<compile_context>
chip_gen: v7x
topology: tpu7x:2x2x1
jax: 0.10.0
libtpu: 0.0.40
codegen_flags: <defaults>
</compile_context>

<pallas_src>
import jax
import jax.numpy as jnp
from jax.experimental import pallas as pl
from jax.experimental.pallas import tpu as pltpu

MAX_LENGTH = 15
HIDDEN = 32
OUTPUT = 64    # vocabulary size
LANE = 128     # TPU lane width; attention-length / gate / vocab axes pad to this
NEG_BIG = -1e30


def attn_decoder_kernel(pre_ref, enc_ref, w_ref, b_ref, hc0_ref, out_ref):
    H, V = HIDDEN, OUTPUT
    T = out_ref.shape[0]

    # Loop-invariant loads (live in vregs across the unrolled recurrence).
    w_ah = w_ref[0 * H:1 * H, :]      # (H,128) attn weight (h half), lane-padded  (bf16)
    w_li = w_ref[1 * H:2 * H, :]      # (H,128) LSTM input->gates [f|i|c|o]        (bf16)
    w_lh = w_ref[2 * H:3 * H, :]      # (H,128) LSTM hidden->gates                 (bf16)
    w_hma = w_ref[3 * H:4 * H, :]     # (H,128) hidden_mapping (ctx half), padded  (bf16)
    w_out = w_ref[4 * H:5 * H, :]     # (H,128) out, lane-padded                   (bf16)
    enc = enc_ref[...]                # (128,H) encoder outputs, zero-row-padded   (bf16)
    b_lstm = b_ref[0:1, :]            # (1,128) bi + bh                            (f32)
    b_out = b_ref[1:2, :]             # (1,128) out bias, pad lanes = -1e30        (f32)

    h = hc0_ref[:, 0:H]               # (1,H) recurrent state carried in vregs
    c = hc0_ref[:, H:2 * H]           # (1,H)

    # Static Python loop == fully unrolled recurrence (T <= MAX_LENGTH); all
    # slice/store indices are static (equivalent to lax.fori_loop(unroll=True)).
    for t in range(T):
        pre = pre_ref[t:t + 1, :]                     # (1,256) hoisted token-only terms
        pre_attn = pre[:, 0:LANE]                     # embeds@W_attn_e + attn_b (pad -1e30)
        pre_hm = pre[:, LANE:LANE + H]                # embeds@W_hm_e + hm_b

        h_b = h.astype(jnp.bfloat16)

        # attn_weights = softmax(attn([embeds|h])) over a 128-padded length axis.
        logits = pre_attn + jnp.dot(h_b, w_ah, preferred_element_type=jnp.float32)
        m = jnp.max(logits, axis=-1, keepdims=True)
        p = jnp.exp(logits - m)                       # padded lanes: exp(-1e30 - m) == 0
        attn_w = p * pl.reciprocal(jnp.sum(p, axis=-1, keepdims=True), approx=True)

        # attn_result = attn_weights @ encoder_outputs (zero-padded rows give 0).
        ctx = jnp.dot(attn_w.astype(jnp.bfloat16), enc,
                      preferred_element_type=jnp.float32)                    # (1,H)

        # lstm_input = tanh(hidden_mapping([embeds|ctx]))  (split-weight form)
        hm = pre_hm + jnp.dot(ctx.astype(jnp.bfloat16), w_hma,
                              preferred_element_type=jnp.float32)[:, 0:H]
        lstm_in = jnp.tanh(hm)                                               # (1,H)

        # LSTM cell: gates = lstm_in@W_li + h@W_lh + b, gate order [f|i|c|o].
        gates = (jnp.dot(lstm_in.astype(jnp.bfloat16), w_li,
                         preferred_element_type=jnp.float32)
                 + jnp.dot(h_b, w_lh, preferred_element_type=jnp.float32)
                 + b_lstm)                                                   # (1,4H)
        sig = jax.nn.sigmoid(gates)                   # one EUP dispatch for f/i/o
        f_g = sig[:, 0:H]
        i_g = sig[:, H:2 * H]
        o_g = sig[:, 3 * H:4 * H]
        c_g = jnp.tanh(gates[:, 2 * H:3 * H])
        c = f_g * c + i_g * c_g
        h = o_g * jnp.tanh(c)

        # output = log_softmax(out(h)); pad lanes carry -1e30 bias -> exp == 0.
        o = jnp.dot(h.astype(jnp.bfloat16), w_out,
                    preferred_element_type=jnp.float32) + b_out              # (1,128)
        om = jnp.max(o, axis=-1, keepdims=True)
        oe = o - om
        logp = oe - jnp.log(jnp.sum(jnp.exp(oe), axis=-1, keepdims=True))

        # One lane-dense (1,256) row per step: [logp(64) | h(32) | c(32) | attn_w(128)].
        out_ref[t:t + 1, :] = jnp.concatenate([logp[:, 0:V], h, c, attn_w], axis=1)


def make_params(key, hidden=HIDDEN, output=OUTPUT, max_length=MAX_LENGTH):
    """Deterministic synthetic params, PyTorch Linear-style uniform init."""
    def linear(k, fan_in, fan_out):
        kw, kb = jax.random.split(k)
        bound = 1.0 / jnp.sqrt(fan_in)
        w = jax.random.uniform(kw, (fan_in, fan_out), jnp.float32, -bound, bound)
        b = jax.random.uniform(kb, (1, fan_out), jnp.float32, -bound, bound)
        return w, b

    ks = jax.random.split(key, 13)
    P = {}
    P["emb"] = jax.random.normal(ks[0], (output, hidden), jnp.float32)

    attn_w, P["attn_b"] = linear(ks[1], 2 * hidden, max_length)
    P["attn_we"], P["attn_wh"] = attn_w[:hidden], attn_w[hidden:]

    hm_w, P["hm_b"] = linear(ks[2], 2 * hidden, hidden)
    P["hm_we"], P["hm_wa"] = hm_w[:hidden], hm_w[hidden:]

    # LSTM: 8 Linears (H -> H); stack gates in order [f, i, c, o]
    wif, bif = linear(ks[3], hidden, hidden)
    wii, bii = linear(ks[4], hidden, hidden)
    wic, bic = linear(ks[5], hidden, hidden)
    wio, bio = linear(ks[6], hidden, hidden)
    whf, bhf = linear(ks[7], hidden, hidden)
    whi, bhi = linear(ks[8], hidden, hidden)
    whc, bhc = linear(ks[9], hidden, hidden)
    who, bho = linear(ks[10], hidden, hidden)
    P["wi"] = jnp.concatenate([wif, wii, wic, wio], axis=1)   # (H, 4H)
    P["bi"] = jnp.concatenate([bif, bii, bic, bio], axis=1)   # (1, 4H)
    P["wh"] = jnp.concatenate([whf, whi, whc, who], axis=1)   # (H, 4H)
    P["bh"] = jnp.concatenate([bhf, bhi, bhc, bho], axis=1)   # (1, 4H)

    P["out_w"], P["out_b"] = linear(ks[11], hidden, output)
    return P


def pack_inputs(P, encoder_outputs, tokens):
    """Host-side packing: token-only precompute, fused/padded weight slabs."""
    H, V, L = HIDDEN, OUTPUT, MAX_LENGTH
    T = int(tokens.shape[0])
    f32 = jnp.float32

    # Token-only work hoisted out of the recurrence (one batched matmul each).
    E = P["emb"][tokens]                                               # (T,H)
    # TODO(synk): nn.Dropout(p=0.1) on embeddings is identity in eval mode;
    # training-mode stochastic dropout is not implemented here.
    attn_we = jnp.pad(P["attn_we"], ((0, 0), (0, LANE - L)))           # (H,128)
    attn_b = jnp.concatenate([P["attn_b"][0],
                              jnp.full((LANE - L,), NEG_BIG, f32)])    # (128,)
    pre_attn = E @ attn_we + attn_b                                    # (T,128)
    pre_hm = E @ P["hm_we"] + P["hm_b"][0]                             # (T,H)
    pre = jnp.concatenate(
        [pre_attn, pre_hm, jnp.zeros((T, LANE - H), f32)], axis=1)     # (T,256)

    # Recurrent-path weight slab in bf16 (f32 accumulation in-kernel).
    w_ah = jnp.pad(P["attn_wh"], ((0, 0), (0, LANE - L)))              # (H,128)
    w_hma = jnp.pad(P["hm_wa"], ((0, 0), (0, LANE - H)))               # (H,128)
    w_out = jnp.pad(P["out_w"], ((0, 0), (0, LANE - V)))               # (H,128)
    w_slab = jnp.concatenate([w_ah, P["wi"], P["wh"], w_hma, w_out],
                             axis=0).astype(jnp.bfloat16)              # (5H,128)

    enc = jnp.pad(encoder_outputs,
                  ((0, LANE - L), (0, 0))).astype(jnp.bfloat16)        # (128,H)

    # Bias slab stays f32: row0 = bi+bh, row1 = out bias (pad lanes -1e30).
    lstm_b = (P["bi"] + P["bh"])[0]                                    # (128,)
    out_b = jnp.concatenate([P["out_b"][0],
                             jnp.full((LANE - V,), NEG_BIG, f32)])     # (128,)
    zeros = jnp.zeros((LANE,), f32)
    biases = jnp.stack([lstm_b, out_b] + [zeros] * 6)                  # (8,128)
    return pre, enc, w_slab, biases


def attn_decoder_decode(tokens, hidden_tuple, encoder_outputs, P):
    """Runs len(tokens) decoder steps (teacher-forced token ids) inside ONE
    pallas_call / ONE program. Each unrolled step reproduces
    AttnDecoderRNN.forward exactly (eval-mode dropout)."""
    T = int(tokens.shape[0])
    tokens = tokens.astype(jnp.int32)
    pre, enc, w_slab, biases = pack_inputs(P, encoder_outputs, tokens)
    h0 = hidden_tuple[0].reshape(1, HIDDEN)
    c0 = hidden_tuple[1].reshape(1, HIDDEN)
    init_hc = jnp.concatenate([h0, c0], axis=1)                        # (1,2H)

    packed = pl.pallas_call(
        attn_decoder_kernel,
        out_shape=jax.ShapeDtypeStruct((T, 2 * LANE), jnp.float32),
        grid=(1,),
        in_specs=[
            pl.BlockSpec((T, 2 * LANE), lambda i: (0, 0)),             # pre slab
            pl.BlockSpec((LANE, HIDDEN), lambda i: (0, 0)),            # enc (padded, bf16)
            pl.BlockSpec((5 * HIDDEN, LANE), lambda i: (0, 0)),        # weight slab (bf16)
            pl.BlockSpec((8, LANE), lambda i: (0, 0)),                 # bias slab
            pl.BlockSpec((1, 2 * HIDDEN), lambda i: (0, 0)),           # [h0 | c0]
        ],
        out_specs=pl.BlockSpec((T, 2 * LANE), lambda i: (0, 0)),
        compiler_params=pltpu.CompilerParams(dimension_semantics=("arbitrary",)),
    )(pre, enc, w_slab, biases, init_hc)

    logp = packed[:, 0:OUTPUT]                                         # (T, V)
    h_all = packed[:, OUTPUT:OUTPUT + HIDDEN]                          # (T, H)
    c_all = packed[:, OUTPUT + HIDDEN:OUTPUT + 2 * HIDDEN]             # (T, H)
    attn = packed[:, LANE:LANE + MAX_LENGTH]                           # (T, L)
    return logp, h_all, c_all, attn


def attn_decoder_forward(token, hidden_tuple, encoder_outputs, P):
    """Single AttnDecoderRNN.forward step (matches PyTorch return shapes)."""
    tokens = jnp.asarray(token, jnp.int32).reshape(1)
    logp, h, c, attn = attn_decoder_decode(tokens, hidden_tuple, encoder_outputs, P)
    return (logp[0:1],
            (h.reshape(1, 1, HIDDEN), c.reshape(1, 1, HIDDEN)),
            attn[0:1])


def reference_step(token, h, c, enc, P):
    """Pure-JAX reference mirroring the PyTorch semantics for one step."""
    embeds = P["emb"][token]
    attn_in = jnp.concatenate([embeds, h])
    logits = attn_in @ jnp.concatenate([P["attn_we"], P["attn_wh"]], 0) + P["attn_b"][0]
    aw = jax.nn.softmax(logits)
    ctx = aw @ enc
    hm_in = jnp.concatenate([embeds, ctx])
    lstm_in = jnp.tanh(hm_in @ jnp.concatenate([P["hm_we"], P["hm_wa"]], 0) + P["hm_b"][0])
    gates = lstm_in @ P["wi"] + P["bi"][0] + h @ P["wh"] + P["bh"][0]
    H = HIDDEN
    f = jax.nn.sigmoid(gates[0:H])
    i = jax.nn.sigmoid(gates[H:2 * H])
    cg = jnp.tanh(gates[2 * H:3 * H])
    o = jax.nn.sigmoid(gates[3 * H:4 * H])
    c_new = f * c + i * cg
    h_new = o * jnp.tanh(c_new)
    out = h_new @ P["out_w"] + P["out_b"][0]
    logp = jax.nn.log_softmax(out)
    return logp, h_new, c_new, aw


if __name__ == "__main__":
    key = jax.random.PRNGKey(0)
    kp, kh, kc, ke, kt = jax.random.split(key, 5)

    params = make_params(kp)
    h0 = jax.random.normal(kh, (1, 1, HIDDEN), jnp.float32)       # previous hidden state
    c0 = jax.random.normal(kc, (1, 1, HIDDEN), jnp.float32)       # previous cell state
    enc = jax.random.normal(ke, (MAX_LENGTH, HIDDEN), jnp.float32)
    tokens = jax.random.randint(kt, (8,), 0, OUTPUT, jnp.int32)   # teacher-forced ids

    # Multi-step decode: entire recurrence inside one pallas_call / one program.
    logp, h_all, c_all, attn = attn_decoder_decode(tokens, (h0, c0), enc, params)
    jax.block_until_ready((logp, h_all, c_all, attn))

    # Per-step check against a pure-JAX reference (chained from kernel outputs so
    # the check verifies both the step math and the in-kernel state carry).
    # Tolerance allows bf16 weight storage / MXU passes + approx EUP reciprocal.
    TOL = dict(atol=5e-3, rtol=5e-3)
    h_prev = h0.reshape(-1)
    c_prev = c0.reshape(-1)
    for s in range(int(tokens.shape[0])):
        r_logp, r_h, r_c, r_aw = reference_step(tokens[s], h_prev, c_prev, enc, params)
        assert jnp.allclose(logp[s], r_logp, **TOL), f"logp mismatch at step {s}"
        assert jnp.allclose(h_all[s], r_h, **TOL), f"h mismatch at step {s}"
        assert jnp.allclose(c_all[s], r_c, **TOL), f"c mismatch at step {s}"
        assert jnp.allclose(attn[s], r_aw, **TOL), f"attn mismatch at step {s}"
        h_prev, c_prev = h_all[s], c_all[s]

    # Single-step wrapper (same return shapes as the PyTorch module's forward).
    logp1, (h1, c1), aw1 = attn_decoder_forward(tokens[0], (h0, c0), enc, params)
    jax.block_until_ready((logp1, h1, c1, aw1))
    assert logp1.shape == (1, OUTPUT) and h1.shape == (1, 1, HIDDEN)
    assert c1.shape == (1, 1, HIDDEN) and aw1.shape == (1, MAX_LENGTH)

    print("KERNEL_OK")
</pallas_src>

<mosaic_0001>
module attributes {stable_mosaic.version = 11 : i64} {
  func.func @attn_decoder_kernel(%arg0: i32, %arg1: memref<8x256xf32, #tpu.memory_space<vmem>>, %arg2: memref<128x32xbf16, #tpu.memory_space<vmem>>, %arg3: memref<160x128xbf16, #tpu.memory_space<vmem>>, %arg4: memref<8x128xf32, #tpu.memory_space<vmem>>, %arg5: memref<1x64xf32, #tpu.memory_space<vmem>>, %arg6: memref<8x256xf32, #tpu.memory_space<vmem>>) attributes {dimension_semantics = [#tpu.dimension_semantics<arbitrary>], iteration_bounds = array<i64: 1>, scalar_prefetch = 0 : i64, scratch_operands = 0 : i64, tpu.core_type = #tpu.core_type<tc>, window_params = [{pipeline_mode = #tpu.pipeline_mode<synchronous>, transform_indices = @transform_0, window_bounds = array<i64: 8, 256>}, {pipeline_mode = #tpu.pipeline_mode<synchronous>, transform_indices = @transform_1, window_bounds = array<i64: 128, 32>}, {pipeline_mode = #tpu.pipeline_mode<synchronous>, transform_indices = @transform_2, window_bounds = array<i64: 160, 128>}, {pipeline_mode = #tpu.pipeline_mode<synchronous>, transform_indices = @transform_3, window_bounds = array<i64: 8, 128>}, {pipeline_mode = #tpu.pipeline_mode<synchronous>, transform_indices = @transform_4, window_bounds = array<i64: 1, 64>}, {pipeline_mode = #tpu.pipeline_mode<synchronous>, transform_indices = @transform_5, window_bounds = array<i64: 8, 256>}]} {
    %c0 = arith.constant 0 : index
    %c0_0 = arith.constant 0 : index
    %0 = vector.load %arg3[%c0, %c0_0] : memref<160x128xbf16, #tpu.memory_space<vmem>>, vector<32x128xbf16>
    %c32 = arith.constant 32 : index
    %c0_1 = arith.constant 0 : index
    %1 = vector.load %arg3[%c32, %c0_1] : memref<160x128xbf16, #tpu.memory_space<vmem>>, vector<32x128xbf16>
    %c64 = arith.constant 64 : index
    %c0_2 = arith.constant 0 : index
    %2 = vector.load %arg3[%c64, %c0_2] : memref<160x128xbf16, #tpu.memory_space<vmem>>, vector<32x128xbf16>
    %c96 = arith.constant 96 : index
    %c0_3 = arith.constant 0 : index
    %3 = vector.load %arg3[%c96, %c0_3] : memref<160x128xbf16, #tpu.memory_space<vmem>>, vector<32x128xbf16>
    %c128 = arith.constant 128 : index
    %c0_4 = arith.constant 0 : index
    %4 = vector.load %arg3[%c128, %c0_4] : memref<160x128xbf16, #tpu.memory_space<vmem>>, vector<32x128xbf16>
    %c0_5 = arith.constant 0 : index
    %c0_6 = arith.constant 0 : index
    %5 = vector.load %arg2[%c0_5, %c0_6] : memref<128x32xbf16, #tpu.memory_space<vmem>>, vector<128x32xbf16>
    %c0_7 = arith.constant 0 : index
    %c0_8 = arith.constant 0 : index
    %6 = vector.load %arg4[%c0_7, %c0_8] : memref<8x128xf32, #tpu.memory_space<vmem>>, vector<1x128xf32>
    %c1 = arith.constant 1 : index
    %c0_9 = arith.constant 0 : index
    %7 = vector.load %arg4[%c1, %c0_9] : memref<8x128xf32, #tpu.memory_space<vmem>>, vector<1x128xf32>
    %c0_10 = arith.constant 0 : index
    %c0_11 = arith.constant 0 : index
    %8 = vector.load %arg5[%c0_10, %c0_11] : memref<1x64xf32, #tpu.memory_space<vmem>>, vector<1x32xf32>
    %c0_12 = arith.constant 0 : index
    %c32_13 = arith.constant 32 : index
    %9 = vector.load %arg5[%c0_12, %c32_13] : memref<1x64xf32, #tpu.memory_space<vmem>>, vector<1x32xf32>
    %c0_14 = arith.constant 0 : index
    %c0_15 = arith.constant 0 : index
    %10 = vector.load %arg1[%c0_14, %c0_15] : memref<8x256xf32, #tpu.memory_space<vmem>>, vector<1x256xf32>
    %11 = vector.extract_strided_slice %10 {offsets = [0, 0], sizes = [1, 128], strides = [1, 1]} : vector<1x256xf32> to vector<1x128xf32>
    %12 = vector.extract_strided_slice %10 {offsets = [0, 128], sizes = [1, 32], strides = [1, 1]} : vector<1x256xf32> to vector<1x32xf32>
    %13 = arith.truncf %8 : vector<1x32xf32> to vector<1x32xbf16>
    %cst = arith.constant dense<0.000000e+00> : vector<1x128xf32>
    %14 = tpu.matmul %13, %0, %cst {dimension_numbers = #tpu.dot_dimension_numbers<[1], [0], [0], [1], [0, 0, 1, 1], [], []>} : vector<1x32xbf16>, vector<32x128xbf16>, vector<1x128xf32> -> vector<1x128xf32>
    %15 = arith.addf %11, %14 : vector<1x128xf32>
    %cst_16 = arith.constant dense<0xFF800000> : vector<1xf32>
    %16 = vector.multi_reduction <maximumf>, %15, %cst_16 [1] : vector<1x128xf32> to vector<1xf32>
    %17 = vector.shape_cast %16 : vector<1xf32> to vector<1x1xf32>
    %18 = vector.broadcast %17 : vector<1x1xf32> to vector<1x128xf32>
    %19 = arith.subf %15, %18 : vector<1x128xf32>
    %20 = math.exp %19 : vector<1x128xf32>
    %cst_17 = arith.constant dense<0.000000e+00> : vector<1xf32>
    %21 = vector.multi_reduction <add>, %20, %cst_17 [1] : vector<1x128xf32> to vector<1xf32>
    %22 = vector.shape_cast %21 : vector<1xf32> to vector<1x1xf32>
    %23 = tpu.reciprocal %22 {approx = true} : vector<1x1xf32> -> vector<1x1xf32>
    %24 = vector.broadcast %23 : vector<1x1xf32> to vector<1x128xf32>
    %25 = arith.mulf %20, %24 : vector<1x128xf32>
    %26 = arith.truncf %25 : vector<1x128xf32> to vector<1x128xbf16>
    %cst_18 = arith.constant dense<0.000000e+00> : vector<1x32xf32>
    %27 = tpu.matmul %26, %5, %cst_18 {dimension_numbers = #tpu.dot_dimension_numbers<[1], [0], [0], [1], [0, 0, 1, 1], [], []>} : vector<1x128xbf16>, vector<128x32xbf16>, vector<1x32xf32> -> vector<1x32xf32>
    %28 = arith.truncf %27 : vector<1x32xf32> to vector<1x32xbf16>
    %cst_19 = arith.constant dense<0.000000e+00> : vector<1x128xf32>
    %29 = tpu.matmul %28, %3, %cst_19 {dimension_numbers = #tpu.dot_dimension_numbers<[1], [0], [0], [1], [0, 0, 1, 1], [], []>} : vector<1x32xbf16>, vector<32x128xbf16>, vector<1x128xf32> -> vector<1x128xf32>
    %30 = vector.extract_strided_slice %29 {offsets = [0, 0], sizes = [1, 32], strides = [1, 1]} : vector<1x128xf32> to vector<1x32xf32>
    %31 = arith.addf %12, %30 : vector<1x32xf32>
    %32 = math.tanh %31 : vector<1x32xf32>
    %33 = arith.truncf %32 : vector<1x32xf32> to vector<1x32xbf16>
    %cst_20 = arith.constant dense<0.000000e+00> : vector<1x128xf32>
    %34 = tpu.matmul %33, %1, %cst_20 {dimension_numbers = #tpu.dot_dimension_numbers<[1], [0], [0], [1], [0, 0, 1, 1], [], []>} : vector<1x32xbf16>, vector<32x128xbf16>, vector<1x128xf32> -> vector<1x128xf32>
    %cst_21 = arith.constant dense<0.000000e+00> : vector<1x128xf32>
    %35 = tpu.matmul %13, %2, %cst_21 {dimension_numbers = #tpu.dot_dimension_numbers<[1], [0], [0], [1], [0, 0, 1, 1], [], []>} : vector<1x32xbf16>, vector<32x128xbf16>, vector<1x128xf32> -> vector<1x128xf32>
    %36 = arith.addf %34, %35 : vector<1x128xf32>
    %37 = arith.addf %36, %6 : vector<1x128xf32>
    %38 = arith.negf %37 : vector<1x128xf32>
    %39 = math.exp %38 : vector<1x128xf32>
    %cst_22 = arith.constant 1.000000e+00 : f32
    %40 = vector.broadcast %cst_22 : f32 to vector<1x128xf32>
    %41 = arith.addf %40, %39 : vector<1x128xf32>
    %42 = arith.divf %40, %41 : vector<1x128xf32>
    %43 = vector.extract_strided_slice %42 {offsets = [0, 0], sizes = [1, 32], strides = [1, 1]} : vector<1x128xf32> to vector<1x32xf32>
    %44 = vector.extract_strided_slice %42 {offsets = [0, 32], sizes = [1, 32], strides = [1, 1]} : vector<1x128xf32> to vector<1x32xf32>
    %45 = vector.extract_strided_slice %42 {offsets = [0, 96], sizes = [1, 32], strides = [1, 1]} : vector<1x128xf32> to vector<1x32xf32>
    %46 = vector.extract_strided_slice %37 {offsets = [0, 64], sizes = [1, 32], strides = [1, 1]} : vector<1x128xf32> to vector<1x32xf32>
    %47 = math.tanh %46 : vector<1x32xf32>
    %48 = arith.mulf %43, %9 : vector<1x32xf32>
    %49 = arith.mulf %44, %47 : vector<1x32xf32>
    %50 = arith.addf %48, %49 : vector<1x32xf32>
    %51 = math.tanh %50 : vector<1x32xf32>
    %52 = arith.mulf %45, %51 : vector<1x32xf32>
    %53 = arith.truncf %52 : vector<1x32xf32> to vector<1x32xbf16>
    %cst_23 = arith.constant dense<0.000000e+00> : vector<1x128xf32>
    %54 = tpu.matmul %53, %4, %cst_23 {dimension_numbers = #tpu.dot_dimension_numbers<[1], [0], [0], [1], [0, 0, 1, 1], [], []>} : vector<1x32xbf16>, vector<32x128xbf16>, vector<1x128xf32> -> vector<1x128xf32>
    %55 = arith.addf %54, %7 : vector<1x128xf32>
    %cst_24 = arith.constant dense<0xFF800000> : vector<1xf32>
    %56 = vector.multi_reduction <maximumf>, %55, %cst_24 [1] : vector<1x128xf32> to vector<1xf32>
    %57 = vector.shape_cast %56 : vector<1xf32> to vector<1x1xf32>
    %58 = vector.broadcast %57 : vector<1x1xf32> to vector<1x128xf32>
    %59 = arith.subf %55, %58 : vector<1x128xf32>
    %60 = math.exp %59 : vector<1x128xf32>
    %cst_25 = arith.constant dense<0.000000e+00> : vector<1xf32>
    %61 = vector.multi_reduction <add>, %60, %cst_25 [1] : vector<1x128xf32> to vector<1xf32>
    %62 = vector.shape_cast %61 : vector<1xf32> to vector<1x1xf32>
    %63 = math.log %62 : vector<1x1xf32>
    %64 = vector.broadcast %63 : vector<1x1xf32> to vector<1x128xf32>
    %65 = arith.subf %59, %64 : vector<1x128xf32>
    %66 = vector.extract_strided_slice %65 {offsets = [0, 0], sizes = [1, 64], strides = [1, 1]} : vector<1x128xf32> to vector<1x64xf32>
    %67 = tpu.concatenate %66, %52, %50, %25 in 1 : vector<1x64xf32>, vector<1x32xf32>, vector<1x32xf32>, vector<1x128xf32> -> vector<1x256xf32>
    %c0_26 = arith.constant 0 : index
    %c0_27 = arith.constant 0 : index
    %68 = vector.load %arg6[%c0_26, %c0_27] : memref<8x256xf32, #tpu.memory_space<vmem>>, vector<1x256xf32>
    tpu.vector_store %arg6[%c0_26, %c0_27], %67 {strides = array<i32>} : memref<8x256xf32, #tpu.memory_space<vmem>>, vector<1x256xf32>,
    %c1_28 = arith.constant 1 : index
    %c0_29 = arith.constant 0 : index
    %69 = vector.load %arg1[%c1_28, %c0_29] : memref<8x256xf32, #tpu.memory_space<vmem>>, vector<1x256xf32>
    %70 = vector.extract_strided_slice %69 {offsets = [0, 0], sizes = [1, 128], strides = [1, 1]} : vector<1x256xf32> to vector<1x128xf32>
    %71 = vector.extract_strided_slice %69 {offsets = [0, 128], sizes = [1, 32], strides = [1, 1]} : vector<1x256xf32> to vector<1x32xf32>
    %72 = arith.truncf %52 : vector<1x32xf32> to vector<1x32xbf16>
    %cst_30 = arith.constant dense<0.000000e+00> : vector<1x128xf32>
    %73 = tpu.matmul %72, %0, %cst_30 {dimension_numbers = #tpu.dot_dimension_numbers<[1], [0], [0], [1], [0, 0, 1, 1], [], []>} : vector<1x32xbf16>, vector<32x128xbf16>, vector<1x128xf32> -> vector<1x128xf32>
    %74 = arith.addf %70, %73 : vector<1x128xf32>
    %cst_31 = arith.constant dense<0xFF800000> : vector<1xf32>
    %75 = vector.multi_reduction <maximumf>, %74, %cst_31 [1] : vector<1x128xf32> to vector<1xf32>
    %76 = vector.shape_cast %75 : vector<1xf32> to vector<1x1xf32>
    %77 = vector.broadcast %76 : vector<1x1xf32> to vector<1x128xf32>
    %78 = arith.subf %74, %77 : vector<1x128xf32>
    %79 = math.exp %78 : vector<1x128xf32>
    %cst_32 = arith.constant dense<0.000000e+00> : vector<1xf32>
    %80 = vector.multi_reduction <add>, %79, %cst_32 [1] : vector<1x128xf32> to vector<1xf32>
    %81 = vector.shape_cast %80 : vector<1xf32> to vector<1x1xf32>
    %82 = tpu.reciprocal %81 {approx = true} : vector<1x1xf32> -> vector<1x1xf32>
    %83 = vector.broadcast %82 : vector<1x1xf32> to vector<1x128xf32>
    %84 = arith.mulf %79, %83 : vector<1x128xf32>
    %85 = arith.truncf %84 : vector<1x128xf32> to vector<1x128xbf16>
    %cst_33 = arith.constant dense<0.000000e+00> : vector<1x32xf32>
    %86 = tpu.matmul %85, %5, %cst_33 {dimension_numbers = #tpu.dot_dimension_numbers<[1], [0], [0], [1], [0, 0, 1, 1], [], []>} : vector<1x128xbf16>, vector<128x32xbf16>, vector<1x32xf32> -> vector<1x32xf32>
    %87 = arith.truncf %86 : vector<1x32xf32> to vector<1x32xbf16>
    %cst_34 = arith.constant dense<0.000000e+00> : vector<1x128xf32>
    %88 = tpu.matmul %87, %3, %cst_34 {dimension_numbers = #tpu.dot_dimension_numbers<[1], [0], [0], [1], [0, 0, 1, 1], [], []>} : vector<1x32xbf16>, vector<32x128xbf16>, vector<1x128xf32> -> vector<1x128xf32>
    %89 = vector.extract_strided_slice %88 {offsets = [0, 0], sizes = [1, 32], strides = [1, 1]} : vector<1x128xf32> to vector<1x32xf32>
    %90 = arith.addf %71, %89 : vector<1x32xf32>
    %91 = math.tanh %90 : vector<1x32xf32>
    %92 = arith.truncf %91 : vector<1x32xf32> to vector<1x32xbf16>
    %cst_35 = arith.constant dense<0.000000e+00> : vector<1x128xf32>
    %93 = tpu.matmul %92, %1, %cst_35 {dimension_numbers = #tpu.dot_dimension_numbers<[1], [0], [0], [1], [0, 0, 1, 1], [], []>} : vector<1x32xbf16>, vector<32x128xbf16>, vector<1x128xf32> -> vector<1x128xf32>
    %cst_36 = arith.constant dense<0.000000e+00> : vector<1x128xf32>
    %94 = tpu.matmul %72, %2, %cst_36 {dimension_numbers = #tpu.dot_dimension_numbers<[1], [0], [0], [1], [0, 0, 1, 1], [], []>} : vector<1x32xbf16>, vector<32x128xbf16>, vector<1x128xf32> -> vector<1x128xf32>
    %95 = arith.addf %93, %94 : vector<1x128xf32>
    %96 = arith.addf %95, %6 : vector<1x128xf32>
    %97 = arith.negf %96 : vector<1x128xf32>
    %98 = math.exp %97 : vector<1x128xf32>
    %cst_37 = arith.constant 1.000000e+00 : f32
    %99 = vector.broadcast %cst_37 : f32 to vector<1x128xf32>
    %100 = arith.addf %99, %98 : vector<1x128xf32>
    %101 = arith.divf %99, %100 : vector<1x128xf32>
    %102 = vector.extract_strided_slice %101 {offsets = [0, 0], sizes = [1, 32], strides = [1, 1]} : vector<1x128xf32> to vector<1x32xf32>
    %103 = vector.extract_strided_slice %101 {offsets = [0, 32], sizes = [1, 32], strides = [1, 1]} : vector<1x128xf32> to vector<1x32xf32>
    %104 = vector.extract_strided_slice %101 {offsets = [0, 96], sizes = [1, 32], strides = [1, 1]} : vector<1x128xf32> to vector<1x32xf32>
    %105 = vector.extract_strided_slice %96 {offsets = [0, 64], sizes = [1, 32], strides = [1, 1]} : vector<1x128xf32> to vector<1x32xf32>
    %106 = math.tanh %105 : vector<1x32xf32>
    %107 = arith.mulf %102, %50 : vector<1x32xf32>
    %108 = arith.mulf %103, %106 : vector<1x32xf32>
    %109 = arith.addf %107, %108 : vector<1x32xf32>
    %110 = math.tanh %109 : vector<1x32xf32>
    %111 = arith.mulf %104, %110 : vector<1x32xf32>
    %112 = arith.truncf %111 : vector<1x32xf32> to vector<1x32xbf16>
    %cst_38 = arith.constant dense<0.000000e+00> : vector<1x128xf32>
    %113 = tpu.matmul %112, %4, %cst_38 {dimension_numbers = #tpu.dot_dimension_numbers<[1], [0], [0], [1], [0, 0, 1, 1], [], []>} : vector<1x32xbf16>, vector<32x128xbf16>, vector<1x128xf32> -> vector<1x128xf32>
    %114 = arith.addf %113, %7 : vector<1x128xf32>
    %cst_39 = arith.constant dense<0xFF800000> : vector<1xf32>
    %115 = vector.multi_reduction <maximumf>, %114, %cst_39 [1] : vector<1x128xf32> to vector<1xf32>
    %116 = vector.shape_cast %115 : vector<1xf32> to vector<1x1xf32>
    %117 = vector.broadcast %116 : vector<1x1xf32> to vector<1x128xf32>
    %118 = arith.subf %114, %117 : vector<1x128xf32>
    %119 = math.exp %118 : vector<1x128xf32>
    %cst_40 = arith.constant dense<0.000000e+00> : vector<1xf32>
    %120 = vector.multi_reduction <add>, %119, %cst_40 [1] : vector<1x128xf32> to vector<1xf32>
    %121 = vector.shape_cast %120 : vector<1xf32> to vector<1x1xf32>
    %122 = math.log %121 : vector<1x1xf32>
    %123 = vector.broadcast %122 : vector<1x1xf32> to vector<1x128xf32>
    %124 = arith.subf %118, %123 : vector<1x128xf32>
    %125 = vector.extract_strided_slice %124 {offsets = [0, 0], sizes = [1, 64], strides = [1, 1]} : vector<1x128xf32> to vector<1x64xf32>
    %126 = tpu.concatenate %125, %111, %109, %84 in 1 : vector<1x64xf32>, vector<1x32xf32>, vector<1x32xf32>, vector<1x128xf32> -> vector<1x256xf32>
    %c1_41 = arith.constant 1 : index
    %c0_42 = arith.constant 0 : index
    %127 = vector.load %arg6[%c1_41, %c0_42] : memref<8x256xf32, #tpu.memory_space<vmem>>, vector<1x256xf32>
    tpu.vector_store %arg6[%c1_41, %c0_42], %126 {strides = array<i32>} : memref<8x256xf32, #tpu.memory_space<vmem>>, vector<1x256xf32>,
    %c2 = arith.constant 2 : index
    %c0_43 = arith.constant 0 : index
    %128 = vector.load %arg1[%c2, %c0_43] : memref<8x256xf32, #tpu.memory_space<vmem>>, vector<1x256xf32>
    %129 = vector.extract_strided_slice %128 {offsets = [0, 0], sizes = [1, 128], strides = [1, 1]} : vector<1x256xf32> to vector<1x128xf32>
    %130 = vector.extract_strided_slice %128 {offsets = [0, 128], sizes = [1, 32], strides = [1, 1]} : vector<1x256xf32> to vector<1x32xf32>
    %131 = arith.truncf %111 : vector<1x32xf32> to vector<1x32xbf16>
    %cst_44 = arith.constant dense<0.000000e+00> : vector<1x128xf32>
    %132 = tpu.matmul %131, %0, %cst_44 {dimension_numbers = #tpu.dot_dimension_numbers<[1], [0], [0], [1], [0, 0, 1, 1], [], []>} : vector<1x32xbf16>, vector<32x128xbf16>, vector<1x128xf32> -> vector<1x128xf32>
    %133 = arith.addf %129, %132 : vector<1x128xf32>
    %cst_45 = arith.constant dense<0xFF800000> : vector<1xf32>
    %134 = vector.multi_reduction <maximumf>, %133, %cst_45 [1] : vector<1x128xf32> to vector<1xf32>
    %135 = vector.shape_cast %134 : vector<1xf32> to vector<1x1xf32>
    %136 = vector.broadcast %135 : vector<1x1xf32> to vector<1x128xf32>
    %137 = arith.subf %133, %136 : vector<1x128xf32>
    %138 = math.exp %137 : vector<1x128xf32>
    %cst_46 = arith.constant dense<0.000000e+00> : vector<1xf32>
    %139 = vector.multi_reduction <add>, %138, %cst_46 [1] : vector<1x128xf32> to vector<1xf32>
    %140 = vector.shape_cast %139 : vector<1xf32> to vector<1x1xf32>
    %141 = tpu.reciprocal %140 {approx = true} : vector<1x1xf32> -> vector<1x1xf32>
    %142 = vector.broadcast %141 : vector<1x1xf32> to vector<1x128xf32>
    %143 = arith.mulf %138, %142 : vector<1x128xf32>
    %144 = arith.truncf %143 : vector<1x128xf32> to vector<1x128xbf16>
    %cst_47 = arith.constant dense<0.000000e+00> : vector<1x32xf32>
    %145 = tpu.matmul %144, %5, %cst_47 {dimension_numbers = #tpu.dot_dimension_numbers<[1], [0], [0], [1], [0, 0, 1, 1], [], []>} : vector<1x128xbf16>, vector<128x32xbf16>, vector<1x32xf32> -> vector<1x32xf32>
    %146 = arith.truncf %145 : vector<1x32xf32> to vector<1x32xbf16>
    %cst_48 = arith.constant dense<0.000000e+00> : vector<1x128xf32>
    %147 = tpu.matmul %146, %3, %cst_48 {dimension_numbers = #tpu.dot_dimension_numbers<[1], [0], [0], [1], [0, 0, 1, 1], [], []>} : vector<1x32xbf16>, vector<32x128xbf16>, vector<1x128xf32> -> vector<1x128xf32>
    %148 = vector.extract_strided_slice %147 {offsets = [0, 0], sizes = [1, 32], strides = [1, 1]} : vector<1x128xf32> to vector<1x32xf32>
    %149 = arith.addf %130, %148 : vector<1x32xf32>
    %150 = math.tanh %149 : vector<1x32xf32>
    %151 = arith.truncf %150 : vector<1x32xf32> to vector<1x32xbf16>
    %cst_49 = arith.constant dense<0.000000e+00> : vector<1x128xf32>
    %152 = tpu.matmul %151, %1, %cst_49 {dimension_numbers = #tpu.dot_dimension_numbers<[1], [0], [0], [1], [0, 0, 1, 1], [], []>} : vector<1x32xbf16>, vector<32x128xbf16>, vector<1x128xf32> -> vector<1x128xf32>
    %cst_50 = arith.constant dense<0.000000e+00> : vector<1x128xf32>
    %153 = tpu.matmul %131, %2, %cst_50 {dimension_numbers = #tpu.dot_dimension_numbers<[1], [0], [0], [1], [0, 0, 1, 1], [], []>} : vector<1x32xbf16>, vector<32x128xbf16>, vector<1x128xf32> -> vector<1x128xf32>
    %154 = arith.addf %152, %153 : vector<1x128xf32>
    %155 = arith.addf %154, %6 : vector<1x128xf32>
    %156 = arith.negf %155 : vector<1x128xf32>
    %157 = math.exp %156 : vector<1x128xf32>
    %cst_51 = arith.constant 1.000000e+00 : f32
    %158 = vector.broadcast %cst_51 : f32 to vector<1x128xf32>
    %159 = arith.addf %158, %157 : vector<1x128xf32>
    %160 = arith.divf %158, %159 : vector<1x128xf32>
    %161 = vector.extract_strided_slice %160 {offsets = [0, 0], sizes = [1, 32], strides = [1, 1]} : vector<1x128xf32> to vector<1x32xf32>
    %162 = vector.extract_strided_slice %160 {offsets = [0, 32], sizes = [1, 32], strides = [1, 1]} : vector<1x128xf32> to vector<1x32xf32>
    %163 = vector.extract_strided_slice %160 {offsets = [0, 96], sizes = [1, 32], strides = [1, 1]} : vector<1x128xf32> to vector<1x32xf32>
    %164 = vector.extract_strided_slice %155 {offsets = [0, 64], sizes = [1, 32], strides = [1, 1]} : vector<1x128xf32> to vector<1x32xf32>
    %165 = math.tanh %164 : vector<1x32xf32>
    %166 = arith.mulf %161, %109 : vector<1x32xf32>
    %167 = arith.mulf %162, %165 : vector<1x32xf32>
    %168 = arith.addf %166, %167 : vector<1x32xf32>
    %169 = math.tanh %168 : vector<1x32xf32>
    %170 = arith.mulf %163, %169 : vector<1x32xf32>
    %171 = arith.truncf %170 : vector<1x32xf32> to vector<1x32xbf16>
    %cst_52 = arith.constant dense<0.000000e+00> : vector<1x128xf32>
    %172 = tpu.matmul %171, %4, %cst_52 {dimension_numbers = #tpu.dot_dimension_numbers<[1], [0], [0], [1], [0, 0, 1, 1], [], []>} : vector<1x32xbf16>, vector<32x128xbf16>, vector<1x128xf32> -> vector<1x128xf32>
    %173 = arith.addf %172, %7 : vector<1x128xf32>
    %cst_53 = arith.constant dense<0xFF800000> : vector<1xf32>
    %174 = vector.multi_reduction <maximumf>, %173, %cst_53 [1] : vector<1x128xf32> to vector<1xf32>
    %175 = vector.shape_cast %174 : vector<1xf32> to vector<1x1xf32>
    %176 = vector.broadcast %175 : vector<1x1xf32> to vector<1x128xf32>
    %177 = arith.subf %173, %176 : vector<1x128xf32>
    %178 = math.exp %177 : vector<1x128xf32>
    %cst_54 = arith.constant dense<0.000000e+00> : vector<1xf32>
    %179 = vector.multi_reduction <add>, %178, %cst_54 [1] : vector<1x128xf32> to vector<1xf32>
    %180 = vector.shape_cast %179 : vector<1xf32> to vector<1x1xf32>
    %181 = math.log %180 : vector<1x1xf32>
    %182 = vector.broadcast %181 : vector<1x1xf32> to vector<1x128xf32>
    %183 = arith.subf %177, %182 : vector<1x128xf32>
    %184 = vector.extract_strided_slice %183 {offsets = [0, 0], sizes = [1, 64], strides = [1, 1]} : vector<1x128xf32> to vector<1x64xf32>
    %185 = tpu.concatenate %184, %170, %168, %143 in 1 : vector<1x64xf32>, vector<1x32xf32>, vector<1x32xf32>, vector<1x128xf32> -> vector<1x256xf32>
    %c2_55 = arith.constant 2 : index
    %c0_56 = arith.constant 0 : index
    %186 = vector.load %arg6[%c2_55, %c0_56] : memref<8x256xf32, #tpu.memory_space<vmem>>, vector<1x256xf32>
    tpu.vector_store %arg6[%c2_55, %c0_56], %185 {strides = array<i32>} : memref<8x256xf32, #tpu.memory_space<vmem>>, vector<1x256xf32>,
    %c3 = arith.constant 3 : index
    %c0_57 = arith.constant 0 : index
    %187 = vector.load %arg1[%c3, %c0_57] : memref<8x256xf32, #tpu.memory_space<vmem>>, vector<1x256xf32>
    %188 = vector.extract_strided_slice %187 {offsets = [0, 0], sizes = [1, 128], strides = [1, 1]} : vector<1x256xf32> to vector<1x128xf32>
    %189 = vector.extract_strided_slice %187 {offsets = [0, 128], sizes = [1, 32], strides = [1, 1]} : vector<1x256xf32> to vector<1x32xf32>
    %190 = arith.truncf %170 : vector<1x32xf32> to vector<1x32xbf16>
    %cst_58 = arith.constant dense<0.000000e+00> : vector<1x128xf32>
    %191 = tpu.matmul %190, %0, %cst_58 {dimension_numbers = #tpu.dot_dimension_numbers<[1], [0], [0], [1], [0, 0, 1, 1], [], []>} : vector<1x32xbf16>, vector<32x128xbf16>, vector<1x128xf32> -> vector<1x128xf32>
    %192 = arith.addf %188, %191 : vector<1x128xf32>
    %cst_59 = arith.constant dense<0xFF800000> : vector<1xf32>
    %193 = vector.multi_reduction <maximumf>, %192, %cst_59 [1] : vector<1x128xf32> to vector<1xf32>
    %194 = vector.shape_cast %193 : vector<1xf32> to vector<1x1xf32>
    %195 = vector.broadcast %194 : vector<1x1xf32> to vector<1x128xf32>
    %196 = arith.subf %192, %195 : vector<1x128xf32>
    %197 = math.exp %196 : vector<1x128xf32>
    %cst_60 = arith.constant dense<0.000000e+00> : vector<1xf32>
    %198 = vector.multi_reduction <add>, %197, %cst_60 [1] : vector<1x128xf32> to vector<1xf32>
    %199 = vector.shape_cast %198 : vector<1xf32> to vector<1x1xf32>
    %200 = tpu.reciprocal %199 {approx = true} : vector<1x1xf32> -> vector<1x1xf32>
    %201 = vector.broadcast %200 : vector<1x1xf32> to vector<1x128xf32>
    %202 = arith.mulf %197, %201 : vector<1x128xf32>
    %203 = arith.truncf %202 : vector<1x128xf32> to vector<1x128xbf16>
    %cst_61 = arith.constant dense<0.000000e+00> : vector<1x32xf32>
    %204 = tpu.matmul %203, %5, %cst_61 {dimension_numbers = #tpu.dot_dimension_numbers<[1], [0], [0], [1], [0, 0, 1, 1], [], []>} : vector<1x128xbf16>, vector<128x32xbf16>, vector<1x32xf32> -> vector<1x32xf32>
    %205 = arith.truncf %204 : vector<1x32xf32> to vector<1x32xbf16>
    %cst_62 = arith.constant dense<0.000000e+00> : vector<1x128xf32>
    %206 = tpu.matmul %205, %3, %cst_62 {dimension_numbers = #tpu.dot_dimension_numbers<[1], [0], [0], [1], [0, 0, 1, 1], [], []>} : vector<1x32xbf16>, vector<32x128xbf16>, vector<1x128xf32> -> vector<1x128xf32>
    %207 = vector.extract_strided_slice %206 {offsets = [0, 0], sizes = [1, 32], strides = [1, 1]} : vector<1x128xf32> to vector<1x32xf32>
    %208 = arith.addf %189, %207 : vector<1x32xf32>
    %209 = math.tanh %208 : vector<1x32xf32>
    %210 = arith.truncf %209 : vector<1x32xf32> to vector<1x32xbf16>
    %cst_63 = arith.constant dense<0.000000e+00> : vector<1x128xf32>
    %211 = tpu.matmul %210, %1, %cst_63 {dimension_numbers = #tpu.dot_dimension_numbers<[1], [0], [0], [1], [0, 0, 1, 1], [], []>} : vector<1x32xbf16>, vector<32x128xbf16>, vector<1x128xf32> -> vector<1x128xf32>
    %cst_64 = arith.constant dense<0.000000e+00> : vector<1x128xf32>
    %212 = tpu.matmul %190, %2, %cst_64 {dimension_numbers = #tpu.dot_dimension_numbers<[1], [0], [0], [1], [0, 0, 1, 1], [], []>} : vector<1x32xbf16>, vector<32x128xbf16>, vector<1x128xf32> -> vector<1x128xf32>
    %213 = arith.addf %211, %212 : vector<1x128xf32>
    %214 = arith.addf %213, %6 : vector<1x128xf32>
    %215 = arith.negf %214 : vector<1x128xf32>
    %216 = math.exp %215 : vector<1x128xf32>
    %cst_65 = arith.constant 1.000000e+00 : f32
    %217 = vector.broadcast %cst_65 : f32 to vector<1x128xf32>
    %218 = arith.addf %217, %216 : vector<1x128xf32>
    %219 = arith.divf %217, %218 : vector<1x128xf32>
    %220 = vector.extract_strided_slice %219 {offsets = [0, 0], sizes = [1, 32], strides = [1, 1]} : vector<1x128xf32> to vector<1x32xf32>
    %221 = vector.extract_strided_slice %219 {offsets = [0, 32], sizes = [1, 32], strides = [1, 1]} : vector<1x128xf32> to vector<1x32xf32>
    %222 = vector.extract_strided_slice %219 {offsets = [0, 96], sizes = [1, 32], strides = [1, 1]} : vector<1x128xf32> to vector<1x32xf32>
    %223 = vector.extract_strided_slice %214 {offsets = [0, 64], sizes = [1, 32], strides = [1, 1]} : vector<1x128xf32> to vector<1x32xf32>
    %224 = math.tanh %223 : vector<1x32xf32>
    %225 = arith.mulf %220, %168 : vector<1x32xf32>
    %226 = arith.mulf %221, %224 : vector<1x32xf32>
    %227 = arith.addf %225, %226 : vector<1x32xf32>
    %228 = math.tanh %227 : vector<1x32xf32>
    %229 = arith.mulf %222, %228 : vector<1x32xf32>
    %230 = arith.truncf %229 : vector<1x32xf32> to vector<1x32xbf16>
    %cst_66 = arith.constant dense<0.000000e+00> : vector<1x128xf32>
    %231 = tpu.matmul %230, %4, %cst_66 {dimension_numbers = #tpu.dot_dimension_numbers<[1], [0], [0], [1], [0, 0, 1, 1], [], []>} : vector<1x32xbf16>, vector<32x128xbf16>, vector<1x128xf32> -> vector<1x128xf32>
    %232 = arith.addf %231, %7 : vector<1x128xf32>
    %cst_67 = arith.constant dense<0xFF800000> : vector<1xf32>
    %233 = vector.multi_reduction <maximumf>, %232, %cst_67 [1] : vector<1x128xf32> to vector<1xf32>
    %234 = vector.shape_cast %233 : vector<1xf32> to vector<1x1xf32>
    %235 = vector.broadcast %234 : vector<1x1xf32> to vector<1x128xf32>
    %236 = arith.subf %232, %235 : vector<1x128xf32>
    %237 = math.exp %236 : vector<1x128xf32>
    %cst_68 = arith.constant dense<0.000000e+00> : vector<1xf32>
    %238 = vector.multi_reduction <add>, %237, %cst_68 [1] : vector<1x128xf32> to vector<1xf32>
    %239 = vector.shape_cast %238 : vector<1xf32> to vector<1x1xf32>
    %240 = math.log %239 : vector<1x1xf32>
    %241 = vector.broadcast %240 : vector<1x1xf32> to vector<1x128xf32>
    %242 = arith.subf %236, %241 : vector<1x128xf32>
    %243 = vector.extract_strided_slice %242 {offsets = [0, 0], sizes = [1, 64], strides = [1, 1]} : vector<1x128xf32> to vector<1x64xf32>
    %244 = tpu.concatenate %243, %229, %227, %202 in 1 : vector<1x64xf32>, vector<1x32xf32>, vector<1x32xf32>, vector<1x128xf32> -> vector<1x256xf32>
    %c3_69 = arith.constant 3 : index
    %c0_70 = arith.constant 0 : index
    %245 = vector.load %arg6[%c3_69, %c0_70] : memref<8x256xf32, #tpu.memory_space<vmem>>, vector<1x256xf32>
    tpu.vector_store %arg6[%c3_69, %c0_70], %244 {strides = array<i32>} : memref<8x256xf32, #tpu.memory_space<vmem>>, vector<1x256xf32>,
    %c4 = arith.constant 4 : index
    %c0_71 = arith.constant 0 : index
    %246 = vector.load %arg1[%c4, %c0_71] : memref<8x256xf32, #tpu.memory_space<vmem>>, vector<1x256xf32>
    %247 = vector.extract_strided_slice %246 {offsets = [0, 0], sizes = [1, 128], strides = [1, 1]} : vector<1x256xf32> to vector<1x128xf32>
    %248 = vector.extract_strided_slice %246 {offsets = [0, 128], sizes = [1, 32], strides = [1, 1]} : vector<1x256xf32> to vector<1x32xf32>
    %249 = arith.truncf %229 : vector<1x32xf32> to vector<1x32xbf16>
    %cst_72 = arith.constant dense<0.000000e+00> : vector<1x128xf32>
    %250 = tpu.matmul %249, %0, %cst_72 {dimension_numbers = #tpu.dot_dimension_numbers<[1], [0], [0], [1], [0, 0, 1, 1], [], []>} : vector<1x32xbf16>, vector<32x128xbf16>, vector<1x128xf32> -> vector<1x128xf32>
    %251 = arith.addf %247, %250 : vector<1x128xf32>
    %cst_73 = arith.constant dense<0xFF800000> : vector<1xf32>
    %252 = vector.multi_reduction <maximumf>, %251, %cst_73 [1] : vector<1x128xf32> to vector<1xf32>
    %253 = vector.shape_cast %252 : vector<1xf32> to vector<1x1xf32>
    %254 = vector.broadcast %253 : vector<1x1xf32> to vector<1x128xf32>
    %255 = arith.subf %251, %254 : vector<1x128xf32>
    %256 = math.exp %255 : vector<1x128xf32>
    %cst_74 = arith.constant dense<0.000000e+00> : vector<1xf32>
    %257 = vector.multi_reduction <add>, %256, %cst_74 [1] : vector<1x128xf32> to vector<1xf32>
    %258 = vector.shape_cast %257 : vector<1xf32> to vector<1x1xf32>
    %259 = tpu.reciprocal %258 {approx = true} : vector<1x1xf32> -> vector<1x1xf32>
    %260 = vector.broadcast %259 : vector<1x1xf32> to vector<1x128xf32>
    %261 = arith.mulf %256, %260 : vector<1x128xf32>
    %262 = arith.truncf %261 : vector<1x128xf32> to vector<1x128xbf16>
    %cst_75 = arith.constant dense<0.000000e+00> : vector<1x32xf32>
    %263 = tpu.matmul %262, %5, %cst_75 {dimension_numbers = #tpu.dot_dimension_numbers<[1], [0], [0], [1], [0, 0, 1, 1], [], []>} : vector<1x128xbf16>, vector<128x32xbf16>, vector<1x32xf32> -> vector<1x32xf32>
    %264 = arith.truncf %263 : vector<1x32xf32> to vector<1x32xbf16>
    %cst_76 = arith.constant dense<0.000000e+00> : vector<1x128xf32>
    %265 = tpu.matmul %264, %3, %cst_76 {dimension_numbers = #tpu.dot_dimension_numbers<[1], [0], [0], [1], [0, 0, 1, 1], [], []>} : vector<1x32xbf16>, vector<32x128xbf16>, vector<1x128xf32> -> vector<1x128xf32>
    %266 = vector.extract_strided_slice %265 {offsets = [0, 0], sizes = [1, 32], strides = [1, 1]} : vector<1x128xf32> to vector<1x32xf32>
    %267 = arith.addf %248, %266 : vector<1x32xf32>
    %268 = math.tanh %267 : vector<1x32xf32>
    %269 = arith.truncf %268 : vector<1x32xf32> to vector<1x32xbf16>
    %cst_77 = arith.constant dense<0.000000e+00> : vector<1x128xf32>
    %270 = tpu.matmul %269, %1, %cst_77 {dimension_numbers = #tpu.dot_dimension_numbers<[1], [0], [0], [1], [0, 0, 1, 1], [], []>} : vector<1x32xbf16>, vector<32x128xbf16>, vector<1x128xf32> -> vector<1x128xf32>
    %cst_78 = arith.constant dense<0.000000e+00> : vector<1x128xf32>
    %271 = tpu.matmul %249, %2, %cst_78 {dimension_numbers = #tpu.dot_dimension_numbers<[1], [0], [0], [1], [0, 0, 1, 1], [], []>} : vector<1x32xbf16>, vector<32x128xbf16>, vector<1x128xf32> -> vector<1x128xf32>
    %272 = arith.addf %270, %271 : vector<1x128xf32>
    %273 = arith.addf %272, %6 : vector<1x128xf32>
    %274 = arith.negf %273 : vector<1x128xf32>
    %275 = math.exp %274 : vector<1x128xf32>
    %cst_79 = arith.constant 1.000000e+00 : f32
    %276 = vector.broadcast %cst_79 : f32 to vector<1x128xf32>
    %277 = arith.addf %276, %275 : vector<1x128xf32>
    %278 = arith.divf %276, %277 : vector<1x128xf32>
    %279 = vector.extract_strided_slice %278 {offsets = [0, 0], sizes = [1, 32], strides = [1, 1]} : vector<1x128xf32> to vector<1x32xf32>
    %280 = vector.extract_strided_slice %278 {offsets = [0, 32], sizes = [1, 32], strides = [1, 1]} : vector<1x128xf32> to vector<1x32xf32>
    %281 = vector.extract_strided_slice %278 {offsets = [0, 96], sizes = [1, 32], strides = [1, 1]} : vector<1x128xf32> to vector<1x32xf32>
    %282 = vector.extract_strided_slice %273 {offsets = [0, 64], sizes = [1, 32], strides = [1, 1]} : vector<1x128xf32> to vector<1x32xf32>
    %283 = math.tanh %282 : vector<1x32xf32>
    %284 = arith.mulf %279, %227 : vector<1x32xf32>
    %285 = arith.mulf %280, %283 : vector<1x32xf32>
    %286 = arith.addf %284, %285 : vector<1x32xf32>
    %287 = math.tanh %286 : vector<1x32xf32>
    %288 = arith.mulf %281, %287 : vector<1x32xf32>
    %289 = arith.truncf %288 : vector<1x32xf32> to vector<1x32xbf16>
    %cst_80 = arith.constant dense<0.000000e+00> : vector<1x128xf32>
    %290 = tpu.matmul %289, %4, %cst_80 {dimension_numbers = #tpu.dot_dimension_numbers<[1], [0], [0], [1], [0, 0, 1, 1], [], []>} : vector<1x32xbf16>, vector<32x128xbf16>, vector<1x128xf32> -> vector<1x128xf32>
    %291 = arith.addf %290, %7 : vector<1x128xf32>
    %cst_81 = arith.constant dense<0xFF800000> : vector<1xf32>
    %292 = vector.multi_reduction <maximumf>, %291, %cst_81 [1] : vector<1x128xf32> to vector<1xf32>
    %293 = vector.shape_cast %292 : vector<1xf32> to vector<1x1xf32>
    %294 = vector.broadcast %293 : vector<1x1xf32> to vector<1x128xf32>
    %295 = arith.subf %291, %294 : vector<1x128xf32>
    %296 = math.exp %295 : vector<1x128xf32>
    %cst_82 = arith.constant dense<0.000000e+00> : vector<1xf32>
    %297 = vector.multi_reduction <add>, %296, %cst_82 [1] : vector<1x128xf32> to vector<1xf32>
    %298 = vector.shape_cast %297 : vector<1xf32> to vector<1x1xf32>
    %299 = math.log %298 : vector<1x1xf32>
    %300 = vector.broadcast %299 : vector<1x1xf32> to vector<1x128xf32>
    %301 = arith.subf %295, %300 : vector<1x128xf32>
    %302 = vector.extract_strided_slice %301 {offsets = [0, 0], sizes = [1, 64], strides = [1, 1]} : vector<1x128xf32> to vector<1x64xf32>
    %303 = tpu.concatenate %302, %288, %286, %261 in 1 : vector<1x64xf32>, vector<1x32xf32>, vector<1x32xf32>, vector<1x128xf32> -> vector<1x256xf32>
    %c4_83 = arith.constant 4 : index
    %c0_84 = arith.constant 0 : index
    %304 = vector.load %arg6[%c4_83, %c0_84] : memref<8x256xf32, #tpu.memory_space<vmem>>, vector<1x256xf32>
    tpu.vector_store %arg6[%c4_83, %c0_84], %303 {strides = array<i32>} : memref<8x256xf32, #tpu.memory_space<vmem>>, vector<1x256xf32>,
    %c5 = arith.constant 5 : index
    %c0_85 = arith.constant 0 : index
    %305 = vector.load %arg1[%c5, %c0_85] : memref<8x256xf32, #tpu.memory_space<vmem>>, vector<1x256xf32>
    %306 = vector.extract_strided_slice %305 {offsets = [0, 0], sizes = [1, 128], strides = [1, 1]} : vector<1x256xf32> to vector<1x128xf32>
    %307 = vector.extract_strided_slice %305 {offsets = [0, 128], sizes = [1, 32], strides = [1, 1]} : vector<1x256xf32> to vector<1x32xf32>
    %308 = arith.truncf %288 : vector<1x32xf32> to vector<1x32xbf16>
    %cst_86 = arith.constant dense<0.000000e+00> : vector<1x128xf32>
    %309 = tpu.matmul %308, %0, %cst_86 {dimension_numbers = #tpu.dot_dimension_numbers<[1], [0], [0], [1], [0, 0, 1, 1], [], []>} : vector<1x32xbf16>, vector<32x128xbf16>, vector<1x128xf32> -> vector<1x128xf32>
    %310 = arith.addf %306, %309 : vector<1x128xf32>
    %cst_87 = arith.constant dense<0xFF800000> : vector<1xf32>
    %311 = vector.multi_reduction <maximumf>, %310, %cst_87 [1] : vector<1x128xf32> to vector<1xf32>
    %312 = vector.shape_cast %311 : vector<1xf32> to vector<1x1xf32>
    %313 = vector.broadcast %312 : vector<1x1xf32> to vector<1x128xf32>
    %314 = arith.subf %310, %313 : vector<1x128xf32>
    %315 = math.exp %314 : vector<1x128xf32>
    %cst_88 = arith.constant dense<0.000000e+00> : vector<1xf32>
    %316 = vector.multi_reduction <add>, %315, %cst_88 [1] : vector<1x128xf32> to vector<1xf32>
    %317 = vector.shape_cast %316 : vector<1xf32> to vector<1x1xf32>
    %318 = tpu.reciprocal %317 {approx = true} : vector<1x1xf32> -> vector<1x1xf32>
    %319 = vector.broadcast %318 : vector<1x1xf32> to vector<1x128xf32>
    %320 = arith.mulf %315, %319 : vector<1x128xf32>
    %321 = arith.truncf %320 : vector<1x128xf32> to vector<1x128xbf16>
    %cst_89 = arith.constant dense<0.000000e+00> : vector<1x32xf32>
    %322 = tpu.matmul %321, %5, %cst_89 {dimension_numbers = #tpu.dot_dimension_numbers<[1], [0], [0], [1], [0, 0, 1, 1], [], []>} : vector<1x128xbf16>, vector<128x32xbf16>, vector<1x32xf32> -> vector<1x32xf32>
    %323 = arith.truncf %322 : vector<1x32xf32> to vector<1x32xbf16>
    %cst_90 = arith.constant dense<0.000000e+00> : vector<1x128xf32>
    %324 = tpu.matmul %323, %3, %cst_90 {dimension_numbers = #tpu.dot_dimension_numbers<[1], [0], [0], [1], [0, 0, 1, 1], [], []>} : vector<1x32xbf16>, vector<32x128xbf16>, vector<1x128xf32> -> vector<1x128xf32>
    %325 = vector.extract_strided_slice %324 {offsets = [0, 0], sizes = [1, 32], strides = [1, 1]} : vector<1x128xf32> to vector<1x32xf32>
    %326 = arith.addf %307, %325 : vector<1x32xf32>
    %327 = math.tanh %326 : vector<1x32xf32>
    %328 = arith.truncf %327 : vector<1x32xf32> to vector<1x32xbf16>
    %cst_91 = arith.constant dense<0.000000e+00> : vector<1x128xf32>
    %329 = tpu.matmul %328, %1, %cst_91 {dimension_numbers = #tpu.dot_dimension_numbers<[1], [0], [0], [1], [0, 0, 1, 1], [], []>} : vector<1x32xbf16>, vector<32x128xbf16>, vector<1x128xf32> -> vector<1x128xf32>
    %cst_92 = arith.constant dense<0.000000e+00> : vector<1x128xf32>
    %330 = tpu.matmul %308, %2, %cst_92 {dimension_numbers = #tpu.dot_dimension_numbers<[1], [0], [0], [1], [0, 0, 1, 1], [], []>} : vector<1x32xbf16>, vector<32x128xbf16>, vector<1x128xf32> -> vector<1x128xf32>
    %331 = arith.addf %329, %330 : vector<1x128xf32>
    %332 = arith.addf %331, %6 : vector<1x128xf32>
    %333 = arith.negf %332 : vector<1x128xf32>
    %334 = math.exp %333 : vector<1x128xf32>
    %cst_93 = arith.constant 1.000000e+00 : f32
    %335 = vector.broadcast %cst_93 : f32 to vector<1x128xf32>
    %336 = arith.addf %335, %334 : vector<1x128xf32>
    %337 = arith.divf %335, %336 : vector<1x128xf32>
    %338 = vector.extract_strided_slice %337 {offsets = [0, 0], sizes = [1, 32], strides = [1, 1]} : vector<1x128xf32> to vector<1x32xf32>
    %339 = vector.extract_strided_slice %337 {offsets = [0, 32], sizes = [1, 32], strides = [1, 1]} : vector<1x128xf32> to vector<1x32xf32>
    %340 = vector.extract_strided_slice %337 {offsets = [0, 96], sizes = [1, 32], strides = [1, 1]} : vector<1x128xf32> to vector<1x32xf32>
    %341 = vector.extract_strided_slice %332 {offsets = [0, 64], sizes = [1, 32], strides = [1, 1]} : vector<1x128xf32> to vector<1x32xf32>
    %342 = math.tanh %341 : vector<1x32xf32>
    %343 = arith.mulf %338, %286 : vector<1x32xf32>
    %344 = arith.mulf %339, %342 : vector<1x32xf32>
    %345 = arith.addf %343, %344 : vector<1x32xf32>
    %346 = math.tanh %345 : vector<1x32xf32>
    %347 = arith.mulf %340, %346 : vector<1x32xf32>
    %348 = arith.truncf %347 : vector<1x32xf32> to vector<1x32xbf16>
    %cst_94 = arith.constant dense<0.000000e+00> : vector<1x128xf32>
    %349 = tpu.matmul %348, %4, %cst_94 {dimension_numbers = #tpu.dot_dimension_numbers<[1], [0], [0], [1], [0, 0, 1, 1], [], []>} : vector<1x32xbf16>, vector<32x128xbf16>, vector<1x128xf32> -> vector<1x128xf32>
    %350 = arith.addf %349, %7 : vector<1x128xf32>
    %cst_95 = arith.constant dense<0xFF800000> : vector<1xf32>
    %351 = vector.multi_reduction <maximumf>, %350, %cst_95 [1] : vector<1x128xf32> to vector<1xf32>
    %352 = vector.shape_cast %351 : vector<1xf32> to vector<1x1xf32>
    %353 = vector.broadcast %352 : vector<1x1xf32> to vector<1x128xf32>
    %354 = arith.subf %350, %353 : vector<1x128xf32>
    %355 = math.exp %354 : vector<1x128xf32>
    %cst_96 = arith.constant dense<0.000000e+00> : vector<1xf32>
    %356 = vector.multi_reduction <add>, %355, %cst_96 [1] : vector<1x128xf32> to vector<1xf32>
    %357 = vector.shape_cast %356 : vector<1xf32> to vector<1x1xf32>
    %358 = math.log %357 : vector<1x1xf32>
    %359 = vector.broadcast %358 : vector<1x1xf32> to vector<1x128xf32>
    %360 = arith.subf %354, %359 : vector<1x128xf32>
    %361 = vector.extract_strided_slice %360 {offsets = [0, 0], sizes = [1, 64], strides = [1, 1]} : vector<1x128xf32> to vector<1x64xf32>
    %362 = tpu.concatenate %361, %347, %345, %320 in 1 : vector<1x64xf32>, vector<1x32xf32>, vector<1x32xf32>, vector<1x128xf32> -> vector<1x256xf32>
    %c5_97 = arith.constant 5 : index
    %c0_98 = arith.constant 0 : index
    %363 = vector.load %arg6[%c5_97, %c0_98] : memref<8x256xf32, #tpu.memory_space<vmem>>, vector<1x256xf32>
    tpu.vector_store %arg6[%c5_97, %c0_98], %362 {strides = array<i32>} : memref<8x256xf32, #tpu.memory_space<vmem>>, vector<1x256xf32>,
    %c6 = arith.constant 6 : index
    %c0_99 = arith.constant 0 : index
    %364 = vector.load %arg1[%c6, %c0_99] : memref<8x256xf32, #tpu.memory_space<vmem>>, vector<1x256xf32>
    %365 = vector.extract_strided_slice %364 {offsets = [0, 0], sizes = [1, 128], strides = [1, 1]} : vector<1x256xf32> to vector<1x128xf32>
    %366 = vector.extract_strided_slice %364 {offsets = [0, 128], sizes = [1, 32], strides = [1, 1]} : vector<1x256xf32> to vector<1x32xf32>
    %367 = arith.truncf %347 : vector<1x32xf32> to vector<1x32xbf16>
    %cst_100 = arith.constant dense<0.000000e+00> : vector<1x128xf32>
    %368 = tpu.matmul %367, %0, %cst_100 {dimension_numbers = #tpu.dot_dimension_numbers<[1], [0], [0], [1], [0, 0, 1, 1], [], []>} : vector<1x32xbf16>, vector<32x128xbf16>, vector<1x128xf32> -> vector<1x128xf32>
    %369 = arith.addf %365, %368 : vector<1x128xf32>
    %cst_101 = arith.constant dense<0xFF800000> : vector<1xf32>
    %370 = vector.multi_reduction <maximumf>, %369, %cst_101 [1] : vector<1x128xf32> to vector<1xf32>
    %371 = vector.shape_cast %370 : vector<1xf32> to vector<1x1xf32>
    %372 = vector.broadcast %371 : vector<1x1xf32> to vector<1x128xf32>
    %373 = arith.subf %369, %372 : vector<1x128xf32>
    %374 = math.exp %373 : vector<1x128xf32>
    %cst_102 = arith.constant dense<0.000000e+00> : vector<1xf32>
    %375 = vector.multi_reduction <add>, %374, %cst_102 [1] : vector<1x128xf32> to vector<1xf32>
    %376 = vector.shape_cast %375 : vector<1xf32> to vector<1x1xf32>
    %377 = tpu.reciprocal %376 {approx = true} : vector<1x1xf32> -> vector<1x1xf32>
    %378 = vector.broadcast %377 : vector<1x1xf32> to vector<1x128xf32>
    %379 = arith.mulf %374, %378 : vector<1x128xf32>
    %380 = arith.truncf %379 : vector<1x128xf32> to vector<1x128xbf16>
    %cst_103 = arith.constant dense<0.000000e+00> : vector<1x32xf32>
    %381 = tpu.matmul %380, %5, %cst_103 {dimension_numbers = #tpu.dot_dimension_numbers<[1], [0], [0], [1], [0, 0, 1, 1], [], []>} : vector<1x128xbf16>, vector<128x32xbf16>, vector<1x32xf32> -> vector<1x32xf32>
    %382 = arith.truncf %381 : vector<1x32xf32> to vector<1x32xbf16>
    %cst_104 = arith.constant dense<0.000000e+00> : vector<1x128xf32>
    %383 = tpu.matmul %382, %3, %cst_104 {dimension_numbers = #tpu.dot_dimension_numbers<[1], [0], [0], [1], [0, 0, 1, 1], [], []>} : vector<1x32xbf16>, vector<32x128xbf16>, vector<1x128xf32> -> vector<1x128xf32>
    %384 = vector.extract_strided_slice %383 {offsets = [0, 0], sizes = [1, 32], strides = [1, 1]} : vector<1x128xf32> to vector<1x32xf32>
    %385 = arith.addf %366, %384 : vector<1x32xf32>
    %386 = math.tanh %385 : vector<1x32xf32>
    %387 = arith.truncf %386 : vector<1x32xf32> to vector<1x32xbf16>
    %cst_105 = arith.constant dense<0.000000e+00> : vector<1x128xf32>
    %388 = tpu.matmul %387, %1, %cst_105 {dimension_numbers = #tpu.dot_dimension_numbers<[1], [0], [0], [1], [0, 0, 1, 1], [], []>} : vector<1x32xbf16>, vector<32x128xbf16>, vector<1x128xf32> -> vector<1x128xf32>
    %cst_106 = arith.constant dense<0.000000e+00> : vector<1x128xf32>
    %389 = tpu.matmul %367, %2, %cst_106 {dimension_numbers = #tpu.dot_dimension_numbers<[1], [0], [0], [1], [0, 0, 1, 1], [], []>} : vector<1x32xbf16>, vector<32x128xbf16>, vector<1x128xf32> -> vector<1x128xf32>
    %390 = arith.addf %388, %389 : vector<1x128xf32>
    %391 = arith.addf %390, %6 : vector<1x128xf32>
    %392 = arith.negf %391 : vector<1x128xf32>
    %393 = math.exp %392 : vector<1x128xf32>
    %cst_107 = arith.constant 1.000000e+00 : f32
    %394 = vector.broadcast %cst_107 : f32 to vector<1x128xf32>
    %395 = arith.addf %394, %393 : vector<1x128xf32>
    %396 = arith.divf %394, %395 : vector<1x128xf32>
    %397 = vector.extract_strided_slice %396 {offsets = [0, 0], sizes = [1, 32], strides = [1, 1]} : vector<1x128xf32> to vector<1x32xf32>
    %398 = vector.extract_strided_slice %396 {offsets = [0, 32], sizes = [1, 32], strides = [1, 1]} : vector<1x128xf32> to vector<1x32xf32>
    %399 = vector.extract_strided_slice %396 {offsets = [0, 96], sizes = [1, 32], strides = [1, 1]} : vector<1x128xf32> to vector<1x32xf32>
    %400 = vector.extract_strided_slice %391 {offsets = [0, 64], sizes = [1, 32], strides = [1, 1]} : vector<1x128xf32> to vector<1x32xf32>
    %401 = math.tanh %400 : vector<1x32xf32>
    %402 = arith.mulf %397, %345 : vector<1x32xf32>
    %403 = arith.mulf %398, %401 : vector<1x32xf32>
    %404 = arith.addf %402, %403 : vector<1x32xf32>
    %405 = math.tanh %404 : vector<1x32xf32>
    %406 = arith.mulf %399, %405 : vector<1x32xf32>
    %407 = arith.truncf %406 : vector<1x32xf32> to vector<1x32xbf16>
    %cst_108 = arith.constant dense<0.000000e+00> : vector<1x128xf32>
    %408 = tpu.matmul %407, %4, %cst_108 {dimension_numbers = #tpu.dot_dimension_numbers<[1], [0], [0], [1], [0, 0, 1, 1], [], []>} : vector<1x32xbf16>, vector<32x128xbf16>, vector<1x128xf32> -> vector<1x128xf32>
    %409 = arith.addf %408, %7 : vector<1x128xf32>
    %cst_109 = arith.constant dense<0xFF800000> : vector<1xf32>
    %410 = vector.multi_reduction <maximumf>, %409, %cst_109 [1] : vector<1x128xf32> to vector<1xf32>
    %411 = vector.shape_cast %410 : vector<1xf32> to vector<1x1xf32>
    %412 = vector.broadcast %411 : vector<1x1xf32> to vector<1x128xf32>
    %413 = arith.subf %409, %412 : vector<1x128xf32>
    %414 = math.exp %413 : vector<1x128xf32>
    %cst_110 = arith.constant dense<0.000000e+00> : vector<1xf32>
    %415 = vector.multi_reduction <add>, %414, %cst_110 [1] : vector<1x128xf32> to vector<1xf32>
    %416 = vector.shape_cast %415 : vector<1xf32> to vector<1x1xf32>
    %417 = math.log %416 : vector<1x1xf32>
    %418 = vector.broadcast %417 : vector<1x1xf32> to vector<1x128xf32>
    %419 = arith.subf %413, %418 : vector<1x128xf32>
    %420 = vector.extract_strided_slice %419 {offsets = [0, 0], sizes = [1, 64], strides = [1, 1]} : vector<1x128xf32> to vector<1x64xf32>
    %421 = tpu.concatenate %420, %406, %404, %379 in 1 : vector<1x64xf32>, vector<1x32xf32>, vector<1x32xf32>, vector<1x128xf32> -> vector<1x256xf32>
    %c6_111 = arith.constant 6 : index
    %c0_112 = arith.constant 0 : index
    %422 = vector.load %arg6[%c6_111, %c0_112] : memref<8x256xf32, #tpu.memory_space<vmem>>, vector<1x256xf32>
    tpu.vector_store %arg6[%c6_111, %c0_112], %421 {strides = array<i32>} : memref<8x256xf32, #tpu.memory_space<vmem>>, vector<1x256xf32>,
    %c7 = arith.constant 7 : index
    %c0_113 = arith.constant 0 : index
    %423 = vector.load %arg1[%c7, %c0_113] : memref<8x256xf32, #tpu.memory_space<vmem>>, vector<1x256xf32>
    %424 = vector.extract_strided_slice %423 {offsets = [0, 0], sizes = [1, 128], strides = [1, 1]} : vector<1x256xf32> to vector<1x128xf32>
    %425 = vector.extract_strided_slice %423 {offsets = [0, 128], sizes = [1, 32], strides = [1, 1]} : vector<1x256xf32> to vector<1x32xf32>
    %426 = arith.truncf %406 : vector<1x32xf32> to vector<1x32xbf16>
    %cst_114 = arith.constant dense<0.000000e+00> : vector<1x128xf32>
    %427 = tpu.matmul %426, %0, %cst_114 {dimension_numbers = #tpu.dot_dimension_numbers<[1], [0], [0], [1], [0, 0, 1, 1], [], []>} : vector<1x32xbf16>, vector<32x128xbf16>, vector<1x128xf32> -> vector<1x128xf32>
    %428 = arith.addf %424, %427 : vector<1x128xf32>
    %cst_115 = arith.constant dense<0xFF800000> : vector<1xf32>
    %429 = vector.multi_reduction <maximumf>, %428, %cst_115 [1] : vector<1x128xf32> to vector<1xf32>
    %430 = vector.shape_cast %429 : vector<1xf32> to vector<1x1xf32>
    %431 = vector.broadcast %430 : vector<1x1xf32> to vector<1x128xf32>
    %432 = arith.subf %428, %431 : vector<1x128xf32>
    %433 = math.exp %432 : vector<1x128xf32>
    %cst_116 = arith.constant dense<0.000000e+00> : vector<1xf32>
    %434 = vector.multi_reduction <add>, %433, %cst_116 [1] : vector<1x128xf32> to vector<1xf32>
    %435 = vector.shape_cast %434 : vector<1xf32> to vector<1x1xf32>
    %436 = tpu.reciprocal %435 {approx = true} : vector<1x1xf32> -> vector<1x1xf32>
    %437 = vector.broadcast %436 : vector<1x1xf32> to vector<1x128xf32>
    %438 = arith.mulf %433, %437 : vector<1x128xf32>
    %439 = arith.truncf %438 : vector<1x128xf32> to vector<1x128xbf16>
    %cst_117 = arith.constant dense<0.000000e+00> : vector<1x32xf32>
    %440 = tpu.matmul %439, %5, %cst_117 {dimension_numbers = #tpu.dot_dimension_numbers<[1], [0], [0], [1], [0, 0, 1, 1], [], []>} : vector<1x128xbf16>, vector<128x32xbf16>, vector<1x32xf32> -> vector<1x32xf32>
    %441 = arith.truncf %440 : vector<1x32xf32> to vector<1x32xbf16>
    %cst_118 = arith.constant dense<0.000000e+00> : vector<1x128xf32>
    %442 = tpu.matmul %441, %3, %cst_118 {dimension_numbers = #tpu.dot_dimension_numbers<[1], [0], [0], [1], [0, 0, 1, 1], [], []>} : vector<1x32xbf16>, vector<32x128xbf16>, vector<1x128xf32> -> vector<1x128xf32>
    %443 = vector.extract_strided_slice %442 {offsets = [0, 0], sizes = [1, 32], strides = [1, 1]} : vector<1x128xf32> to vector<1x32xf32>
    %444 = arith.addf %425, %443 : vector<1x32xf32>
    %445 = math.tanh %444 : vector<1x32xf32>
    %446 = arith.truncf %445 : vector<1x32xf32> to vector<1x32xbf16>
    %cst_119 = arith.constant dense<0.000000e+00> : vector<1x128xf32>
    %447 = tpu.matmul %446, %1, %cst_119 {dimension_numbers = #tpu.dot_dimension_numbers<[1], [0], [0], [1], [0, 0, 1, 1], [], []>} : vector<1x32xbf16>, vector<32x128xbf16>, vector<1x128xf32> -> vector<1x128xf32>
    %cst_120 = arith.constant dense<0.000000e+00> : vector<1x128xf32>
    %448 = tpu.matmul %426, %2, %cst_120 {dimension_numbers = #tpu.dot_dimension_numbers<[1], [0], [0], [1], [0, 0, 1, 1], [], []>} : vector<1x32xbf16>, vector<32x128xbf16>, vector<1x128xf32> -> vector<1x128xf32>
    %449 = arith.addf %447, %448 : vector<1x128xf32>
    %450 = arith.addf %449, %6 : vector<1x128xf32>
    %451 = arith.negf %450 : vector<1x128xf32>
    %452 = math.exp %451 : vector<1x128xf32>
    %cst_121 = arith.constant 1.000000e+00 : f32
    %453 = vector.broadcast %cst_121 : f32 to vector<1x128xf32>
    %454 = arith.addf %453, %452 : vector<1x128xf32>
    %455 = arith.divf %453, %454 : vector<1x128xf32>
    %456 = vector.extract_strided_slice %455 {offsets = [0, 0], sizes = [1, 32], strides = [1, 1]} : vector<1x128xf32> to vector<1x32xf32>
    %457 = vector.extract_strided_slice %455 {offsets = [0, 32], sizes = [1, 32], strides = [1, 1]} : vector<1x128xf32> to vector<1x32xf32>
    %458 = vector.extract_strided_slice %455 {offsets = [0, 96], sizes = [1, 32], strides = [1, 1]} : vector<1x128xf32> to vector<1x32xf32>
    %459 = vector.extract_strided_slice %450 {offsets = [0, 64], sizes = [1, 32], strides = [1, 1]} : vector<1x128xf32> to vector<1x32xf32>
    %460 = math.tanh %459 : vector<1x32xf32>
    %461 = arith.mulf %456, %404 : vector<1x32xf32>
    %462 = arith.mulf %457, %460 : vector<1x32xf32>
    %463 = arith.addf %461, %462 : vector<1x32xf32>
    %464 = math.tanh %463 : vector<1x32xf32>
    %465 = arith.mulf %458, %464 : vector<1x32xf32>
    %466 = arith.truncf %465 : vector<1x32xf32> to vector<1x32xbf16>
    %cst_122 = arith.constant dense<0.000000e+00> : vector<1x128xf32>
    %467 = tpu.matmul %466, %4, %cst_122 {dimension_numbers = #tpu.dot_dimension_numbers<[1], [0], [0], [1], [0, 0, 1, 1], [], []>} : vector<1x32xbf16>, vector<32x128xbf16>, vector<1x128xf32> -> vector<1x128xf32>
    %468 = arith.addf %467, %7 : vector<1x128xf32>
    %cst_123 = arith.constant dense<0xFF800000> : vector<1xf32>
    %469 = vector.multi_reduction <maximumf>, %468, %cst_123 [1] : vector<1x128xf32> to vector<1xf32>
    %470 = vector.shape_cast %469 : vector<1xf32> to vector<1x1xf32>
    %471 = vector.broadcast %470 : vector<1x1xf32> to vector<1x128xf32>
    %472 = arith.subf %468, %471 : vector<1x128xf32>
    %473 = math.exp %472 : vector<1x128xf32>
    %cst_124 = arith.constant dense<0.000000e+00> : vector<1xf32>
    %474 = vector.multi_reduction <add>, %473, %cst_124 [1] : vector<1x128xf32> to vector<1xf32>
    %475 = vector.shape_cast %474 : vector<1xf32> to vector<1x1xf32>
    %476 = math.log %475 : vector<1x1xf32>
    %477 = vector.broadcast %476 : vector<1x1xf32> to vector<1x128xf32>
    %478 = arith.subf %472, %477 : vector<1x128xf32>
    %479 = vector.extract_strided_slice %478 {offsets = [0, 0], sizes = [1, 64], strides = [1, 1]} : vector<1x128xf32> to vector<1x64xf32>
    %480 = tpu.concatenate %479, %465, %463, %438 in 1 : vector<1x64xf32>, vector<1x32xf32>, vector<1x32xf32>, vector<1x128xf32> -> vector<1x256xf32>
    %c7_125 = arith.constant 7 : index
    %c0_126 = arith.constant 0 : index
    %481 = vector.load %arg6[%c7_125, %c0_126] : memref<8x256xf32, #tpu.memory_space<vmem>>, vector<1x256xf32>
    tpu.vector_store %arg6[%c7_125, %c0_126], %480 {strides = array<i32>} : memref<8x256xf32, #tpu.memory_space<vmem>>, vector<1x256xf32>,
    return
  }
  func.func @transform_0(%arg0: i32) -> (i32, i32) {
    %c0_i32 = arith.constant 0 : i32
    %c0_i32_0 = arith.constant 0 : i32
    %c0_i32_1 = arith.constant 0 : i32
    return %c0_i32, %c0_i32_0 : i32, i32
  }
  func.func @transform_1(%arg0: i32) -> (i32, i32) {
    %c0_i32 = arith.constant 0 : i32
    %c0_i32_0 = arith.constant 0 : i32
    %c0_i32_1 = arith.constant 0 : i32
    return %c0_i32, %c0_i32_0 : i32, i32
  }
  func.func @transform_2(%arg0: i32) -> (i32, i32) {
    %c0_i32 = arith.constant 0 : i32
    %c0_i32_0 = arith.constant 0 : i32
    %c0_i32_1 = arith.constant 0 : i32
    return %c0_i32, %c0_i32_0 : i32, i32
  }
  func.func @transform_3(%arg0: i32) -> (i32, i32) {
    %c0_i32 = arith.constant 0 : i32
    %c0_i32_0 = arith.constant 0 : i32
    %c0_i32_1 = arith.constant 0 : i32
    return %c0_i32, %c0_i32_0 : i32, i32
  }
  func.func @transform_4(%arg0: i32) -> (i32, i32) {
    %c0_i32 = arith.constant 0 : i32
    %c0_i32_0 = arith.constant 0 : i32
    %c0_i32_1 = arith.constant 0 : i32
    return %c0_i32, %c0_i32_0 : i32, i32
  }
  func.func @transform_5(%arg0: i32) -> (i32, i32) {
    %c0_i32 = arith.constant 0 : i32
    %c0_i32_0 = arith.constant 0 : i32
    %c0_i32_1 = arith.constant 0 : i32
    return %c0_i32, %c0_i32_0 : i32, i32
  }
}

</mosaic_0001>

<bundles_post_ra>
// kernel: tpu_custom_call.1
= control target key start
LH: loop header
LB: loop body
LE: loop exit
PB: predicated region body
PF: predicated region fallthrough
CT: control target
= control target key end

     0   :  { %10 = vsyncpa [#allocation3], 0  ;;  %s4991_s0 = inlined_call_operand.hbm [shape: f32[8,256], index: 0, kind: input, shape index: {}]   ;;  %s4992_s1 = inlined_call_operand.vmem [shape: bf16[128,32], index: 1, kind: input, shape index: {}]   ;;  %s4993_s2 = inlined_call_operand.vmem [shape: bf16[160,128], index: 2, kind: input, shape index: {}]   ;;  %s4994_s3 = inlined_call_operand.vmem [shape: f32[8,128], index: 3, kind: input, shape index: {}]   ;;  %s4995_s4 = inlined_call_operand.vmem [shape: f32[1,64], index: 4, kind: input, shape index: {}]   ;;  %s4996_s5 = inlined_call_operand.hbm [shape: f32[8,256], index: 5, kind: output, shape index: {}]  }
   0x1   :  { %11 = vsyncpa [#allocation4], 0  ;;  %s3932_s18 = smov [#allocation2]   ;;  %s3884_s22 = scalar_lea.hbm %s4991_s0, 256 }
   0x2   :  { %s18_s19 = sshll.u32 %s3932_s18, 4  ;;  %p3885_p0 = scmp.ne.s32.totalorder %s4991_s0, %s3884_s22  ;;  %s19_s19 = int_to_ptr.vmem [resolvable:$true] %s18_s19 }
   0x3   :  { %p3888_p1 = scmp.lt.u32.totalorder %s3884_s22, %s4991_s0 }
   0x5   :  { %p3890_p2 = pnand %p3888_p1, %p3885_p0 }
   0x7   :  { %3893 = shalt.err (!%p3890_p2)
}
   0x8   :  { %s3894_s27 = scalar_lea.vmem %s19_s19, 256  ;;  %p3899_p4 = scmp.lt.s32.totalorder %s19_s19, %s19_s19 }
   0x9   :  { %p3895_p3 = scmp.ne.s32.totalorder %s19_s19, %s3894_s27  ;;  %p3900_p5 = scmp.lt.s32.totalorder %s3894_s27, %s3894_s27 }
   0xb   :  { %p3901_p6 = por %p3900_p5, %p3899_p4 }
   0xd   :  { %p3902_p7 = pnand %p3901_p6, %p3895_p3 }
   0xf   :  { %3905 = shalt.err (!%p3902_p7)
}
  0x10   :  { %21 = dma.hbm_to_vmem [thread:$0]  %s4991_s0, 256, %s19_s19, [#allocation3]  }
  0x11   :  { %3928 = dma.done.wait [#allocation3], 256  }
  0x12   :  { %3929 = vsyncadd [#allocation3], 4294967040  ;;  %v3933_v0 = vmov 0.0   ;;  %vm3934_vm0 = vmmov 0   ;;  %v3990_v1 = vld [vmem:[%s4993_s2] sm:$0xff]   ;;  %v3996_v2 = vld [vmem:[%s4993_s2 + $0x8] sm:$0xff]   ;;  %v411_v59 = vlaneseq }
  0x13   :  { %3216 = vmatprep.subr.bf16.mxu0 %v3933_v0  ;;  %3220 = vmatprep.mubr.msk.bf16.mxu0 %vm3934_vm0, %v3933_v0  ;;  %v4001_v3 = vld [vmem:[%s4995_s4] sm:$0x1]  ;;  %vm87_vm1 = vcmask 261120   ;;  %vm132_vm2 = vcmask 1040384   ;;  %v4027_v13 = vld [vmem:[%s4992_s1 + $0x8] sm:$0xff]   ;;  %v4034_v14 = vld [vmem:[%s4992_s1 + $0x10] sm:$0xff]  }
  0x14   :  { %3224 = vmatprep.subr.bf16.mxu1 %v3933_v0  ;;  %3240 = vmatprep.mubr.msk.bf16.mxu1 %vm3934_vm0, %v3933_v0  ;;  %v4006_v4 = vpack.c.bf16 %v4001_v3, %v4001_v3  ;;  %v4014_v5 = vld [vmem:[#allocation2] ss:$8 sm:$0x3]  ;;  %v4041_v15 = vld [vmem:[%s4992_s1 + $0x18] sm:$0xff]   ;;  %v4063_v23 = vld [vmem:[%s4992_s1 + $0x30] sm:$0xff]   ;;  %v4145_v60 = vshrl.u32 %v411_v59, 7 }
  0x15   :  { %3217 = vmatpush3.bf16.msra.mxu0 %v3990_v1  ;;  %v4021_v12 = vld [vmem:[%s4992_s1] sm:$0xff]   ;;  %v4056_v22 = vld [vmem:[%s4992_s1 + $0x28] sm:$0xff]   ;;  %v4070_v24 = vld [vmem:[%s4992_s1 + $0x38] sm:$0xff]   ;;  %v290_v40 = vrot.slane %v4014_v5, 1  ;;  %s3935_s12 = smov 96   ;;  %s3936_s17 = smov 32  }
  0x16   :  { %3218 = vmatprep.subr.bf16.mxu0 %v3933_v0  ;;  %3225 = vmatpush3.bf16.msra.mxu1 %v4021_v12  ;;  %v4050_v21 = vld [vmem:[%s4992_s1 + $0x20] sm:$0xff]   ;;  %v4078_v25 = vld [vmem:[%s4993_s2 + $0x30] sm:$0xff]   ;;  %v4084_v26 = vld [vmem:[%s4993_s2 + $0x38] sm:$0xff]   ;;  %v413_v61 = vsub.s32 0, %v4145_v60  ;;  %vm514_vm3 = vcmask 523264   ;;  %vm516_vm4 = vcmask 785408  }
  0x17   :  { %3226 = vmatprep.subr.bf16.mxu1 %v3933_v0  ;;  %v4102_v32 = vld [vmem:[%s4993_s2 + $0x20] sm:$0xff]   ;;  %v4112_v37 = vld [vmem:[%s4993_s2 + $0x28] sm:$0xff]   ;;  %v4123_v38 = vld [vmem:[%s4993_s2 + $0x10] sm:$0xff]   ;;  %vm4870_vm5 = vcmp.lt.s32.totalorder %v411_v59, 256 }
  0x18   :  { %v4130_v39 = vld [vmem:[%s4993_s2 + $0x18] sm:$0xff]   ;;  %v4141_v52 = vld [vmem:[%s4994_s3] sm:$0x1]  ;;  %v414_v63 = vrot.slane %v4001_v3, %v413_v61 }
  0x19   :  { %3219 = vmatpush3.bf16.msra.mxu0 %v3996_v2  ;;  %v4158_v3 = vld [vmem:[%s4993_s2 + $0x40] sm:$0xff]  }
  0x1a   :  { %3244 = vmatprep.subr.bf16.mxu0 %v3933_v0  ;;  %3227 = vmatpush3.bf16.msra.mxu1 %v4027_v13 }
  0x1b   :  { %3228 = vmatprep.subr.bf16.mxu1 %v3933_v0 }
  0x1c   :  { %3221 = vmatmul.mubr.msk.bf16.vlgmr.msra.gmra.mrb[0].mxu0 %vm87_vm1, %v4006_v4 }
  0x1d   :  { %3248 = vmatprep.mubr.msk.bf16.mxu0 %vm3934_vm0, %v3933_v0  ;;  %3245 = vmatpush3.bf16.msra.mxu0 %v4078_v25 }
  0x1e   :  { %3229 = vmatpush3.bf16.msra.mxu1 %v4034_v14  ;;  %3246 = vmatprep.subr.bf16.mxu0 %v3933_v0 }
  0x1f   :  { %3230 = vmatprep.subr.bf16.mxu1 %v3933_v0 }
  0x21   :  { %3247 = vmatpush3.bf16.msra.mxu0 %v4084_v26 }
  0x22   :  { %3231 = vmatpush3.bf16.msra.mxu1 %v4041_v15  ;;  %3252 = vmatprep.subr.bf16.mxu0 %v3933_v0 }
  0x23   :  { %3232 = vmatprep.subr.bf16.mxu1 %v3933_v0 }
  0x26   :  { %3233 = vmatpush3.bf16.msra.mxu1 %v4050_v21 }
  0x27   :  { %3234 = vmatprep.subr.bf16.mxu1 %v3933_v0 }
  0x2a   :  { %3235 = vmatpush3.bf16.msra.mxu1 %v4056_v22 }
  0x2b   :  { %3236 = vmatprep.subr.bf16.mxu1 %v3933_v0 }
  0x2e   :  { %3237 = vmatpush3.bf16.msra.mxu1 %v4063_v23 }
  0x2f   :  { %3238 = vmatprep.subr.bf16.mxu1 %v3933_v0 }
  0x32   :  { %3239 = vmatpush3.bf16.msra.mxu1 %v4070_v24 }
  0x33   :  { %3276 = vmatprep.subr.bf16.mxu1 %v3933_v0 }
  0xef   :  { %v125_v6 = vpop.f32.mrb[0].mxu0 }
  0xf0   :  { %v131_v7 = vadd.f32 %v125_v6, %v4014_v5  ;;  %v3222_v8 = vpop.f32.mrb[1].mxu0 }
  0xf1   :  { %v128_v9 = vpop.f32.mrb[2].mxu0 }
  0xf2   :  { %v3223_v10 = vpop.f32.mrb[3].mxu0  ;;  %v133_v11 = vsel %vm132_vm2, %v131_v7, -inf }
  0xf3   :  { %134 = vmax.xlane.f32.xlu0 %v133_v11 }
 0x180   :  { %v135_v16 = vpop.xlane.xlu0 %134 }
 0x181   :  { %v136_v17 = vsub.f32 %v131_v7, %v135_v16 }
 0x183   :  { %v137_v18 = vmul.f32 1.442695, %v136_v17 }
 0x185   :  { %3721 = vpow2.f32 %v137_v18  ;;  %v4164_v18 = vld [vmem:[%s4993_s2 + $0x48] sm:$0xff]  }
 0x18f   :  { %v3722_v19 = vpop.eup %3721 }
 0x190   :  { %v139_v20 = vsel %vm132_vm2, %v3722_v19, 0.0 }
 0x191   :  { %140 = vadd.xlane.f32.xlu0 %v139_v20 }
 0x21e   :  { %v141_v27 = vpop.xlane.xlu0 %140 }
 0x21f   :  { %3723 = vrcp.f32 %v141_v27 }
 0x229   :  { %v3724_v28 = vpop.eup %3723 }
 0x22a   :  { %v4089_v29 = vmul.f32 %v3724_v28, %v3722_v19 }
 0x22c   :  { %v144_v30 = vpack.c.bf16 %v4089_v29, %v4089_v29 }
 0x22e   :  { %3241 = vmatmul.mubr.bf16.vlgmr.msra.gmra.mrb[0].mxu1 %v144_v30 }
 0x22f   :  { %3277 = vmatpush3.bf16.msra.mxu1 %v3990_v1  ;;  %3280 = vmatprep.mubr.msk.bf16.mxu1 %vm3934_vm0, %v3933_v0 }
 0x230   :  { %3278 = vmatprep.subr.bf16.mxu1 %v3933_v0 }
 0x233   :  { %3279 = vmatpush3.bf16.msra.mxu1 %v3996_v2 }
 0x234   :  { %3304 = vmatprep.subr.bf16.mxu1 %v3933_v0 }
 0x301   :  { %v227_v31 = vpop.f32.mrb[0].mxu1 }
 0x302   :  { %v233_v33 = vpack.c.bf16 %v227_v31, %v227_v31  ;;  %v3242_v34 = vpop.f32.mrb[1].mxu1  ;;  %v543_v31 = vld [vmem:[#allocation2 + $0x1] ss:$8 sm:$0x3] }
 0x303   :  { %v230_v35 = vpop.f32.mrb[2].mxu1 }
 0x304   :  { %v3243_v36 = vpop.f32.mrb[3].mxu1  ;;  %3249 = vmatmul.mubr.msk.bf16.vlgmr.msra.gmra.mrb[4].mxu0 %vm87_vm1, %v233_v33 }
 0x305   :  { %3253 = vmatpush3.bf16.msra.mxu0 %v4102_v32  ;;  %3256 = vmatprep.mubr.msk.bf16.mxu0 %vm3934_vm0, %v3933_v0 }
 0x306   :  { %3254 = vmatprep.subr.bf16.mxu0 %v3933_v0 }
 0x309   :  { %3255 = vmatpush3.bf16.msra.mxu0 %v4112_v37 }
 0x30a   :  { %3260 = vmatprep.subr.bf16.mxu0 %v3933_v0 }
 0x30c   :  { %3257 = vmatmul.mubr.msk.bf16.vlgmr.msra.gmra.mrb[8].mxu0 %vm87_vm1, %v4006_v4 }
 0x30d   :  { %3264 = vmatprep.mubr.msk.bf16.mxu0 %vm3934_vm0, %v3933_v0  ;;  %3261 = vmatpush3.bf16.msra.mxu0 %v4123_v38 }
 0x30e   :  { %3262 = vmatprep.subr.bf16.mxu0 %v3933_v0 }
 0x311   :  { %3263 = vmatpush3.bf16.msra.mxu0 %v4130_v39 }
 0x312   :  { %3268 = vmatprep.subr.bf16.mxu0 %v3933_v0 }
 0x3d7   :  { %v283_v41 = vpop.f32.mrb[4].mxu0 }
 0x3d8   :  { %v292_v42 = vadd.f32 %v290_v40, %v283_v41  ;;  %v3250_v43 = vpop.f32.mrb[5].mxu0 }
 0x3d9   :  { %v286_v44 = vpop.f32.mrb[6].mxu0 }
 0x3da   :  { %3725 = vtanh.f32 %v292_v42  ;;  %v3251_v45 = vpop.f32.mrb[7].mxu0 }
 0x3df   :  { %v341_v48 = vpop.f32.mrb[8].mxu0 }
 0x3e0   :  { %v3258_v49 = vpop.f32.mrb[9].mxu0 }
 0x3e1   :  { %v344_v50 = vpop.f32.mrb[10].mxu0 }
 0x3e2   :  { %v3259_v51 = vpop.f32.mrb[11].mxu0 }
 0x3e4   :  { %v3726_v46 = vpop.eup %3725 }
 0x3e5   :  { %v294_v47 = vpack.c.bf16 %v3726_v46, %v3726_v46 }
 0x3e7   :  { %3265 = vmatmul.mubr.msk.bf16.vlgmr.msra.gmra.mrb[12].mxu0 %vm87_vm1, %v294_v47 }
 0x3e8   :  { %3272 = vmatprep.mubr.msk.bf16.mxu0 %vm3934_vm0, %v3933_v0  ;;  %3269 = vmatpush3.bf16.msra.mxu0 %v4158_v3 }
 0x3e9   :  { %3270 = vmatprep.subr.bf16.mxu0 %v3933_v0 }
 0x3ec   :  { %3271 = vmatpush3.bf16.msra.mxu0 %v4164_v18 }
 0x3ed   :  { %3284 = vmatprep.subr.bf16.mxu0 %v3933_v0 }
 0x4ba   :  { %v396_v53 = vpop.f32.mrb[12].mxu0 }
 0x4bb   :  { %v397_v54 = vadd.f32 %v396_v53, %v341_v48  ;;  %v3266_v55 = vpop.f32.mrb[13].mxu0 }
 0x4bc   :  { %v399_v56 = vpop.f32.mrb[14].mxu0 }
 0x4bd   :  { %v402_v57 = vadd.f32 %v397_v54, %v4141_v52  ;;  %v3267_v58 = vpop.f32.mrb[15].mxu0 }
 0x4bf   :  { %3727 = vtanh.f32 %v402_v57  ;;  %v2978_v4 = vmul.f32 -1.442695, %v402_v57 }
 0x4c1   :  { %3729 = vpow2.f32 %v2978_v4 }
 0x4c9   :  { %v3728_v62 = vpop.eup %3727 }
 0x4ca   :  { %420 = vrot.lane.b32.xlu1 %v3728_v62, %s3935_s12 }
 0x4cb   :  { %v3730_v5 = vpop.eup %3729 }
 0x4cc   :  { %v406_v6 = vadd.f32 1.0, %v3730_v5 }
 0x4ce   :  { %415 = vrot.lane.b32.xlu1 %v414_v63, %s3935_s12  ;;  %3731 = vrcp.f32 %v406_v6  ;;  %v682_v63 = vrot.slane %v543_v31, 1 }
 0x4d8   :  { %v3732_v7 = vpop.eup %3731 }
 0x53c   :  { %v421_v8 = vpop.permute.xlu1 %420 }
 0x53d   :  { %v423_v9 = vmul.f32 %v3732_v7, %v421_v8 }
 0x53f   :  { %425 = vrot.lane.b32.xlu0 %v423_v9, %s3935_s12 }
 0x540   :  { %v416_v10 = vpop.permute.xlu1 %415 }
 0x541   :  { %v418_v11 = vmul.f32 %v3732_v7, %v416_v10 }
 0x5b1   :  { %v426_v16 = vpop.permute.xlu0 %425 }
 0x5b2   :  { %v4152_v17 = vadd.f32 %v426_v16, %v418_v11 }
 0x5b4   :  { %3733 = vtanh.f32 %v4152_v17 }
 0x5be   :  { %v3734_v19 = vpop.eup %3733 }
 0x5bf   :  { %431 = vrot.lane.b32.xlu1 %v3734_v19, %s3935_s12 }
 0x631   :  { %v432_v20 = vpop.permute.xlu1 %431 }
 0x632   :  { %v4170_v27 = vmul.f32 %v3732_v7, %v432_v20 }
 0x634   :  { %v435_v28 = vpack.c.bf16 %v4170_v27, %v4170_v27 }
 0x636   :  { %437 = vrot.lane.b32.xlu1 %v435_v28, %s3936_s17 }
 0x6a8   :  { %v4175_v30 = vpop.permute.xlu1 %437 }
 0x6a9   :  { %3273 = vmatmul.mubr.msk.bf16.vlgmr.msra.gmra.mrb[16].mxu0 %vm87_vm1, %v4175_v30  ;;  %3281 = vmatmul.mubr.msk.bf16.vlgmr.msra.gmra.mrb[4].mxu1 %vm87_vm1, %v4175_v30 }
 0x6aa   :  { %3285 = vmatpush3.bf16.msra.mxu0 %v4021_v12  ;;  %3300 = vmatprep.mubr.msk.bf16.mxu0 %vm3934_vm0, %v3933_v0 }
 0x6ab   :  { %3286 = vmatprep.subr.bf16.mxu0 %v3933_v0  ;;  %3305 = vmatpush3.bf16.msra.mxu1 %v4078_v25 }
 0x6ac   :  { %3306 = vmatprep.subr.bf16.mxu1 %v3933_v0  ;;  %3308 = vmatprep.mubr.msk.bf16.mxu1 %vm3934_vm0, %v3933_v0 }
 0x6ae   :  { %3287 = vmatpush3.bf16.msra.mxu0 %v4027_v13 }
 0x6af   :  { %3288 = vmatprep.subr.bf16.mxu0 %v3933_v0  ;;  %3307 = vmatpush3.bf16.msra.mxu1 %v4084_v26 }
 0x6b0   :  { %3312 = vmatprep.subr.bf16.mxu1 %v3933_v0 }
 0x6b2   :  { %3289 = vmatpush3.bf16.msra.mxu0 %v4034_v14 }
 0x6b3   :  { %3290 = vmatprep.subr.bf16.mxu0 %v3933_v0 }
 0x6b6   :  { %3291 = vmatpush3.bf16.msra.mxu0 %v4041_v15 }
 0x6b7   :  { %3292 = vmatprep.subr.bf16.mxu0 %v3933_v0 }
 0x6ba   :  { %3293 = vmatpush3.bf16.msra.mxu0 %v4050_v21 }
 0x6bb   :  { %3294 = vmatprep.subr.bf16.mxu0 %v3933_v0 }
 0x6be   :  { %3295 = vmatpush3.bf16.msra.mxu0 %v4056_v22 }
 0x6bf   :  { %3296 = vmatprep.subr.bf16.mxu0 %v3933_v0 }
 0x6c2   :  { %3297 = vmatpush3.bf16.msra.mxu0 %v4063_v23 }
 0x6c3   :  { %3298 = vmatprep.subr.bf16.mxu0 %v3933_v0 }
 0x6c6   :  { %3299 = vmatpush3.bf16.msra.mxu0 %v4070_v24 }
 0x6c7   :  { %3336 = vmatprep.subr.bf16.mxu0 %v3933_v0 }
 0x77c   :  { %v4205_v33 = vpop.f32.mrb[16].mxu0  ;;  %v578_v34 = vpop.f32.mrb[4].mxu1 }
 0x77d   :  { %v584_v35 = vadd.f32 %v578_v34, %v543_v31  ;;  %v3274_v36 = vpop.f32.mrb[17].mxu0  ;;  %v3282_v40 = vpop.f32.mrb[5].mxu1 }
 0x77e   :  { %v491_v41 = vpop.f32.mrb[18].mxu0  ;;  %v581_v42 = vpop.f32.mrb[6].mxu1 }
 0x77f   :  { %v3275_v43 = vpop.f32.mrb[19].mxu0  ;;  %v3283_v44 = vpop.f32.mrb[7].mxu1  ;;  %v585_v45 = vsel %vm132_vm2, %v584_v35, -inf }
 0x780   :  { %586 = vmax.xlane.f32.xlu1 %v585_v45 }
 0x80d   :  { %v587_v46 = vpop.xlane.xlu1 %586 }
 0x80e   :  { %v588_v47 = vsub.f32 %v584_v35, %v587_v46 }
 0x810   :  { %v589_v48 = vmul.f32 1.442695, %v588_v47 }
 0x812   :  { %3735 = vpow2.f32 %v589_v48 }
 0x81c   :  { %v3736_v49 = vpop.eup %3735 }
 0x81d   :  { %v591_v50 = vsel %vm132_vm2, %v3736_v49, 0.0 }
 0x81e   :  { %592 = vadd.xlane.f32.xlu0 %v591_v50 }
 0x8ab   :  { %v593_v51 = vpop.xlane.xlu0 %592 }
 0x8ac   :  { %3737 = vrcp.f32 %v593_v51 }
 0x8b6   :  { %v3738_v53 = vpop.eup %3737 }
 0x8b7   :  { %v4209_v54 = vmul.f32 %v3738_v53, %v3736_v49 }
 0x8b9   :  { %v596_v55 = vpack.c.bf16 %v4209_v54, %v4209_v54 }
 0x8bb   :  { %3301 = vmatmul.mubr.bf16.vlgmr.msra.gmra.mrb[20].mxu0 %v596_v55 }
 0x8bc   :  { %3337 = vmatpush3.bf16.msra.mxu0 %v3990_v1  ;;  %3340 = vmatprep.mubr.msk.bf16.mxu0 %vm3934_vm0, %v3933_v0 }
 0x8bd   :  { %3338 = vmatprep.subr.bf16.mxu0 %v3933_v0 }
 0x8c0   :  { %3339 = vmatpush3.bf16.msra.mxu0 %v3996_v2 }
 0x8c1   :  { %3364 = vmatprep.subr.bf16.mxu0 %v3933_v0 }
 0x98e   :  { %v631_v56 = vpop.f32.mrb[20].mxu0 }
 0x98f   :  { %v637_v57 = vpack.c.bf16 %v631_v56, %v631_v56  ;;  %v3302_v58 = vpop.f32.mrb[21].mxu0 }
 0x990   :  { %v634_v61 = vpop.f32.mrb[22].mxu0 }
 0x991   :  { %v3303_v62 = vpop.f32.mrb[23].mxu0  ;;  %3309 = vmatmul.mubr.msk.bf16.vlgmr.msra.gmra.mrb[8].mxu1 %vm87_vm1, %v637_v57  ;;  %v886_v57 = vld [vmem:[#allocation2 + $0x2] ss:$8 sm:$0x3] }
 0x992   :  { %3313 = vmatpush3.bf16.msra.mxu1 %v4102_v32  ;;  %3316 = vmatprep.mubr.msk.bf16.mxu1 %vm3934_vm0, %v3933_v0 }
 0x993   :  { %3314 = vmatprep.subr.bf16.mxu1 %v3933_v0 }
 0x996   :  { %3315 = vmatpush3.bf16.msra.mxu1 %v4112_v37 }
 0x997   :  { %3320 = vmatprep.subr.bf16.mxu1 %v3933_v0 }
 0x999   :  { %3317 = vmatmul.mubr.msk.bf16.vlgmr.msra.gmra.mrb[12].mxu1 %vm87_vm1, %v4175_v30 }
 0x99a   :  { %3321 = vmatpush3.bf16.msra.mxu1 %v4123_v38  ;;  %3324 = vmatprep.mubr.msk.bf16.mxu1 %vm3934_vm0, %v3933_v0 }
 0x99b   :  { %3322 = vmatprep.subr.bf16.mxu1 %v3933_v0 }
 0x99e   :  { %3323 = vmatpush3.bf16.msra.mxu1 %v4130_v39 }
 0x99f   :  { %3328 = vmatprep.subr.bf16.mxu1 %v3933_v0 }
 0xa64   :  { %v675_v4 = vpop.f32.mrb[8].mxu1 }
 0xa65   :  { %v684_v5 = vadd.f32 %v682_v63, %v675_v4  ;;  %v3310_v6 = vpop.f32.mrb[9].mxu1 }
 0xa66   :  { %v678_v7 = vpop.f32.mrb[10].mxu1 }
 0xa67   :  { %3739 = vtanh.f32 %v684_v5  ;;  %v3311_v8 = vpop.f32.mrb[11].mxu1 }
 0xa6c   :  { %v721_v9 = vpop.f32.mrb[12].mxu1 }
 0xa6d   :  { %v3318_v10 = vpop.f32.mrb[13].mxu1 }
 0xa6e   :  { %v724_v11 = vpop.f32.mrb[14].mxu1 }
 0xa6f   :  { %v3319_v16 = vpop.f32.mrb[15].mxu1 }
 0xa71   :  { %v3740_v19 = vpop.eup %3739 }
 0xa72   :  { %v686_v20 = vpack.c.bf16 %v3740_v19, %v3740_v19 }
 0xa74   :  { %3325 = vmatmul.mubr.msk.bf16.vlgmr.msra.gmra.mrb[16].mxu1 %vm87_vm1, %v686_v20 }
 0xa75   :  { %3329 = vmatpush3.bf16.msra.mxu1 %v4158_v3  ;;  %3332 = vmatprep.mubr.msk.bf16.mxu1 %vm3934_vm0, %v3933_v0 }
 0xa76   :  { %3330 = vmatprep.subr.bf16.mxu1 %v3933_v0 }
 0xa79   :  { %3331 = vmatpush3.bf16.msra.mxu1 %v4164_v18 }
 0xa7a   :  { %3344 = vmatprep.subr.bf16.mxu1 %v3933_v0 }
 0xb47   :  { %v764_v28 = vpop.f32.mrb[16].mxu1 }
 0xb48   :  { %v765_v30 = vadd.f32 %v764_v28, %v721_v9  ;;  %v3326_v31 = vpop.f32.mrb[17].mxu1 }
 0xb49   :  { %v767_v34 = vpop.f32.mrb[18].mxu1 }
 0xb4a   :  { %v770_v35 = vadd.f32 %v765_v30, %v4141_v52  ;;  %v3327_v36 = vpop.f32.mrb[19].mxu1 }
 0xb4c   :  { %3741 = vtanh.f32 %v770_v35  ;;  %v2986_v41 = vmul.f32 -1.442695, %v770_v35 }
 0xb4e   :  { %3743 = vpow2.f32 %v2986_v41 }
 0xb56   :  { %v3742_v40 = vpop.eup %3741 }
 0xb57   :  { %780 = vrot.lane.b32.xlu1 %v3742_v40, %s3935_s12 }
 0xb58   :  { %v3744_v42 = vpop.eup %3743 }
 0xb59   :  { %v774_v43 = vadd.f32 1.0, %v3744_v42 }
 0xb5b   :  { %3745 = vrcp.f32 %v774_v43  ;;  %v1025_v43 = vrot.slane %v886_v57, 1 }
 0xb65   :  { %v3746_v44 = vpop.eup %3745 }
 0xb66   :  { %v778_v47 = vmul.f32 %v3746_v44, %v4152_v17 }
 0xbc9   :  { %v781_v45 = vpop.permute.xlu1 %780 }
 0xbca   :  { %v783_v46 = vmul.f32 %v3746_v44, %v781_v45 }
 0xbcc   :  { %785 = vrot.lane.b32.xlu0 %v783_v46, %s3935_s12 }
 0xc3e   :  { %v786_v48 = vpop.permute.xlu0 %785 }
 0xc3f   :  { %v4245_v49 = vadd.f32 %v786_v48, %v778_v47 }
 0xc41   :  { %3747 = vtanh.f32 %v4245_v49 }
 0xc4b   :  { %v3748_v50 = vpop.eup %3747 }
 0xc4c   :  { %791 = vrot.lane.b32.xlu1 %v3748_v50, %s3935_s12 }
 0xcbe   :  { %v792_v51 = vpop.permute.xlu1 %791 }
 0xcbf   :  { %v4249_v53 = vmul.f32 %v3746_v44, %v792_v51 }
 0xcc1   :  { %v795_v55 = vpack.c.bf16 %v4249_v53, %v4249_v53 }
 0xcc3   :  { %797 = vrot.lane.b32.xlu1 %v795_v55, %s3936_s17 }
 0xd35   :  { %v4254_v56 = vpop.permute.xlu1 %797 }
 0xd36   :  { %3333 = vmatmul.mubr.msk.bf16.vlgmr.msra.gmra.mrb[20].mxu1 %vm87_vm1, %v4254_v56  ;;  %3341 = vmatmul.mubr.msk.bf16.vlgmr.msra.gmra.mrb[24].mxu0 %vm87_vm1, %v4254_v56 }
 0xd37   :  { %3345 = vmatpush3.bf16.msra.mxu1 %v4021_v12  ;;  %3360 = vmatprep.mubr.msk.bf16.mxu1 %vm3934_vm0, %v3933_v0 }
 0xd38   :  { %3346 = vmatprep.subr.bf16.mxu1 %v3933_v0  ;;  %3365 = vmatpush3.bf16.msra.mxu0 %v4078_v25 }
 0xd39   :  { %3366 = vmatprep.subr.bf16.mxu0 %v3933_v0  ;;  %3368 = vmatprep.mubr.msk.bf16.mxu0 %vm3934_vm0, %v3933_v0 }
 0xd3b   :  { %3347 = vmatpush3.bf16.msra.mxu1 %v4027_v13 }
 0xd3c   :  { %3348 = vmatprep.subr.bf16.mxu1 %v3933_v0  ;;  %3367 = vmatpush3.bf16.msra.mxu0 %v4084_v26 }
 0xd3d   :  { %3372 = vmatprep.subr.bf16.mxu0 %v3933_v0 }
 0xd3f   :  { %3349 = vmatpush3.bf16.msra.mxu1 %v4034_v14 }
 0xd40   :  { %3350 = vmatprep.subr.bf16.mxu1 %v3933_v0 }
 0xd43   :  { %3351 = vmatpush3.bf16.msra.mxu1 %v4041_v15 }
 0xd44   :  { %3352 = vmatprep.subr.bf16.mxu1 %v3933_v0 }
 0xd47   :  { %3353 = vmatpush3.bf16.msra.mxu1 %v4050_v21 }
 0xd48   :  { %3354 = vmatprep.subr.bf16.mxu1 %v3933_v0 }
 0xd4b   :  { %3355 = vmatpush3.bf16.msra.mxu1 %v4056_v22 }
 0xd4c   :  { %3356 = vmatprep.subr.bf16.mxu1 %v3933_v0 }
 0xd4f   :  { %3357 = vmatpush3.bf16.msra.mxu1 %v4063_v23 }
 0xd50   :  { %3358 = vmatprep.subr.bf16.mxu1 %v3933_v0 }
 0xd53   :  { %3359 = vmatpush3.bf16.msra.mxu1 %v4070_v24 }
 0xd54   :  { %3396 = vmatprep.subr.bf16.mxu1 %v3933_v0 }
 0xe09   :  { %v4284_v58 = vpop.f32.mrb[20].mxu1  ;;  %v921_v61 = vpop.f32.mrb[24].mxu0 }
 0xe0a   :  { %v927_v62 = vadd.f32 %v921_v61, %v886_v57  ;;  %v3334_v63 = vpop.f32.mrb[21].mxu1  ;;  %v3342_v4 = vpop.f32.mrb[25].mxu0 }
 0xe0b   :  { %v839_v5 = vpop.f32.mrb[22].mxu1  ;;  %v924_v6 = vpop.f32.mrb[26].mxu0 }
 0xe0c   :  { %v3335_v7 = vpop.f32.mrb[23].mxu1  ;;  %v3343_v8 = vpop.f32.mrb[27].mxu0  ;;  %v928_v9 = vsel %vm132_vm2, %v927_v62, -inf }
 0xe0d   :  { %929 = vmax.xlane.f32.xlu1 %v928_v9 }
 0xe9a   :  { %v930_v10 = vpop.xlane.xlu1 %929 }
 0xe9b   :  { %v931_v11 = vsub.f32 %v927_v62, %v930_v10 }
 0xe9d   :  { %v932_v16 = vmul.f32 1.442695, %v931_v11 }
 0xe9f   :  { %3749 = vpow2.f32 %v932_v16 }
 0xea9   :  { %v3750_v19 = vpop.eup %3749 }
 0xeaa   :  { %v934_v20 = vsel %vm132_vm2, %v3750_v19, 0.0 }
 0xeab   :  { %935 = vadd.xlane.f32.xlu0 %v934_v20 }
 0xf38   :  { %v936_v28 = vpop.xlane.xlu0 %935 }
 0xf39   :  { %3751 = vrcp.f32 %v936_v28 }
 0xf43   :  { %v3752_v30 = vpop.eup %3751 }
 0xf44   :  { %v4288_v31 = vmul.f32 %v3752_v30, %v3750_v19 }
 0xf46   :  { %v939_v34 = vpack.c.bf16 %v4288_v31, %v4288_v31 }
 0xf48   :  { %3361 = vmatmul.mubr.bf16.vlgmr.msra.gmra.mrb[24].mxu1 %v939_v34 }
 0xf49   :  { %3397 = vmatpush3.bf16.msra.mxu1 %v3990_v1  ;;  %3400 = vmatprep.mubr.msk.bf16.mxu1 %vm3934_vm0, %v3933_v0 }
 0xf4a   :  { %3398 = vmatprep.subr.bf16.mxu1 %v3933_v0 }
 0xf4d   :  { %3399 = vmatpush3.bf16.msra.mxu1 %v3996_v2 }
 0xf4e   :  { %3424 = vmatprep.subr.bf16.mxu1 %v3933_v0 }
0x101b   :  { %v974_v35 = vpop.f32.mrb[24].mxu1 }
0x101c   :  { %v980_v36 = vpack.c.bf16 %v974_v35, %v974_v35  ;;  %v3362_v40 = vpop.f32.mrb[25].mxu1 }
0x101d   :  { %v977_v41 = vpop.f32.mrb[26].mxu1 }
0x101e   :  { %v3363_v42 = vpop.f32.mrb[27].mxu1  ;;  %3369 = vmatmul.mubr.msk.bf16.vlgmr.msra.gmra.mrb[28].mxu0 %vm87_vm1, %v980_v36 }
0x101f   :  { %3373 = vmatpush3.bf16.msra.mxu0 %v4102_v32  ;;  %3376 = vmatprep.mubr.msk.bf16.mxu0 %vm3934_vm0, %v3933_v0 }
0x1020   :  { %3374 = vmatprep.subr.bf16.mxu0 %v3933_v0 }
0x1023   :  { %3375 = vmatpush3.bf16.msra.mxu0 %v4112_v37 }
0x1024   :  { %3380 = vmatprep.subr.bf16.mxu0 %v3933_v0 }
0x1026   :  { %3377 = vmatmul.mubr.msk.bf16.vlgmr.msra.gmra.mrb[32].mxu0 %vm87_vm1, %v4254_v56 }
0x1027   :  { %3381 = vmatpush3.bf16.msra.mxu0 %v4123_v38  ;;  %3384 = vmatprep.mubr.msk.bf16.mxu0 %vm3934_vm0, %v3933_v0 }
0x1028   :  { %3382 = vmatprep.subr.bf16.mxu0 %v3933_v0 }
0x102b   :  { %3383 = vmatpush3.bf16.msra.mxu0 %v4130_v39 }
0x102c   :  { %3388 = vmatprep.subr.bf16.mxu0 %v3933_v0 }
0x10f1   :  { %v1018_v44 = vpop.f32.mrb[28].mxu0 }
0x10f2   :  { %v1027_v45 = vadd.f32 %v1025_v43, %v1018_v44  ;;  %v3370_v46 = vpop.f32.mrb[29].mxu0  ;;  %v1229_v43 = vld [vmem:[#allocation2 + $0x3] ss:$8 sm:$0x3] }
0x10f3   :  { %v1021_v47 = vpop.f32.mrb[30].mxu0 }
0x10f4   :  { %3753 = vtanh.f32 %v1027_v45  ;;  %v3371_v48 = vpop.f32.mrb[31].mxu0 }
0x10f9   :  { %v1064_v50 = vpop.f32.mrb[32].mxu0 }
0x10fa   :  { %v3378_v51 = vpop.f32.mrb[33].mxu0 }
0x10fb   :  { %v1067_v55 = vpop.f32.mrb[34].mxu0 }
0x10fc   :  { %v3379_v56 = vpop.f32.mrb[35].mxu0 }
0x10fe   :  { %v3754_v61 = vpop.eup %3753 }
0x10ff   :  { %v1029_v62 = vpack.c.bf16 %v3754_v61, %v3754_v61 }
0x1101   :  { %3385 = vmatmul.mubr.msk.bf16.vlgmr.msra.gmra.mrb[36].mxu0 %vm87_vm1, %v1029_v62 }
0x1102   :  { %3389 = vmatpush3.bf16.msra.mxu0 %v4158_v3  ;;  %3392 = vmatprep.mubr.msk.bf16.mxu0 %vm3934_vm0, %v3933_v0 }
0x1103   :  { %3390 = vmatprep.subr.bf16.mxu0 %v3933_v0 }
0x1106   :  { %3391 = vmatpush3.bf16.msra.mxu0 %v4164_v18 }
0x1107   :  { %3404 = vmatprep.subr.bf16.mxu0 %v3933_v0 }
0x11d4   :  { %v1107_v57 = vpop.f32.mrb[36].mxu0 }
0x11d5   :  { %v1108_v63 = vadd.f32 %v1107_v57, %v1064_v50  ;;  %v3386_v4 = vpop.f32.mrb[37].mxu0 }
0x11d6   :  { %v1110_v5 = vpop.f32.mrb[38].mxu0 }
0x11d7   :  { %v1113_v6 = vadd.f32 %v1108_v63, %v4141_v52  ;;  %v3387_v7 = vpop.f32.mrb[39].mxu0 }
0x11d9   :  { %3755 = vtanh.f32 %v1113_v6  ;;  %v2992_v9 = vmul.f32 -1.442695, %v1113_v6 }
0x11db   :  { %3757 = vpow2.f32 %v2992_v9 }
0x11e3   :  { %v3756_v8 = vpop.eup %3755 }
0x11e4   :  { %1123 = vrot.lane.b32.xlu1 %v3756_v8, %s3935_s12 }
0x11e5   :  { %v3758_v10 = vpop.eup %3757 }
0x11e6   :  { %v1117_v11 = vadd.f32 1.0, %v3758_v10 }
0x11e8   :  { %3759 = vrcp.f32 %v1117_v11 }
0x11f2   :  { %v3760_v16 = vpop.eup %3759 }
0x11f3   :  { %v1121_v28 = vmul.f32 %v3760_v16, %v4245_v49 }
0x1256   :  { %v1124_v19 = vpop.permute.xlu1 %1123 }
0x1257   :  { %v1126_v20 = vmul.f32 %v3760_v16, %v1124_v19 }
0x1259   :  { %1128 = vrot.lane.b32.xlu0 %v1126_v20, %s3935_s12 }
0x12cb   :  { %v1129_v30 = vpop.permute.xlu0 %1128 }
0x12cc   :  { %v4324_v34 = vadd.f32 %v1129_v30, %v1121_v28 }
0x12ce   :  { %3761 = vtanh.f32 %v4324_v34 }
0x12d8   :  { %v3762_v35 = vpop.eup %3761 }
0x12d9   :  { %1134 = vrot.lane.b32.xlu1 %v3762_v35, %s3935_s12 }
0x134b   :  { %v1135_v36 = vpop.permute.xlu1 %1134 }
0x134c   :  { %v4328_v40 = vmul.f32 %v3760_v16, %v1135_v36 }
0x134e   :  { %v1138_v41 = vpack.c.bf16 %v4328_v40, %v4328_v40 }
0x1350   :  { %1140 = vrot.lane.b32.xlu1 %v1138_v41, %s3936_s17 }
0x13c2   :  { %v4333_v42 = vpop.permute.xlu1 %1140 }
0x13c3   :  { %3393 = vmatmul.mubr.msk.bf16.vlgmr.msra.gmra.mrb[40].mxu0 %vm87_vm1, %v4333_v42  ;;  %3401 = vmatmul.mubr.msk.bf16.vlgmr.msra.gmra.mrb[28].mxu1 %vm87_vm1, %v4333_v42 }
0x13c4   :  { %3405 = vmatpush3.bf16.msra.mxu0 %v4021_v12  ;;  %3420 = vmatprep.mubr.msk.bf16.mxu0 %vm3934_vm0, %v3933_v0 }
0x13c5   :  { %3406 = vmatprep.subr.bf16.mxu0 %v3933_v0  ;;  %3425 = vmatpush3.bf16.msra.mxu1 %v4078_v25 }
0x13c6   :  { %3426 = vmatprep.subr.bf16.mxu1 %v3933_v0  ;;  %3428 = vmatprep.mubr.msk.bf16.mxu1 %vm3934_vm0, %v3933_v0 }
0x13c8   :  { %3407 = vmatpush3.bf16.msra.mxu0 %v4027_v13 }
0x13c9   :  { %3408 = vmatprep.subr.bf16.mxu0 %v3933_v0  ;;  %3427 = vmatpush3.bf16.msra.mxu1 %v4084_v26 }
0x13ca   :  { %3432 = vmatprep.subr.bf16.mxu1 %v3933_v0 }
0x13cc   :  { %3409 = vmatpush3.bf16.msra.mxu0 %v4034_v14 }
0x13cd   :  { %3410 = vmatprep.subr.bf16.mxu0 %v3933_v0 }
0x13d0   :  { %3411 = vmatpush3.bf16.msra.mxu0 %v4041_v15 }
0x13d1   :  { %3412 = vmatprep.subr.bf16.mxu0 %v3933_v0 }
0x13d4   :  { %3413 = vmatpush3.bf16.msra.mxu0 %v4050_v21 }
0x13d5   :  { %3414 = vmatprep.subr.bf16.mxu0 %v3933_v0 }
0x13d8   :  { %3415 = vmatpush3.bf16.msra.mxu0 %v4056_v22 }
0x13d9   :  { %3416 = vmatprep.subr.bf16.mxu0 %v3933_v0 }
0x13dc   :  { %3417 = vmatpush3.bf16.msra.mxu0 %v4063_v23 }
0x13dd   :  { %3418 = vmatprep.subr.bf16.mxu0 %v3933_v0 }
0x13e0   :  { %3419 = vmatpush3.bf16.msra.mxu0 %v4070_v24 }
0x13e1   :  { %3456 = vmatprep.subr.bf16.mxu0 %v3933_v0 }
0x1496   :  { %v4363_v44 = vpop.f32.mrb[40].mxu0  ;;  %v1264_v45 = vpop.f32.mrb[28].mxu1 }
0x1497   :  { %v1270_v46 = vadd.f32 %v1264_v45, %v1229_v43  ;;  %v3394_v47 = vpop.f32.mrb[41].mxu0  ;;  %v3402_v48 = vpop.f32.mrb[29].mxu1 }
0x1498   :  { %v1182_v50 = vpop.f32.mrb[42].mxu0  ;;  %v1267_v51 = vpop.f32.mrb[30].mxu1 }
0x1499   :  { %v3395_v55 = vpop.f32.mrb[43].mxu0  ;;  %v3403_v56 = vpop.f32.mrb[31].mxu1  ;;  %v1271_v61 = vsel %vm132_vm2, %v1270_v46, -inf }
0x149a   :  { %1272 = vmax.xlane.f32.xlu0 %v1271_v61 }
0x1527   :  { %v1273_v62 = vpop.xlane.xlu0 %1272 }
0x1528   :  { %v1274_v57 = vsub.f32 %v1270_v46, %v1273_v62 }
0x152a   :  { %v1275_v63 = vmul.f32 1.442695, %v1274_v57 }
0x152c   :  { %3763 = vpow2.f32 %v1275_v63 }
0x1536   :  { %v3764_v4 = vpop.eup %3763 }
0x1537   :  { %v1277_v5 = vsel %vm132_vm2, %v3764_v4, 0.0 }
0x1538   :  { %1278 = vadd.xlane.f32.xlu1 %v1277_v5 }
0x15c5   :  { %v1279_v6 = vpop.xlane.xlu1 %1278 }
0x15c6   :  { %3765 = vrcp.f32 %v1279_v6 }
0x15d0   :  { %v3766_v7 = vpop.eup %3765 }
0x15d1   :  { %v4367_v8 = vmul.f32 %v3766_v7, %v3764_v4 }
0x15d3   :  { %v1282_v9 = vpack.c.bf16 %v4367_v8, %v4367_v8 }
0x15d5   :  { %3421 = vmatmul.mubr.bf16.vlgmr.msra.gmra.mrb[44].mxu0 %v1282_v9 }
0x15d6   :  { %3457 = vmatpush3.bf16.msra.mxu0 %v3990_v1  ;;  %3460 = vmatprep.mubr.msk.bf16.mxu0 %vm3934_vm0, %v3933_v0  ;;  %v1368_v1 = vrot.slane %v1229_v43, 1 }
0x15d7   :  { %3458 = vmatprep.subr.bf16.mxu0 %v3933_v0 }
0x15da   :  { %3459 = vmatpush3.bf16.msra.mxu0 %v3996_v2 }
0x15db   :  { %3484 = vmatprep.subr.bf16.mxu0 %v3933_v0 }
0x16a8   :  { %v1317_v10 = vpop.f32.mrb[44].mxu0 }
0x16a9   :  { %v1323_v11 = vpack.c.bf16 %v1317_v10, %v1317_v10  ;;  %v3422_v16 = vpop.f32.mrb[45].mxu0 }
0x16aa   :  { %v1320_v19 = vpop.f32.mrb[46].mxu0 }
0x16ab   :  { %v3423_v20 = vpop.f32.mrb[47].mxu0  ;;  %3429 = vmatmul.mubr.msk.bf16.vlgmr.msra.gmra.mrb[32].mxu1 %vm87_vm1, %v1323_v11 }
0x16ac   :  { %3433 = vmatpush3.bf16.msra.mxu1 %v4102_v32  ;;  %3436 = vmatprep.mubr.msk.bf16.mxu1 %vm3934_vm0, %v3933_v0 }
0x16ad   :  { %3434 = vmatprep.subr.bf16.mxu1 %v3933_v0 }
0x16b0   :  { %3435 = vmatpush3.bf16.msra.mxu1 %v4112_v37 }
0x16b1   :  { %3440 = vmatprep.subr.bf16.mxu1 %v3933_v0 }
0x16b3   :  { %3437 = vmatmul.mubr.msk.bf16.vlgmr.msra.gmra.mrb[36].mxu1 %vm87_vm1, %v4333_v42 }
0x16b4   :  { %3441 = vmatpush3.bf16.msra.mxu1 %v4123_v38  ;;  %3444 = vmatprep.mubr.msk.bf16.mxu1 %vm3934_vm0, %v3933_v0 }
0x16b5   :  { %3442 = vmatprep.subr.bf16.mxu1 %v3933_v0 }
0x16b8   :  { %3443 = vmatpush3.bf16.msra.mxu1 %v4130_v39 }
0x16b9   :  { %3448 = vmatprep.subr.bf16.mxu1 %v3933_v0 }
0x177e   :  { %v1361_v2 = vpop.f32.mrb[32].mxu1 }
0x177f   :  { %v1370_v28 = vadd.f32 %v1368_v1, %v1361_v2  ;;  %v3430_v30 = vpop.f32.mrb[33].mxu1 }
0x1780   :  { %v1364_v35 = vpop.f32.mrb[34].mxu1 }
0x1781   :  { %3767 = vtanh.f32 %v1370_v28  ;;  %v3431_v36 = vpop.f32.mrb[35].mxu1 }
0x1786   :  { %v1407_v41 = vpop.f32.mrb[36].mxu1 }
0x1787   :  { %v3438_v42 = vpop.f32.mrb[37].mxu1 }
0x1788   :  { %v1410_v45 = vpop.f32.mrb[38].mxu1 }
0x1789   :  { %v3439_v46 = vpop.f32.mrb[39].mxu1 }
0x178b   :  { %v3768_v47 = vpop.eup %3767 }
0x178c   :  { %v1372_v48 = vpack.c.bf16 %v3768_v47, %v3768_v47 }
0x178e   :  { %3445 = vmatmul.mubr.msk.bf16.vlgmr.msra.gmra.mrb[40].mxu1 %vm87_vm1, %v1372_v48 }
0x178f   :  { %3449 = vmatpush3.bf16.msra.mxu1 %v4158_v3  ;;  %3452 = vmatprep.mubr.msk.bf16.mxu1 %vm3934_vm0, %v3933_v0 }
0x1790   :  { %3450 = vmatprep.subr.bf16.mxu1 %v3933_v0 }
0x1793   :  { %3451 = vmatpush3.bf16.msra.mxu1 %v4164_v18 }
0x1794   :  { %3464 = vmatprep.subr.bf16.mxu1 %v3933_v0 }
0x1861   :  { %v1450_v43 = vpop.f32.mrb[40].mxu1 }
0x1862   :  { %v1451_v50 = vadd.f32 %v1450_v43, %v1407_v41  ;;  %v3446_v51 = vpop.f32.mrb[41].mxu1  ;;  %v4453_v43 = vld [vmem:[%s4993_s2] sm:$0xff]  }
0x1863   :  { %v1453_v55 = vpop.f32.mrb[42].mxu1 }
0x1864   :  { %v1456_v56 = vadd.f32 %v1451_v50, %v4141_v52  ;;  %v3447_v61 = vpop.f32.mrb[43].mxu1  ;;  %v4462_v50 = vld [vmem:[%s4993_s2 + $0x8] sm:$0xff]  }
0x1866   :  { %3769 = vtanh.f32 %v1456_v56  ;;  %v2998_v57 = vmul.f32 -1.442695, %v1456_v56 }
0x1868   :  { %3771 = vpow2.f32 %v2998_v57 }
0x1870   :  { %v3770_v62 = vpop.eup %3769 }
0x1871   :  { %1466 = vrot.lane.b32.xlu0 %v3770_v62, %s3935_s12 }
0x1872   :  { %v3772_v63 = vpop.eup %3771 }
0x1873   :  { %v1460_v4 = vadd.f32 1.0, %v3772_v63 }
0x1875   :  { %3773 = vrcp.f32 %v1460_v4 }
0x187f   :  { %v3774_v5 = vpop.eup %3773 }
0x1880   :  { %v1464_v9 = vmul.f32 %v3774_v5, %v4324_v34 }
0x18e3   :  { %v1467_v6 = vpop.permute.xlu0 %1466 }
0x18e4   :  { %v1469_v7 = vmul.f32 %v3774_v5, %v1467_v6 }
0x18e6   :  { %1471 = vrot.lane.b32.xlu1 %v1469_v7, %s3935_s12 }
0x1958   :  { %v1472_v10 = vpop.permute.xlu1 %1471 }
0x1959   :  { %v4403_v11 = vadd.f32 %v1472_v10, %v1464_v9 }
0x195b   :  { %3775 = vtanh.f32 %v4403_v11 }
0x1965   :  { %v3776_v16 = vpop.eup %3775 }
0x1966   :  { %1477 = vrot.lane.b32.xlu0 %v3776_v16, %s3935_s12 }
0x19d8   :  { %v1478_v19 = vpop.permute.xlu0 %1477 }
0x19d9   :  { %v4407_v20 = vmul.f32 %v3774_v5, %v1478_v19 }
0x19db   :  { %v1481_v1 = vpack.c.bf16 %v4407_v20, %v4407_v20 }
0x19dd   :  { %1483 = vrot.lane.b32.xlu1 %v1481_v1, %s3936_s17 }
0x1a4f   :  { %v4412_v2 = vpop.permute.xlu1 %1483 }
0x1a50   :  { %3453 = vmatmul.mubr.msk.bf16.vlgmr.msra.gmra.mrb[44].mxu1 %vm87_vm1, %v4412_v2  ;;  %3461 = vmatmul.mubr.msk.bf16.vlgmr.msra.gmra.mrb[48].mxu0 %vm87_vm1, %v4412_v2 }
0x1a51   :  { %3465 = vmatpush3.bf16.msra.mxu1 %v4021_v12  ;;  %3480 = vmatprep.mubr.msk.bf16.mxu1 %vm3934_vm0, %v3933_v0  ;;  %v1572_v12 = vld [vmem:[#allocation2 + $0x4] ss:$8 sm:$0x3] }
0x1a52   :  { %3466 = vmatprep.subr.bf16.mxu1 %v3933_v0  ;;  %3485 = vmatpush3.bf16.msra.mxu0 %v4078_v25 }
0x1a53   :  { %3486 = vmatprep.subr.bf16.mxu0 %v3933_v0  ;;  %3488 = vmatprep.mubr.msk.bf16.mxu0 %vm3934_vm0, %v3933_v0 }
0x1a55   :  { %3467 = vmatpush3.bf16.msra.mxu1 %v4027_v13 }
0x1a56   :  { %3468 = vmatprep.subr.bf16.mxu1 %v3933_v0  ;;  %3487 = vmatpush3.bf16.msra.mxu0 %v4084_v26 }
0x1a57   :  { %3492 = vmatprep.subr.bf16.mxu0 %v3933_v0 }
0x1a59   :  { %3469 = vmatpush3.bf16.msra.mxu1 %v4034_v14 }
0x1a5a   :  { %3470 = vmatprep.subr.bf16.mxu1 %v3933_v0 }
0x1a5d   :  { %3471 = vmatpush3.bf16.msra.mxu1 %v4041_v15 }
0x1a5e   :  { %3472 = vmatprep.subr.bf16.mxu1 %v3933_v0 }
0x1a61   :  { %3473 = vmatpush3.bf16.msra.mxu1 %v4050_v21 }
0x1a62   :  { %3474 = vmatprep.subr.bf16.mxu1 %v3933_v0 }
0x1a65   :  { %3475 = vmatpush3.bf16.msra.mxu1 %v4056_v22 }
0x1a66   :  { %3476 = vmatprep.subr.bf16.mxu1 %v3933_v0 }
0x1a69   :  { %3477 = vmatpush3.bf16.msra.mxu1 %v4063_v23 }
0x1a6a   :  { %3478 = vmatprep.subr.bf16.mxu1 %v3933_v0 }
0x1a6d   :  { %3479 = vmatpush3.bf16.msra.mxu1 %v4070_v24 }
0x1a6e   :  { %3516 = vmatprep.subr.bf16.mxu1 %v3933_v0 }
0x1b23   :  { %v4442_v13 = vpop.f32.mrb[44].mxu1  ;;  %v1607_v14 = vpop.f32.mrb[48].mxu0 }
0x1b24   :  { %v1613_v15 = vadd.f32 %v1607_v14, %v1572_v12  ;;  %v3454_v21 = vpop.f32.mrb[45].mxu1  ;;  %v3462_v25 = vpop.f32.mrb[49].mxu0 }
0x1b25   :  { %v1525_v26 = vpop.f32.mrb[46].mxu1  ;;  %v1610_v28 = vpop.f32.mrb[50].mxu0 }
0x1b26   :  { %v3455_v22 = vpop.f32.mrb[47].mxu1  ;;  %v3463_v30 = vpop.f32.mrb[51].mxu0  ;;  %v1614_v35 = vsel %vm132_vm2, %v1613_v15, -inf }
0x1b27   :  { %1615 = vmax.xlane.f32.xlu0 %v1614_v35 }
0x1bb4   :  { %v1616_v23 = vpop.xlane.xlu0 %1615 }
0x1bb5   :  { %v1617_v36 = vsub.f32 %v1613_v15, %v1616_v23 }
0x1bb7   :  { %v1618_v41 = vmul.f32 1.442695, %v1617_v36 }
0x1bb9   :  { %3777 = vpow2.f32 %v1618_v41 }
0x1bc3   :  { %v3778_v24 = vpop.eup %3777 }
0x1bc4   :  { %v1620_v42 = vsel %vm132_vm2, %v3778_v24, 0.0 }
0x1bc5   :  { %1621 = vadd.xlane.f32.xlu1 %v1620_v42  ;;  %v4510_v42 = vld [vmem:[%s4992_s1] sm:$0xff]  }
0x1c52   :  { %v1622_v45 = vpop.xlane.xlu1 %1621 }
0x1c53   :  { %3779 = vrcp.f32 %v1622_v45  ;;  %v4519_v45 = vld [vmem:[%s4993_s2 + $0x30] sm:$0xff]  }
0x1c5d   :  { %v3780_v46 = vpop.eup %3779 }
0x1c5e   :  { %v4446_v47 = vmul.f32 %v3780_v46, %v3778_v24  ;;  %v4528_v46 = vld [vmem:[%s4992_s1 + $0x8] sm:$0xff]  }
0x1c60   :  { %v1625_v48 = vpack.c.bf16 %v4446_v47, %v4446_v47 }
0x1c62   :  { %3481 = vmatmul.mubr.bf16.vlgmr.msra.gmra.mrb[48].mxu1 %v1625_v48  ;;  %v4535_v48 = vld [vmem:[%s4993_s2 + $0x38] sm:$0xff]  }
0x1c63   :  { %3517 = vmatpush3.bf16.msra.mxu1 %v4453_v43  ;;  %3520 = vmatprep.mubr.msk.bf16.mxu1 %vm3934_vm0, %v3933_v0 }
0x1c64   :  { %3518 = vmatprep.subr.bf16.mxu1 %v3933_v0 }
0x1c67   :  { %3519 = vmatpush3.bf16.msra.mxu1 %v4462_v50 }
0x1c68   :  { %3544 = vmatprep.subr.bf16.mxu1 %v3933_v0 }
0x1d35   :  { %v1660_v51 = vpop.f32.mrb[48].mxu1 }
0x1d36   :  { %v1666_v55 = vpack.c.bf16 %v1660_v51, %v1660_v51  ;;  %v3482_v56 = vpop.f32.mrb[49].mxu1  ;;  %v4542_v51 = vld [vmem:[%s4992_s1 + $0x10] sm:$0xff]  }
0x1d37   :  { %v1663_v61 = vpop.f32.mrb[50].mxu1  ;;  %v4556_v56 = vld [vmem:[%s4992_s1 + $0x20] sm:$0xff]  }
0x1d38   :  { %v3483_v62 = vpop.f32.mrb[51].mxu1  ;;  %3489 = vmatmul.mubr.msk.bf16.vlgmr.msra.gmra.mrb[52].mxu0 %vm87_vm1, %v1666_v55  ;;  %v4549_v55 = vld [vmem:[%s4992_s1 + $0x18] sm:$0xff]   ;;  %v4563_v61 = vld [vmem:[%s4992_s1 + $0x28] sm:$0xff]  }
0x1d39   :  { %3493 = vmatpush3.bf16.msra.mxu0 %v4102_v32  ;;  %3496 = vmatprep.mubr.msk.bf16.mxu0 %vm3934_vm0, %v3933_v0  ;;  %v1711_v32 = vrot.slane %v1572_v12, 1  ;;  %v4570_v62 = vld [vmem:[%s4992_s1 + $0x30] sm:$0xff]  }
0x1d3a   :  { %3494 = vmatprep.subr.bf16.mxu0 %v3933_v0 }
0x1d3d   :  { %3495 = vmatpush3.bf16.msra.mxu0 %v4112_v37 }
0x1d3e   :  { %3500 = vmatprep.subr.bf16.mxu0 %v3933_v0 }
0x1d40   :  { %3497 = vmatmul.mubr.msk.bf16.vlgmr.msra.gmra.mrb[56].mxu0 %vm87_vm1, %v4412_v2 }
0x1d41   :  { %3501 = vmatpush3.bf16.msra.mxu0 %v4123_v38  ;;  %3504 = vmatprep.mubr.msk.bf16.mxu0 %vm3934_vm0, %v3933_v0 }
0x1d42   :  { %3502 = vmatprep.subr.bf16.mxu0 %v3933_v0 }
0x1d45   :  { %3503 = vmatpush3.bf16.msra.mxu0 %v4130_v39 }
0x1d46   :  { %3508 = vmatprep.subr.bf16.mxu0 %v3933_v0 }
0x1e0b   :  { %v1704_v57 = vpop.f32.mrb[52].mxu0 }
0x1e0c   :  { %v1713_v63 = vadd.f32 %v1711_v32, %v1704_v57  ;;  %v3490_v37 = vpop.f32.mrb[53].mxu0  ;;  %v4577_v32 = vld [vmem:[%s4992_s1 + $0x38] sm:$0xff]   ;;  %v1915_v57 = vld [vmem:[#allocation2 + $0x5] ss:$8 sm:$0x3] }
0x1e0d   :  { %v1707_v4 = vpop.f32.mrb[54].mxu0 }
0x1e0e   :  { %3781 = vtanh.f32 %v1713_v63  ;;  %v3491_v5 = vpop.f32.mrb[55].mxu0 }
0x1e13   :  { %v1750_v6 = vpop.f32.mrb[56].mxu0 }
0x1e14   :  { %v3498_v7 = vpop.f32.mrb[57].mxu0 }
0x1e15   :  { %v1753_v9 = vpop.f32.mrb[58].mxu0 }
0x1e16   :  { %v3499_v38 = vpop.f32.mrb[59].mxu0 }
0x1e18   :  { %v3782_v10 = vpop.eup %3781 }
0x1e19   :  { %v1715_v16 = vpack.c.bf16 %v3782_v10, %v3782_v10 }
0x1e1b   :  { %3505 = vmatmul.mubr.msk.bf16.vlgmr.msra.gmra.mrb[60].mxu0 %vm87_vm1, %v1715_v16 }
0x1e1c   :  { %3509 = vmatpush3.bf16.msra.mxu0 %v4158_v3  ;;  %3512 = vmatprep.mubr.msk.bf16.mxu0 %vm3934_vm0, %v3933_v0 }
0x1e1d   :  { %3510 = vmatprep.subr.bf16.mxu0 %v3933_v0 }
0x1e20   :  { %3511 = vmatpush3.bf16.msra.mxu0 %v4164_v18 }
0x1e21   :  { %3524 = vmatprep.subr.bf16.mxu0 %v3933_v0 }
0x1eee   :  { %v1793_v39 = vpop.f32.mrb[60].mxu0 }
0x1eef   :  { %v1794_v19 = vadd.f32 %v1793_v39, %v1750_v6  ;;  %v3506_v1 = vpop.f32.mrb[61].mxu0 }
0x1ef0   :  { %v1796_v2 = vpop.f32.mrb[62].mxu0 }
0x1ef1   :  { %v1799_v12 = vadd.f32 %v1794_v19, %v4141_v52  ;;  %v3507_v14 = vpop.f32.mrb[63].mxu0 }
0x1ef3   :  { %3783 = vtanh.f32 %v1799_v12  ;;  %v3004_v3 = vmul.f32 -1.442695, %v1799_v12 }
0x1ef5   :  { %3785 = vpow2.f32 %v3004_v3 }
0x1efd   :  { %v3784_v15 = vpop.eup %3783 }
0x1efe   :  { %1809 = vrot.lane.b32.xlu0 %v3784_v15, %s3935_s12 }
0x1eff   :  { %v3786_v21 = vpop.eup %3785 }
0x1f00   :  { %v1803_v25 = vadd.f32 1.0, %v3786_v21 }
0x1f02   :  { %3787 = vrcp.f32 %v1803_v25 }
0x1f0c   :  { %v3788_v26 = vpop.eup %3787 }
0x1f0d   :  { %v1807_v22 = vmul.f32 %v3788_v26, %v4403_v11 }
0x1f70   :  { %v1810_v18 = vpop.permute.xlu0 %1809 }
0x1f71   :  { %v1812_v28 = vmul.f32 %v3788_v26, %v1810_v18 }
0x1f73   :  { %1814 = vrot.lane.b32.xlu1 %v1812_v28, %s3935_s12 }
0x1fe5   :  { %v1815_v30 = vpop.permute.xlu1 %1814 }
0x1fe6   :  { %v4492_v35 = vadd.f32 %v1815_v30, %v1807_v22  ;;  %v4599_v30 = vld [vmem:[%s4993_s2 + $0x20] sm:$0xff]  }
0x1fe8   :  { %3789 = vtanh.f32 %v4492_v35 }
0x1ff2   :  { %v3790_v52 = vpop.eup %3789 }
0x1ff3   :  { %1820 = vrot.lane.b32.xlu0 %v3790_v52, %s3935_s12  ;;  %v4608_v52 = vld [vmem:[%s4993_s2 + $0x28] sm:$0xff]  }
0x2065   :  { %v1821_v23 = vpop.permute.xlu0 %1820 }
0x2066   :  { %v4496_v36 = vmul.f32 %v3788_v26, %v1821_v23  ;;  %v4617_v23 = vld [vmem:[%s4993_s2 + $0x10] sm:$0xff]  }
0x2068   :  { %v1824_v41 = vpack.c.bf16 %v4496_v36, %v4496_v36 }
0x206a   :  { %1826 = vrot.lane.b32.xlu1 %v1824_v41, %s3936_s17  ;;  %v4626_v41 = vld [vmem:[%s4993_s2 + $0x18] sm:$0xff]  }
0x20dc   :  { %v4501_v24 = vpop.permute.xlu1 %1826 }
0x20dd   :  { %3513 = vmatmul.mubr.msk.bf16.vlgmr.msra.gmra.mrb[64].mxu0 %vm87_vm1, %v4501_v24  ;;  %3521 = vmatmul.mubr.msk.bf16.vlgmr.msra.gmra.mrb[52].mxu1 %vm87_vm1, %v4501_v24 }
0x20de   :  { %3525 = vmatpush3.bf16.msra.mxu0 %v4510_v42  ;;  %3540 = vmatprep.mubr.msk.bf16.mxu0 %vm3934_vm0, %v3933_v0 }
0x20df   :  { %3526 = vmatprep.subr.bf16.mxu0 %v3933_v0  ;;  %3545 = vmatpush3.bf16.msra.mxu1 %v4519_v45 }
0x20e0   :  { %3546 = vmatprep.subr.bf16.mxu1 %v3933_v0  ;;  %3548 = vmatprep.mubr.msk.bf16.mxu1 %vm3934_vm0, %v3933_v0 }
0x20e2   :  { %3527 = vmatpush3.bf16.msra.mxu0 %v4528_v46 }
0x20e3   :  { %3528 = vmatprep.subr.bf16.mxu0 %v3933_v0  ;;  %3547 = vmatpush3.bf16.msra.mxu1 %v4535_v48 }
0x20e4   :  { %3552 = vmatprep.subr.bf16.mxu1 %v3933_v0 }
0x20e6   :  { %3529 = vmatpush3.bf16.msra.mxu0 %v4542_v51 }
0x20e7   :  { %3530 = vmatprep.subr.bf16.mxu0 %v3933_v0 }
0x20ea   :  { %3531 = vmatpush3.bf16.msra.mxu0 %v4549_v55 }
0x20eb   :  { %3532 = vmatprep.subr.bf16.mxu0 %v3933_v0 }
0x20ee   :  { %3533 = vmatpush3.bf16.msra.mxu0 %v4556_v56 }
0x20ef   :  { %3534 = vmatprep.subr.bf16.mxu0 %v3933_v0 }
0x20f2   :  { %3535 = vmatpush3.bf16.msra.mxu0 %v4563_v61 }
0x20f3   :  { %3536 = vmatprep.subr.bf16.mxu0 %v3933_v0 }
0x20f6   :  { %3537 = vmatpush3.bf16.msra.mxu0 %v4570_v62 }
0x20f7   :  { %3538 = vmatprep.subr.bf16.mxu0 %v3933_v0 }
0x20fa   :  { %3539 = vmatpush3.bf16.msra.mxu0 %v4577_v32 }
0x20fb   :  { %3576 = vmatprep.subr.bf16.mxu0 %v3933_v0 }
0x21b0   :  { %v4581_v63 = vpop.f32.mrb[64].mxu0  ;;  %v1950_v37 = vpop.f32.mrb[52].mxu1 }
0x21b1   :  { %v1956_v4 = vadd.f32 %v1950_v37, %v1915_v57  ;;  %v3514_v5 = vpop.f32.mrb[65].mxu0  ;;  %v3522_v6 = vpop.f32.mrb[53].mxu1 }
0x21b2   :  { %v1868_v7 = vpop.f32.mrb[66].mxu0  ;;  %v1953_v9 = vpop.f32.mrb[54].mxu1 }
0x21b3   :  { %v3515_v38 = vpop.f32.mrb[67].mxu0  ;;  %v3523_v10 = vpop.f32.mrb[55].mxu1  ;;  %v1957_v16 = vsel %vm132_vm2, %v1956_v4, -inf }
0x21b4   :  { %1958 = vmax.xlane.f32.xlu0 %v1957_v16 }
0x2241   :  { %v1959_v39 = vpop.xlane.xlu0 %1958 }
0x2242   :  { %v1960_v19 = vsub.f32 %v1956_v4, %v1959_v39 }
0x2244   :  { %v1961_v1 = vmul.f32 1.442695, %v1960_v19 }
0x2246   :  { %3791 = vpow2.f32 %v1961_v1  ;;  %v4634_v1 = vld [vmem:[%s4993_s2 + $0x40] sm:$0xff]  }
0x2250   :  { %v3792_v2 = vpop.eup %3791 }
0x2251   :  { %v1963_v12 = vsel %vm132_vm2, %v3792_v2, 0.0 }
0x2252   :  { %1964 = vadd.xlane.f32.xlu1 %v1963_v12 }
0x22df   :  { %v1965_v14 = vpop.xlane.xlu1 %1964 }
0x22e0   :  { %3793 = vrcp.f32 %v1965_v14 }
0x22ea   :  { %v3794_v15 = vpop.eup %3793 }
0x22eb   :  { %v4585_v3 = vmul.f32 %v3794_v15, %v3792_v2 }
0x22ed   :  { %v1968_v21 = vpack.c.bf16 %v4585_v3, %v4585_v3 }
0x22ef   :  { %3541 = vmatmul.mubr.bf16.vlgmr.msra.gmra.mrb[68].mxu0 %v1968_v21  ;;  %v4650_v21 = vld [vmem:[%s4994_s3] sm:$0x1] }
0x22f0   :  { %3577 = vmatpush3.bf16.msra.mxu0 %v4453_v43  ;;  %3580 = vmatprep.mubr.msk.bf16.mxu0 %vm3934_vm0, %v3933_v0 }
0x22f1   :  { %3578 = vmatprep.subr.bf16.mxu0 %v3933_v0 }
0x22f4   :  { %3579 = vmatpush3.bf16.msra.mxu0 %v4462_v50 }
0x22f5   :  { %3604 = vmatprep.subr.bf16.mxu0 %v3933_v0 }
0x23c2   :  { %v2003_v25 = vpop.f32.mrb[68].mxu0 }
0x23c3   :  { %v2009_v26 = vpack.c.bf16 %v2003_v25, %v2003_v25  ;;  %v3542_v18 = vpop.f32.mrb[69].mxu0 }
0x23c4   :  { %v2006_v28 = vpop.f32.mrb[70].mxu0 }
0x23c5   :  { %v3543_v22 = vpop.f32.mrb[71].mxu0  ;;  %3549 = vmatmul.mubr.msk.bf16.vlgmr.msra.gmra.mrb[56].mxu1 %vm87_vm1, %v2009_v26 }
0x23c6   :  { %3553 = vmatpush3.bf16.msra.mxu1 %v4599_v30  ;;  %3556 = vmatprep.mubr.msk.bf16.mxu1 %vm3934_vm0, %v3933_v0 }
0x23c7   :  { %3554 = vmatprep.subr.bf16.mxu1 %v3933_v0 }
0x23ca   :  { %3555 = vmatpush3.bf16.msra.mxu1 %v4608_v52 }
0x23cb   :  { %3560 = vmatprep.subr.bf16.mxu1 %v3933_v0 }
0x23cd   :  { %3557 = vmatmul.mubr.msk.bf16.vlgmr.msra.gmra.mrb[60].mxu1 %vm87_vm1, %v4501_v24  ;;  %v2054_v24 = vrot.slane %v1915_v57, 1  ;;  %v4643_v57 = vld [vmem:[%s4993_s2 + $0x48] sm:$0xff]  }
0x23ce   :  { %3561 = vmatpush3.bf16.msra.mxu1 %v4617_v23  ;;  %3564 = vmatprep.mubr.msk.bf16.mxu1 %vm3934_vm0, %v3933_v0 }
0x23cf   :  { %3562 = vmatprep.subr.bf16.mxu1 %v3933_v0 }
0x23d2   :  { %3563 = vmatpush3.bf16.msra.mxu1 %v4626_v41 }
0x23d3   :  { %3568 = vmatprep.subr.bf16.mxu1 %v3933_v0 }
0x2498   :  { %v2047_v37 = vpop.f32.mrb[56].mxu1 }
0x2499   :  { %v2056_v4 = vadd.f32 %v2054_v24, %v2047_v37  ;;  %v3550_v5 = vpop.f32.mrb[57].mxu1 }
0x249a   :  { %v2050_v6 = vpop.f32.mrb[58].mxu1 }
0x249b   :  { %3795 = vtanh.f32 %v2056_v4  ;;  %v3551_v7 = vpop.f32.mrb[59].mxu1 }
0x24a0   :  { %v2093_v9 = vpop.f32.mrb[60].mxu1 }
0x24a1   :  { %v3558_v38 = vpop.f32.mrb[61].mxu1 }
0x24a2   :  { %v2096_v10 = vpop.f32.mrb[62].mxu1 }
0x24a3   :  { %v3559_v16 = vpop.f32.mrb[63].mxu1 }
0x24a5   :  { %v3796_v39 = vpop.eup %3795 }
0x24a6   :  { %v2058_v19 = vpack.c.bf16 %v3796_v39, %v3796_v39 }
0x24a8   :  { %3565 = vmatmul.mubr.msk.bf16.vlgmr.msra.gmra.mrb[64].mxu1 %vm87_vm1, %v2058_v19 }
0x24a9   :  { %3569 = vmatpush3.bf16.msra.mxu1 %v4634_v1  ;;  %3572 = vmatprep.mubr.msk.bf16.mxu1 %vm3934_vm0, %v3933_v0 }
0x24aa   :  { %3570 = vmatprep.subr.bf16.mxu1 %v3933_v0 }
0x24ad   :  { %3571 = vmatpush3.bf16.msra.mxu1 %v4643_v57 }
0x24ae   :  { %3584 = vmatprep.subr.bf16.mxu1 %v3933_v0 }
0x257b   :  { %v2136_v2 = vpop.f32.mrb[64].mxu1 }
0x257c   :  { %v2137_v12 = vadd.f32 %v2136_v2, %v2093_v9  ;;  %v3566_v14 = vpop.f32.mrb[65].mxu1  ;;  %v2258_v2 = vld [vmem:[#allocation2 + $0x6] ss:$8 sm:$0x3] }
0x257d   :  { %v2139_v15 = vpop.f32.mrb[66].mxu1 }
0x257e   :  { %v2142_v25 = vadd.f32 %v4650_v21, %v2137_v12  ;;  %v3567_v26 = vpop.f32.mrb[67].mxu1 }
0x2580   :  { %3797 = vtanh.f32 %v2142_v25  ;;  %v3010_v28 = vmul.f32 -1.442695, %v2142_v25 }
0x2582   :  { %3799 = vpow2.f32 %v3010_v28 }
0x258a   :  { %v3798_v18 = vpop.eup %3797 }
0x258b   :  { %2152 = vrot.lane.b32.xlu0 %v3798_v18, %s3935_s12 }
0x258c   :  { %v3800_v22 = vpop.eup %3799 }
0x258d   :  { %v2146_v24 = vadd.f32 1.0, %v3800_v22 }
0x258f   :  { %3801 = vrcp.f32 %v2146_v24 }
0x2599   :  { %v3802_v37 = vpop.eup %3801 }
0x259a   :  { %v2150_v6 = vmul.f32 %v3802_v37, %v4492_v35 }
0x25fd   :  { %v2153_v4 = vpop.permute.xlu0 %2152 }
0x25fe   :  { %v2155_v5 = vmul.f32 %v3802_v37, %v2153_v4 }
0x2600   :  { %2157 = vrot.lane.b32.xlu1 %v2155_v5, %s3935_s12 }
0x2672   :  { %v2158_v7 = vpop.permute.xlu1 %2157 }
0x2673   :  { %v4656_v9 = vadd.f32 %v2158_v7, %v2150_v6 }
0x2675   :  { %3803 = vtanh.f32 %v4656_v9 }
0x267f   :  { %v3804_v38 = vpop.eup %3803 }
0x2680   :  { %2163 = vrot.lane.b32.xlu0 %v3804_v38, %s3935_s12 }
0x26f2   :  { %v2164_v10 = vpop.permute.xlu0 %2163 }
0x26f3   :  { %v4660_v16 = vmul.f32 %v3802_v37, %v2164_v10 }
0x26f5   :  { %v2167_v39 = vpack.c.bf16 %v4660_v16, %v4660_v16 }
0x26f7   :  { %2169 = vrot.lane.b32.xlu1 %v2167_v39, %s3936_s17 }
0x2769   :  { %v4665_v19 = vpop.permute.xlu1 %2169 }
0x276a   :  { %3573 = vmatmul.mubr.msk.bf16.vlgmr.msra.gmra.mrb[68].mxu1 %vm87_vm1, %v4665_v19  ;;  %3581 = vmatmul.mubr.msk.bf16.vlgmr.msra.gmra.mrb[72].mxu0 %vm87_vm1, %v4665_v19 }
0x276b   :  { %3585 = vmatpush3.bf16.msra.mxu1 %v4510_v42  ;;  %3600 = vmatprep.mubr.msk.bf16.mxu1 %vm3934_vm0, %v3933_v0 }
0x276c   :  { %3586 = vmatprep.subr.bf16.mxu1 %v3933_v0  ;;  %3605 = vmatpush3.bf16.msra.mxu0 %v4519_v45 }
0x276d   :  { %3606 = vmatprep.subr.bf16.mxu0 %v3933_v0  ;;  %3608 = vmatprep.mubr.msk.bf16.mxu0 %vm3934_vm0, %v3933_v0 }
0x276f   :  { %3587 = vmatpush3.bf16.msra.mxu1 %v4528_v46 }
0x2770   :  { %3588 = vmatprep.subr.bf16.mxu1 %v3933_v0  ;;  %3607 = vmatpush3.bf16.msra.mxu0 %v4535_v48 }
0x2771   :  { %3612 = vmatprep.subr.bf16.mxu0 %v3933_v0 }
0x2773   :  { %3589 = vmatpush3.bf16.msra.mxu1 %v4542_v51 }
0x2774   :  { %3590 = vmatprep.subr.bf16.mxu1 %v3933_v0 }
0x2777   :  { %3591 = vmatpush3.bf16.msra.mxu1 %v4549_v55 }
0x2778   :  { %3592 = vmatprep.subr.bf16.mxu1 %v3933_v0 }
0x277b   :  { %3593 = vmatpush3.bf16.msra.mxu1 %v4556_v56 }
0x277c   :  { %3594 = vmatprep.subr.bf16.mxu1 %v3933_v0 }
0x277f   :  { %3595 = vmatpush3.bf16.msra.mxu1 %v4563_v61 }
0x2780   :  { %3596 = vmatprep.subr.bf16.mxu1 %v3933_v0 }
0x2783   :  { %3597 = vmatpush3.bf16.msra.mxu1 %v4570_v62 }
0x2784   :  { %3598 = vmatprep.subr.bf16.mxu1 %v3933_v0 }
0x2787   :  { %3599 = vmatpush3.bf16.msra.mxu1 %v4577_v32 }
0x2788   :  { %3636 = vmatprep.subr.bf16.mxu1 %v3933_v0 }
0x283d   :  { %v4695_v12 = vpop.f32.mrb[68].mxu1  ;;  %v2293_v14 = vpop.f32.mrb[72].mxu0 }
0x283e   :  { %v2299_v15 = vadd.f32 %v2293_v14, %v2258_v2  ;;  %v3574_v25 = vpop.f32.mrb[69].mxu1  ;;  %v3582_v26 = vpop.f32.mrb[73].mxu0 }
0x283f   :  { %v2211_v18 = vpop.f32.mrb[70].mxu1  ;;  %v2296_v28 = vpop.f32.mrb[74].mxu0 }
0x2840   :  { %v3575_v22 = vpop.f32.mrb[71].mxu1  ;;  %v3583_v24 = vpop.f32.mrb[75].mxu0  ;;  %v2300_v37 = vsel %vm132_vm2, %v2299_v15, -inf }
0x2841   :  { %2301 = vmax.xlane.f32.xlu0 %v2300_v37 }
0x28ce   :  { %v2302_v4 = vpop.xlane.xlu0 %2301 }
0x28cf   :  { %v2303_v5 = vsub.f32 %v2299_v15, %v2302_v4 }
0x28d1   :  { %v2304_v6 = vmul.f32 1.442695, %v2303_v5 }
0x28d3   :  { %3805 = vpow2.f32 %v2304_v6 }
0x28dd   :  { %v3806_v7 = vpop.eup %3805 }
0x28de   :  { %v2306_v38 = vsel %vm132_vm2, %v3806_v7, 0.0 }
0x28df   :  { %2307 = vadd.xlane.f32.xlu1 %v2306_v38 }
0x296c   :  { %v2308_v10 = vpop.xlane.xlu1 %2307 }
0x296d   :  { %3807 = vrcp.f32 %v2308_v10 }
0x2977   :  { %v3808_v39 = vpop.eup %3807 }
0x2978   :  { %v4699_v14 = vmul.f32 %v3808_v39, %v3806_v7 }
0x297a   :  { %v2311_v25 = vpack.c.bf16 %v4699_v14, %v4699_v14 }
0x297c   :  { %3601 = vmatmul.mubr.bf16.vlgmr.msra.gmra.mrb[72].mxu1 %v2311_v25 }
0x297d   :  { %3637 = vmatpush3.bf16.msra.mxu1 %v4453_v43  ;;  %3640 = vmatprep.mubr.msk.bf16.mxu1 %vm3934_vm0, %v3933_v0  ;;  %v2397_v43 = vrot.slane %v2258_v2, 1 }
0x297e   :  { %3638 = vmatprep.subr.bf16.mxu1 %v3933_v0 }
0x2981   :  { %3639 = vmatpush3.bf16.msra.mxu1 %v4462_v50 }
0x2982   :  { %3664 = vmatprep.subr.bf16.mxu1 %v3933_v0 }
0x2a4f   :  { %v2346_v15 = vpop.f32.mrb[72].mxu1 }
0x2a50   :  { %v2352_v26 = vpack.c.bf16 %v2346_v15, %v2346_v15  ;;  %v3602_v18 = vpop.f32.mrb[73].mxu1 }
0x2a51   :  { %v2349_v28 = vpop.f32.mrb[74].mxu1 }
0x2a52   :  { %v3603_v22 = vpop.f32.mrb[75].mxu1  ;;  %3609 = vmatmul.mubr.msk.bf16.vlgmr.msra.gmra.mrb[76].mxu0 %vm87_vm1, %v2352_v26 }
0x2a53   :  { %3613 = vmatpush3.bf16.msra.mxu0 %v4599_v30  ;;  %3616 = vmatprep.mubr.msk.bf16.mxu0 %vm3934_vm0, %v3933_v0 }
0x2a54   :  { %3614 = vmatprep.subr.bf16.mxu0 %v3933_v0 }
0x2a57   :  { %3615 = vmatpush3.bf16.msra.mxu0 %v4608_v52 }
0x2a58   :  { %3620 = vmatprep.subr.bf16.mxu0 %v3933_v0 }
0x2a5a   :  { %3617 = vmatmul.mubr.msk.bf16.vlgmr.msra.gmra.mrb[80].mxu0 %vm87_vm1, %v4665_v19 }
0x2a5b   :  { %3621 = vmatpush3.bf16.msra.mxu0 %v4617_v23  ;;  %3624 = vmatprep.mubr.msk.bf16.mxu0 %vm3934_vm0, %v3933_v0 }
0x2a5c   :  { %3622 = vmatprep.subr.bf16.mxu0 %v3933_v0 }
0x2a5f   :  { %3623 = vmatpush3.bf16.msra.mxu0 %v4626_v41 }
0x2a60   :  { %3628 = vmatprep.subr.bf16.mxu0 %v3933_v0 }
0x2b25   :  { %v2390_v50 = vpop.f32.mrb[76].mxu0 }
0x2b26   :  { %v2399_v24 = vadd.f32 %v2397_v43, %v2390_v50  ;;  %v3610_v37 = vpop.f32.mrb[77].mxu0 }
0x2b27   :  { %v2393_v4 = vpop.f32.mrb[78].mxu0 }
0x2b28   :  { %3809 = vtanh.f32 %v2399_v24  ;;  %v3611_v5 = vpop.f32.mrb[79].mxu0 }
0x2b2d   :  { %v2436_v6 = vpop.f32.mrb[80].mxu0 }
0x2b2e   :  { %v3618_v19 = vpop.f32.mrb[81].mxu0 }
0x2b2f   :  { %v2439_v7 = vpop.f32.mrb[82].mxu0 }
0x2b30   :  { %v3619_v38 = vpop.f32.mrb[83].mxu0 }
0x2b32   :  { %v3810_v10 = vpop.eup %3809 }
0x2b33   :  { %v2401_v39 = vpack.c.bf16 %v3810_v10, %v3810_v10 }
0x2b35   :  { %3625 = vmatmul.mubr.msk.bf16.vlgmr.msra.gmra.mrb[84].mxu0 %vm87_vm1, %v2401_v39 }
0x2b36   :  { %3629 = vmatpush3.bf16.msra.mxu0 %v4634_v1  ;;  %3632 = vmatprep.mubr.msk.bf16.mxu0 %vm3934_vm0, %v3933_v0 }
0x2b37   :  { %3630 = vmatprep.subr.bf16.mxu0 %v3933_v0 }
0x2b3a   :  { %3631 = vmatpush3.bf16.msra.mxu0 %v4643_v57 }
0x2b3b   :  { %3644 = vmatprep.subr.bf16.mxu0 %v3933_v0 }
0x2c08   :  { %v2479_v2 = vpop.f32.mrb[84].mxu0 }
0x2c09   :  { %v2480_v25 = vadd.f32 %v2479_v2, %v2436_v6  ;;  %v3626_v15 = vpop.f32.mrb[85].mxu0 }
0x2c0a   :  { %v2482_v26 = vpop.f32.mrb[86].mxu0 }
0x2c0b   :  { %v2485_v18 = vadd.f32 %v4650_v21, %v2480_v25  ;;  %v3627_v28 = vpop.f32.mrb[87].mxu0 }
0x2c0d   :  { %3811 = vtanh.f32 %v2485_v18  ;;  %v3016_v43 = vmul.f32 -1.442695, %v2485_v18 }
0x2c0f   :  { %3813 = vpow2.f32 %v3016_v43 }
0x2c17   :  { %v3812_v22 = vpop.eup %3811 }
0x2c18   :  { %2495 = vrot.lane.b32.xlu0 %v3812_v22, %s3935_s12 }
0x2c19   :  { %v3814_v50 = vpop.eup %3813 }
0x2c1a   :  { %v2489_v24 = vadd.f32 1.0, %v3814_v50 }
0x2c1c   :  { %3815 = vrcp.f32 %v2489_v24 }
0x2c26   :  { %v3816_v37 = vpop.eup %3815 }
0x2c27   :  { %v2493_v6 = vmul.f32 %v3816_v37, %v4656_v9 }
0x2c8a   :  { %v2496_v4 = vpop.permute.xlu0 %2495 }
0x2c8b   :  { %v2498_v5 = vmul.f32 %v3816_v37, %v2496_v4 }
0x2c8d   :  { %2500 = vrot.lane.b32.xlu1 %v2498_v5, %s3935_s12 }
0x2cff   :  { %v2501_v19 = vpop.permute.xlu1 %2500 }
0x2d00   :  { %v4735_v7 = vadd.f32 %v2501_v19, %v2493_v6 }
0x2d02   :  { %3817 = vtanh.f32 %v4735_v7 }
0x2d0c   :  { %v3818_v38 = vpop.eup %3817 }
0x2d0d   :  { %2506 = vrot.lane.b32.xlu0 %v3818_v38, %s3935_s12 }
0x2d7f   :  { %v2507_v10 = vpop.permute.xlu0 %2506 }
0x2d80   :  { %v4739_v39 = vmul.f32 %v3816_v37, %v2507_v10 }
0x2d82   :  { %v2510_v2 = vpack.c.bf16 %v4739_v39, %v4739_v39 }
0x2d84   :  { %2512 = vrot.lane.b32.xlu1 %v2510_v2, %s3936_s17 }
0x2df6   :  { %v2513_v25 = vpop.permute.xlu1 %2512 }
0x2df7   :  { %3633 = vmatmul.mubr.msk.bf16.vlgmr.msra.gmra.mrb[88].mxu0 %vm87_vm1, %v2513_v25  ;;  %3641 = vmatmul.mubr.msk.bf16.vlgmr.msra.gmra.mrb[76].mxu1 %vm87_vm1, %v2513_v25 }
0x2df8   :  { %3645 = vmatpush3.bf16.msra.mxu0 %v4510_v42  ;;  %3660 = vmatprep.mubr.msk.bf16.mxu0 %vm3934_vm0, %v3933_v0  ;;  %v2601_v42 = vld [vmem:[#allocation2 + $0x7] ss:$8 sm:$0x3] }
0x2df9   :  { %3646 = vmatprep.subr.bf16.mxu0 %v3933_v0  ;;  %3665 = vmatpush3.bf16.msra.mxu1 %v4519_v45 }
0x2dfa   :  { %3666 = vmatprep.subr.bf16.mxu1 %v3933_v0  ;;  %3668 = vmatprep.mubr.msk.bf16.mxu1 %vm3934_vm0, %v3933_v0 }
0x2dfc   :  { %3647 = vmatpush3.bf16.msra.mxu0 %v4528_v46 }
0x2dfd   :  { %3648 = vmatprep.subr.bf16.mxu0 %v3933_v0  ;;  %3667 = vmatpush3.bf16.msra.mxu1 %v4535_v48 }
0x2dfe   :  { %3672 = vmatprep.subr.bf16.mxu1 %v3933_v0 }
0x2e00   :  { %3649 = vmatpush3.bf16.msra.mxu0 %v4542_v51 }
0x2e01   :  { %3650 = vmatprep.subr.bf16.mxu0 %v3933_v0 }
0x2e04   :  { %3651 = vmatpush3.bf16.msra.mxu0 %v4549_v55 }
0x2e05   :  { %3652 = vmatprep.subr.bf16.mxu0 %v3933_v0 }
0x2e08   :  { %3653 = vmatpush3.bf16.msra.mxu0 %v4556_v56 }
0x2e09   :  { %3654 = vmatprep.subr.bf16.mxu0 %v3933_v0 }
0x2e0c   :  { %3655 = vmatpush3.bf16.msra.mxu0 %v4563_v61 }
0x2e0d   :  { %3656 = vmatprep.subr.bf16.mxu0 %v3933_v0 }
0x2e10   :  { %3657 = vmatpush3.bf16.msra.mxu0 %v4570_v62 }
0x2e11   :  { %3658 = vmatprep.subr.bf16.mxu0 %v3933_v0 }
0x2e14   :  { %3659 = vmatpush3.bf16.msra.mxu0 %v4577_v32 }
0x2eca   :  { %v4769_v45 = vpop.f32.mrb[88].mxu0  ;;  %v2636_v46 = vpop.f32.mrb[76].mxu1 }
0x2ecb   :  { %v2642_v48 = vadd.f32 %v2636_v46, %v2601_v42  ;;  %v3634_v51 = vpop.f32.mrb[89].mxu0  ;;  %v3642_v55 = vpop.f32.mrb[77].mxu1 }
0x2ecc   :  { %v2554_v56 = vpop.f32.mrb[90].mxu0  ;;  %v2639_v15 = vpop.f32.mrb[78].mxu1 }
0x2ecd   :  { %v3635_v26 = vpop.f32.mrb[91].mxu0  ;;  %v3643_v18 = vpop.f32.mrb[79].mxu1  ;;  %v2643_v61 = vsel %vm132_vm2, %v2642_v48, -inf }
0x2ece   :  { %2644 = vmax.xlane.f32.xlu0 %v2643_v61 }
0x2f5b   :  { %v2645_v28 = vpop.xlane.xlu0 %2644 }
0x2f5c   :  { %v2646_v62 = vsub.f32 %v2642_v48, %v2645_v28 }
0x2f5e   :  { %v2647_v22 = vmul.f32 1.442695, %v2646_v62 }
0x2f60   :  { %3819 = vpow2.f32 %v2647_v22 }
0x2f6a   :  { %v3820_v43 = vpop.eup %3819 }
0x2f6b   :  { %v2649_v32 = vsel %vm132_vm2, %v3820_v43, 0.0 }
0x2f6c   :  { %2650 = vadd.xlane.f32.xlu1 %v2649_v32 }
0x2ff9   :  { %v2651_v50 = vpop.xlane.xlu1 %2650 }
0x2ffa   :  { %3821 = vrcp.f32 %v2651_v50 }
0x3004   :  { %v3822_v24 = vpop.eup %3821 }
0x3005   :  { %v4773_v37 = vmul.f32 %v3822_v24, %v3820_v43 }
0x3007   :  { %v2654_v4 = vpack.c.bf16 %v4773_v37, %v4773_v37 }
0x3009   :  { %3661 = vmatmul.mubr.bf16.vlgmr.msra.gmra.mrb[92].mxu0 %v2654_v4 }
0x30dc   :  { %v2689_v5 = vpop.f32.mrb[92].mxu0 }
0x30dd   :  { %v2695_v6 = vpack.c.bf16 %v2689_v5, %v2689_v5  ;;  %v3662_v19 = vpop.f32.mrb[93].mxu0 }
0x30de   :  { %v2692_v38 = vpop.f32.mrb[94].mxu0 }
0x30df   :  { %v3663_v10 = vpop.f32.mrb[95].mxu0  ;;  %3669 = vmatmul.mubr.msk.bf16.vlgmr.msra.gmra.mrb[80].mxu1 %vm87_vm1, %v2695_v6  ;;  %v4808_v6 = vld [vmem:[%s4994_s3 + $0x1] sm:$0x1]  ;;  %s3938_s3 = smov [#allocation5]  }
0x30e0   :  { %3673 = vmatpush3.bf16.msra.mxu1 %v4599_v30  ;;  %3676 = vmatprep.mubr.msk.bf16.mxu1 %vm3934_vm0, %v3933_v0  ;;  %v2740_v30 = vrot.slane %v2601_v42, 1  ;;  %v489_v19 = vadd.f32 %v4205_v33, %v4808_v6  ;;  %v837_v10 = vadd.f32 %v4284_v58, %v4808_v6  ;;  %v4829_v58 = vadd.f32 %v4581_v63, %v4808_v6 }
0x30e1   :  { %3674 = vmatprep.subr.bf16.mxu1 %v3933_v0 }
0x30e2   :  { %v494_v38 = vsel %vm132_vm2, %v489_v19, -inf }
0x30e4   :  { %3675 = vmatpush3.bf16.msra.mxu1 %v4608_v52 }
0x30e5   :  { %3680 = vmatprep.subr.bf16.mxu1 %v3933_v0 }
0x30e7   :  { %3677 = vmatmul.mubr.msk.bf16.vlgmr.msra.gmra.mrb[84].mxu1 %vm87_vm1, %v2513_v25 }
0x30e8   :  { %3681 = vmatpush3.bf16.msra.mxu1 %v4617_v23  ;;  %3684 = vmatprep.mubr.msk.bf16.mxu1 %vm3934_vm0, %v3933_v0 }
0x30e9   :  { %3682 = vmatprep.subr.bf16.mxu1 %v3933_v0 }
0x30ec   :  { %3683 = vmatpush3.bf16.msra.mxu1 %v4626_v41 }
0x30ed   :  { %3688 = vmatprep.subr.bf16.mxu1 %v3933_v0 }
0x31b2   :  { %v2733_v2 = vpop.f32.mrb[80].mxu1 }
0x31b3   :  { %v2742_v46 = vadd.f32 %v2740_v30, %v2733_v2  ;;  %v3670_v48 = vpop.f32.mrb[81].mxu1  ;;  %v842_v30 = vsel %vm132_vm2, %v837_v10, -inf }
0x31b4   :  { %v2736_v52 = vpop.f32.mrb[82].mxu1 }
0x31b5   :  { %3823 = vtanh.f32 %v2742_v46  ;;  %v3671_v51 = vpop.f32.mrb[83].mxu1  ;;  %v1871_v52 = vsel %vm132_vm2, %v4829_v58, -inf }
0x31ba   :  { %v2779_v55 = vpop.f32.mrb[84].mxu1 }
0x31bb   :  { %v3678_v25 = vpop.f32.mrb[85].mxu1 }
0x31bc   :  { %v2782_v56 = vpop.f32.mrb[86].mxu1 }
0x31bd   :  { %v3679_v23 = vpop.f32.mrb[87].mxu1 }
0x31bf   :  { %v3824_v15 = vpop.eup %3823 }
0x31c0   :  { %v2744_v26 = vpack.c.bf16 %v3824_v15, %v3824_v15 }
0x31c2   :  { %3685 = vmatmul.mubr.msk.bf16.vlgmr.msra.gmra.mrb[88].mxu1 %vm87_vm1, %v2744_v26 }
0x31c3   :  { %3689 = vmatpush3.bf16.msra.mxu1 %v4634_v1  ;;  %3692 = vmatprep.mubr.msk.bf16.mxu1 %vm3934_vm0, %v3933_v0 }
0x31c4   :  { %3690 = vmatprep.subr.bf16.mxu1 %v3933_v0 }
0x31c7   :  { %3691 = vmatpush3.bf16.msra.mxu1 %v4643_v57 }
0x3295   :  { %v2822_v41 = vpop.f32.mrb[88].mxu1 }
0x3296   :  { %v2823_v42 = vadd.f32 %v2822_v41, %v2779_v55  ;;  %v3686_v18 = vpop.f32.mrb[89].mxu1 }
0x3297   :  { %v2825_v61 = vpop.f32.mrb[90].mxu1 }
0x3298   :  { %v2828_v28 = vadd.f32 %v4650_v21, %v2823_v42  ;;  %v3687_v62 = vpop.f32.mrb[91].mxu1 }
0x329a   :  { %3825 = vtanh.f32 %v2828_v28  ;;  %v3022_v43 = vmul.f32 -1.442695, %v2828_v28 }
0x329c   :  { %3827 = vpow2.f32 %v3022_v43  ;;  %v4854_v43 = vadd.f32 %v4769_v45, %v4808_v6 }
0x32a4   :  { %v3826_v22 = vpop.eup %3825 }
0x32a5   :  { %2838 = vrot.lane.b32.xlu0 %v3826_v22, %s3935_s12  ;;  %v1523_v22 = vadd.f32 %v4442_v13, %v4808_v6  ;;  %v3937_v13 = vmov 1966171168  }
0x32a6   :  { %v3828_v1 = vpop.eup %3827 }
0x32a7   :  { %v2832_v32 = vadd.f32 1.0, %v3828_v1  ;;  %v1528_v1 = vsel %vm132_vm2, %v1523_v22, -inf }
0x32a9   :  { %3829 = vrcp.f32 %v2832_v32 }
0x32b3   :  { %v3830_v50 = vpop.eup %3829 }
0x32b4   :  { %v2836_v57 = vmul.f32 %v3830_v50, %v4735_v7 }
0x3317   :  { %v2839_v0 = vpop.permute.xlu0 %2838 }
0x3318   :  { %v2841_v24 = vmul.f32 %v3830_v50, %v2839_v0 }
0x331a   :  { %2843 = vrot.lane.b32.xlu1 %v2841_v24, %s3935_s12  ;;  %v522_v24 = vunpack.c.l.s4 %v3937_v13 }
0x338c   :  { %v2844_v4 = vpop.permute.xlu1 %2843 }
0x338d   :  { %v4801_v5 = vadd.f32 %v2844_v4, %v2836_v57  ;;  %v523_v57 = vunpack.c.0.s8 %v522_v24 }
0x338f   :  { %3831 = vtanh.f32 %v4801_v5 }
0x3399   :  { %v3832_v21 = vpop.eup %3831 }
0x339a   :  { %2849 = vrot.lane.b32.xlu0 %v3832_v21, %s3935_s12 }
0x33b9   :  { %495 = vmax.xlane.f32.xlu0 %v494_v38 }
0x33cf   :  { %507 = vrot.lane.b32.xlu0 %v4170_v27, %s3935_s12  ;;  %v1180_v27 = vadd.f32 %v4363_v44, %v4808_v6 }
0x33d1   :  { %v1185_v48 = vsel %vm132_vm2, %v1180_v27, -inf }
0x33ee   :  { %843 = vmax.xlane.f32.xlu0 %v842_v30 }
0x3404   :  { %855 = vrot.lane.b32.xlu0 %v4249_v53, %s3935_s12  ;;  %v4834_v53 = vadd.f32 %v4695_v12, %v4808_v6 }
0x3406   :  { %v2214_v51 = vsel %vm132_vm2, %v4834_v53, -inf }
0x340c   :  { %v2850_v2 = vpop.permute.xlu0 %2849 }
0x340d   :  { %v4820_v46 = vmul.f32 %v3830_v50, %v2850_v2 }
0x340f   :  { %v2853_v33 = vpack.c.bf16 %v4820_v46, %v4820_v46 }
0x3411   :  { %2855 = vrot.lane.b32.xlu1 %v2853_v33, %s3936_s17 }
0x3423   :  { %1186 = vmax.xlane.f32.xlu0 %v1185_v48 }
0x3427   :  { %1872 = vmax.xlane.f32.xlu0 %v1871_v52 }
0x342b   :  { %2215 = vmax.xlane.f32.xlu0 %v2214_v51 }
0x3446   :  { %v496_v44 = vpop.xlane.xlu0 %495 }
0x3447   :  { %v497_v55 = vsub.f32 %v489_v19, %v496_v44  ;;  %v4863_v19 = vsub.s32 %v523_v57, %v4145_v60 }
0x3449   :  { %v498_v25 = vmul.f32 1.442695, %v497_v55 }
0x344a   :  { %v508_v12 = vpop.permute.xlu0 %507 }
0x344b   :  { %3833 = vpow2.f32 %v498_v25 }
0x3455   :  { %v3834_v63 = vpop.eup %3833 }
0x3456   :  { %v500_v56 = vsel %vm132_vm2, %v3834_v63, 0.0 }
0x3457   :  { %501 = vadd.xlane.f32.xlu1 %v500_v56 }
0x3468   :  { %511 = vrot.lane.b32.xlu1 %v4152_v17, %s3935_s12 }
0x347b   :  { %v844_v23 = vpop.xlane.xlu0 %843 }
0x347c   :  { %v845_v15 = vsub.f32 %v837_v10, %v844_v23 }
0x347e   :  { %v846_v26 = vmul.f32 1.442695, %v845_v15 }
0x347f   :  { %v856_v61 = vpop.permute.xlu0 %855 }
0x3480   :  { %3835 = vpow2.f32 %v846_v26 }
0x3483   :  { %v2856_v41 = vpop.permute.xlu1 %2855 }
0x3484   :  { %3693 = vmatmul.mubr.msk.bf16.vlgmr.msra.gmra.mrb[92].mxu1 %vm87_vm1, %v2856_v41 }
0x348a   :  { %v3836_v42 = vpop.eup %3835 }
0x348b   :  { %v848_v18 = vsel %vm132_vm2, %v3836_v42, 0.0 }
0x348c   :  { %849 = vadd.xlane.f32.xlu1 %v848_v18 }
0x349d   :  { %859 = vrot.lane.b32.xlu1 %v4245_v49, %s3935_s12  ;;  %v2557_v49 = vsel %vm132_vm2, %v4854_v43, -inf }
0x34b0   :  { %v1187_v28 = vpop.xlane.xlu0 %1186 }
0x34b1   :  { %v4847_v62 = vsub.f32 %v1180_v27, %v1187_v28 }
0x34b3   :  { %v1189_v17 = vmul.f32 1.442695, %v4847_v62 }
0x34b5   :  { %3837 = vpow2.f32 %v1189_v17 }
0x34bf   :  { %v3838_v32 = vpop.eup %3837 }
0x34c0   :  { %v1191_v50 = vsel %vm132_vm2, %v3838_v32, 0.0 }
0x34c1   :  { %1529 = vmax.xlane.f32.xlu1 %v1528_v1 }
0x34c5   :  { %2558 = vmax.xlane.f32.xlu1 %v2557_v49 }
0x34c9   :  { %1192 = vadd.xlane.f32.xlu1 %v1191_v50 }
0x34da   :  { %1202 = vrot.lane.b32.xlu1 %v4324_v34, %s3935_s12 }
0x34e4   :  { %v502_v0 = vpop.xlane.xlu1 %501 }
0x34e5   :  { %3839 = vlog2.f32 %v502_v0 }
0x34e8   :  { %v512_v38 = vpop.permute.xlu1 %511 }
0x34ef   :  { %v3840_v45 = vpop.eup %3839 }
0x34f0   :  { %v504_v4 = vmul.f32 0.6931472, %v3840_v45 }
0x34f2   :  { %v505_v21 = vsub.f32 %v497_v55, %v504_v4 }
0x34f4   :  { %v515_v10 = vsel %vm514_vm3, %v505_v21, %v508_v12 }
0x34f5   :  { %v517_v30 = vsel %vm516_vm4, %v515_v10, %v512_v38 }
0x34f6   :  { %v520_v34 = vcombine.low %v517_v30, %v4089_v29 }
0x34f8   :  { %v527_v2 = vrot.slane %v520_v34, %v4863_v19 }
0x34fa   :  { %v534_v27 = vrot.slane %v527_v2, %v4863_v19 }
0x34fc   :  { %540 = vst.msk [vmem:[#allocation5] ss:$8 sm:$0x3] %vm4870_vm5, %v534_v27 }
0x3519   :  { %v850_v60 = vpop.xlane.xlu1 %849 }
0x351a   :  { %3841 = vlog2.f32 %v850_v60 }
0x351d   :  { %v860_v44 = vpop.permute.xlu1 %859 }
0x3524   :  { %v3842_v48 = vpop.eup %3841 }
0x3525   :  { %v852_v52 = vmul.f32 0.6931472, %v3842_v48 }
0x3527   :  { %v853_v51 = vsub.f32 %v845_v15, %v852_v52 }
0x3529   :  { %v862_v29 = vsel %vm514_vm3, %v853_v51, %v856_v61 }
0x352a   :  { %v863_v55 = vsel %vm516_vm4, %v862_v29, %v860_v44 }
0x352b   :  { %v866_v59 = vcombine.low %v863_v55, %v4209_v54 }
0x352d   :  { %v873_v25 = vrot.slane %v866_v59, %v4863_v19 }
0x352f   :  { %v880_v63 = vrot.slane %v873_v25, %v4863_v19 }
0x3531   :  { %883 = vst.msk [vmem:[#allocation5 + $0x1] ss:$8 sm:$0x3] %vm4870_vm5, %v880_v63 }
0x354e   :  { %v1530_v56 = vpop.xlane.xlu1 %1529 }
0x354f   :  { %v4884_v12 = vsub.f32 %v1523_v22, %v1530_v56 }
0x3551   :  { %v1532_v23 = vmul.f32 1.442695, %v4884_v12 }
0x3553   :  { %3843 = vpow2.f32 %v1532_v23 }
0x3557   :  { %v2894_v15 = vpop.f32.mrb[92].mxu1 }
0x3558   :  { %v2895_v26 = vadd.f32 %v2894_v15, %v4808_v6  ;;  %v3694_v41 = vpop.f32.mrb[93].mxu1  ;;  %v1873_v6 = vpop.xlane.xlu0 %1872 }
0x3559   :  { %v2897_v42 = vpop.f32.mrb[94].mxu1 }
0x355a   :  { %v3695_v18 = vpop.f32.mrb[95].mxu1  ;;  %v2900_v54 = vsel %vm132_vm2, %v2895_v26, -inf }
0x355b   :  { %2901 = vmax.xlane.f32.xlu0 %v2900_v54 }
0x355d   :  { %v3844_v61 = vpop.eup %3843 }
0x355e   :  { %v1534_v28 = vsel %vm132_vm2, %v3844_v61, 0.0 }
0x355f   :  { %1535 = vadd.xlane.f32.xlu1 %v1534_v28 }
0x3570   :  { %1884 = vrot.lane.b32.xlu1 %v4496_v36, %s3935_s12  ;;  %v2216_v36 = vpop.xlane.xlu0 %2215 }
0x3571   :  { %1198 = vrot.lane.b32.xlu0 %v4328_v40, %s3935_s12  ;;  %v4907_v40 = vsub.f32 %v4829_v58, %v1873_v6 }
0x3574   :  { %2227 = vrot.lane.b32.xlu1 %v4660_v16, %s3935_s12  ;;  %v4913_v16 = vsub.f32 %v4834_v53, %v2216_v36 }
0x3575   :  { %1541 = vrot.lane.b32.xlu0 %v4407_v20, %s3935_s12  ;;  %v1875_v20 = vmul.f32 1.442695, %v4907_v40 }
0x3577   :  { %3845 = vpow2.f32 %v1875_v20 }
0x3578   :  { %2570 = vrot.lane.b32.xlu1 %v4739_v39, %s3935_s12  ;;  %v2218_v39 = vmul.f32 1.442695, %v4913_v16 }
0x3579   :  { %1545 = vrot.lane.b32.xlu0 %v4403_v11, %s3935_s12  ;;  %v2559_v11 = vpop.xlane.xlu1 %2558 }
0x357a   :  { %3847 = vpow2.f32 %v2218_v39 }
0x357c   :  { %2913 = vrot.lane.b32.xlu1 %v4820_v46, %s3935_s12 }
0x357d   :  { %v1193_v1 = vpop.xlane.xlu1 %1192 }
0x3580   :  { %2231 = vrot.lane.b32.xlu1 %v4656_v9, %s3935_s12  ;;  %v4919_v9 = vsub.f32 %v4854_v43, %v2559_v11 }
0x3581   :  { %v1203_v32 = vpop.permute.xlu1 %1202 }
0x3582   :  { %v2561_v46 = vmul.f32 1.442695, %v4919_v9 }
0x3584   :  { %2574 = vrot.lane.b32.xlu1 %v4735_v7, %s3935_s12  ;;  %3849 = vpow2.f32 %v2561_v46  ;;  %v3846_v7 = vpop.eup %3845 }
0x3585   :  { %v1877_v58 = vsel %vm132_vm2, %v3846_v7, 0.0  ;;  %v3848_v17 = vpop.eup %3847  ;;  %3851 = vlog2.f32 %v1193_v1 }
0x3586   :  { %v2220_v53 = vsel %vm132_vm2, %v3848_v17, 0.0 }
0x3588   :  { %2917 = vrot.lane.b32.xlu1 %v4801_v5, %s3935_s12 }
0x358e   :  { %v3850_v22 = vpop.eup %3849 }
0x358f   :  { %v2563_v5 = vsel %vm132_vm2, %v3850_v22, 0.0  ;;  %v3852_v43 = vpop.eup %3851 }
0x3590   :  { %v1195_v49 = vmul.f32 0.6931472, %v3852_v43 }
0x3592   :  { %v1196_v13 = vsub.f32 %v4847_v62, %v1195_v49 }
0x3598   :  { %1878 = vadd.xlane.f32.xlu0 %v1877_v58 }
0x359c   :  { %2221 = vadd.xlane.f32.xlu0 %v2220_v53 }
0x35a0   :  { %2564 = vadd.xlane.f32.xlu0 %v2563_v5 }
0x35e8   :  { %v2902_v50 = vpop.xlane.xlu0 %2901 }
0x35e9   :  { %v4925_v0 = vsub.f32 %v2895_v26, %v2902_v50 }
0x35eb   :  { %v2904_v24 = vmul.f32 1.442695, %v4925_v0 }
0x35ec   :  { %v1536_v45 = vpop.xlane.xlu1 %1535  ;;  %v1199_v57 = vpop.permute.xlu0 %1198 }
0x35ed   :  { %3853 = vpow2.f32 %v2904_v24  ;;  %v1205_v4 = vsel %vm514_vm3, %v1196_v13, %v1199_v57 }
0x35ee   :  { %3855 = vlog2.f32 %v1536_v45  ;;  %v1206_v21 = vsel %vm516_vm4, %v1205_v4, %v1203_v32 }
0x35ef   :  { %v1209_v38 = vcombine.low %v1206_v21, %v4288_v31 }
0x35f0   :  { %v1542_v34 = vpop.permute.xlu0 %1541  ;;  %v1885_v59 = vpop.permute.xlu1 %1884 }
0x35f1   :  { %v1216_v10 = vrot.slane %v1209_v38, %v4863_v19 }
0x35f3   :  { %v1223_v30 = vrot.slane %v1216_v10, %v4863_v19 }
0x35f4   :  { %v1546_v51 = vpop.permute.xlu0 %1545  ;;  %v2228_v25 = vpop.permute.xlu1 %2227 }
0x35f5   :  { %1226 = vst.msk [vmem:[#allocation5 + $0x2] ss:$8 sm:$0x3] %vm4870_vm5, %v1223_v30 }
0x35f7   :  { %v3854_v62 = vpop.eup %3853 }
0x35f8   :  { %v3856_v2 = vpop.eup %3855  ;;  %v2906_v27 = vsel %vm132_vm2, %v3854_v62, 0.0 }
0x35f9   :  { %v1538_v60 = vmul.f32 0.6931472, %v3856_v2  ;;  %2907 = vadd.xlane.f32.xlu0 %v2906_v27 }
0x35fb   :  { %v1539_v48 = vsub.f32 %v4884_v12, %v1538_v60  ;;  %v2571_v12 = vpop.permute.xlu1 %2570 }
0x35fd   :  { %v1548_v52 = vsel %vm514_vm3, %v1539_v48, %v1542_v34 }
0x35fe   :  { %v1549_v31 = vsel %vm516_vm4, %v1548_v52, %v1546_v51 }
0x35ff   :  { %v1552_v44 = vcombine.low %v1549_v31, %v4367_v8  ;;  %v2914_v15 = vpop.permute.xlu1 %2913 }
0x3601   :  { %v1559_v29 = vrot.slane %v1552_v44, %v4863_v19 }
0x3603   :  { %v1566_v55 = vrot.slane %v1559_v29, %v4863_v19  ;;  %v2232_v41 = vpop.permute.xlu1 %2231 }
0x3605   :  { %1569 = vst.msk [vmem:[#allocation5 + $0x3] ss:$8 sm:$0x3] %vm4870_vm5, %v1566_v55 }
0x3607   :  { %v2575_v36 = vpop.permute.xlu1 %2574 }
0x360b   :  { %v2918_v13 = vpop.permute.xlu1 %2917 }
0x360f   :  { %1888 = vrot.lane.b32.xlu0 %v4492_v35, %s3935_s12  ;;  %s2949_s12 = sshll.u32 %s3938_s3, 4  ;;  %s2950_s12 = int_to_ptr.vmem [resolvable:$true] %s2949_s12 }
0x3610   :  { %s3906_s17 = scalar_lea.vmem %s2950_s12, 256  ;;  %p3911_p9 = scmp.lt.s32.totalorder %s2950_s12, %s2950_s12 }
0x3611   :  { %p3907_p8 = scmp.ne.s32.totalorder %s2950_s12, %s3906_s17  ;;  %p3912_p10 = scmp.lt.s32.totalorder %s3906_s17, %s3906_s17 }
0x3613   :  { %p3913_p11 = por %p3912_p10, %p3911_p9 }
0x3615   :  { %p3914_p12 = pnand %p3913_p11, %p3907_p8 }
0x3625   :  { %v1879_v63 = vpop.xlane.xlu0 %1878 }
0x3629   :  { %v2222_v56 = vpop.xlane.xlu0 %2221 }
0x362a   :  { %3857 = vlog2.f32 %v2222_v56 }
0x362d   :  { %v2565_v23 = vpop.xlane.xlu0 %2564 }
0x362e   :  { %3859 = vlog2.f32 %v2565_v23 }
0x362f   :  { %3861 = vlog2.f32 %v1879_v63 }
0x3634   :  { %v3858_v8 = vpop.eup %3857 }
0x3635   :  { %v2224_v26 = vmul.f32 0.6931472, %v3858_v8 }
0x3637   :  { %v2225_v42 = vsub.f32 %v4913_v16, %v2224_v26 }
0x3638   :  { %v3860_v18 = vpop.eup %3859 }
0x3639   :  { %v2234_v54 = vsel %vm514_vm3, %v2225_v42, %v2228_v25  ;;  %v2567_v61 = vmul.f32 0.6931472, %v3860_v18 }
0x363a   :  { %v2235_v35 = vsel %vm516_vm4, %v2234_v54, %v2232_v41 }
0x363b   :  { %v2238_v28 = vcombine.low %v2235_v35, %v4585_v3  ;;  %v2568_v6 = vsub.f32 %v4919_v9, %v2567_v61  ;;  %v3862_v9 = vpop.eup %3861 }
0x363c   :  { %v1881_v58 = vmul.f32 0.6931472, %v3862_v9 }
0x363d   :  { %v2245_v20 = vrot.slane %v2238_v28, %v4863_v19  ;;  %v2577_v11 = vsel %vm514_vm3, %v2568_v6, %v2571_v12 }
0x363e   :  { %v2578_v39 = vsel %vm516_vm4, %v2577_v11, %v2575_v36  ;;  %v1882_v17 = vsub.f32 %v4907_v40, %v1881_v58 }
0x363f   :  { %v2252_v46 = vrot.slane %v2245_v20, %v4863_v19  ;;  %v2581_v16 = vcombine.low %v2578_v39, %v4699_v14 }
0x3640   :  { %v1891_v22 = vsel %vm514_vm3, %v1882_v17, %v1885_v59 }
0x3641   :  { %2255 = vst.msk [vmem:[#allocation5 + $0x5] ss:$8 sm:$0x3] %vm4870_vm5, %v2252_v46  ;;  %v2588_v7 = vrot.slane %v2581_v16, %v4863_v19 }
0x3643   :  { %v2595_v3 = vrot.slane %v2588_v7, %v4863_v19 }
0x3645   :  { %2598 = vst.msk [vmem:[#allocation5 + $0x6] ss:$8 sm:$0x3] %vm4870_vm5, %v2595_v3 }
0x3686   :  { %v2908_v53 = vpop.xlane.xlu0 %2907 }
0x3687   :  { %3863 = vlog2.f32 %v2908_v53 }
0x368a   :  { %v1889_v14 = vpop.permute.xlu0 %1888 }
0x368b   :  { %v1892_v5 = vsel %vm516_vm4, %v1891_v22, %v1889_v14 }
0x368c   :  { %v1895_v1 = vcombine.low %v1892_v5, %v4446_v47 }
0x368e   :  { %v1902_v43 = vrot.slane %v1895_v1, %v4863_v19 }
0x3690   :  { %v1909_v49 = vrot.slane %v1902_v43, %v4863_v19 }
0x3691   :  { %v3864_v32 = vpop.eup %3863 }
0x3692   :  { %v2910_v50 = vmul.f32 0.6931472, %v3864_v32  ;;  %1912 = vst.msk [vmem:[#allocation5 + $0x4] ss:$8 sm:$0x3] %vm4870_vm5, %v1909_v49 }
0x3694   :  { %v2911_v40 = vsub.f32 %v4925_v0, %v2910_v50 }
0x3696   :  { %v2920_v24 = vsel %vm514_vm3, %v2911_v40, %v2914_v15 }
0x3697   :  { %v2921_v45 = vsel %vm516_vm4, %v2920_v24, %v2918_v13 }
0x3698   :  { %v2924_v57 = vcombine.low %v2921_v45, %v4773_v37 }
0x369a   :  { %v2931_v47 = vrot.slane %v2924_v57, %v4863_v19 }
0x369c   :  { %v2938_v4 = vrot.slane %v2931_v47, %v4863_v19 }
0x369e   :  { %2941 = vst.msk [vmem:[#allocation5 + $0x7] ss:$8 sm:$0x3] %vm4870_vm5, %v2938_v4 }
0x369f   :  { %3917 = shalt.err (!%p3914_p12)
}
0x36a0   :  { %s3918_s7 = scalar_lea.hbm %s4996_s5, 256 }
0x36a1   :  { %p3919_p13 = scmp.ne.s32.totalorder %s4996_s5, %s3918_s7  ;;  %p3922_p0 = scmp.lt.u32.totalorder %s3918_s7, %s4996_s5 }
0x36a3   :  { %p3924_p1 = pnand %p3922_p0, %p3919_p13 }
0x36a5   :  { %3927 = shalt.err (!%p3924_p1)
}
0x36a6   :  { %2952 = dma.vmem_to_hbm [thread:$0]  %s2950_s12, 256, %s4996_s5, [#allocation4]  }
0x36a7   :  { %3930 = dma.done.wait [#allocation4], 256  }
0x36a8   :  { %3931 = vsyncadd [#allocation4], 4294967040 }
0x36a9   :  { %2956 = vsyncpa [#allocation3], 1 }
0x36aa   :  { %2957 = vsyncpa [#allocation4], 1 }

</bundles_post_ra>
